<compile_context>
chip_gen: v5e
topology: v5e:2x2
jax: 0.10.0
libtpu: 0.0.40
codegen_flags: <defaults>
</compile_context>

<pallas_src>
import functools

import jax
import jax.numpy as jnp
from jax.experimental import pallas as pl
from jax.experimental.pallas import tpu as pltpu

LANES = 128
_MIB = 1024 * 1024
_RESIDENT_VMEM_BUDGET = 40 * _MIB   # conservative: fits v7x's 64 MiB physical
_VMEM_LIMIT_CAP = 56 * _MIB


def _round_up(n, m):
    return ((n + m - 1) // m) * m


def _vmem_limit(need_bytes):
    return int(min(_VMEM_LIMIT_CAP, max(32 * _MIB, need_bytes + 8 * _MIB)))


def _pick_block_rows(n_rows, requested):
    """Largest multiple-of-8 divisor of n_rows that is <= requested."""
    cap = min(requested, n_rows)
    if cap >= n_rows:
        return n_rows
    cap -= cap % 8
    for tm in range(cap, 7, -8):
        if n_rows % tm == 0:
            return tm
    # TODO(synk): for N not divisible by 8 (e.g. Cora's 2708) zero-pad the node
    # dimension in the wrapper instead of falling back to a single row block.
    return n_rows


# ----------------------------------------------------------------------------
# Kernels
# ----------------------------------------------------------------------------
def _fused_resident_kernel(adj_ref, z_ref, b1_ref, w2_ref, b2_ref, o_ref):
    """Whole forward with adj VMEM-resident (adj read from HBM exactly once)."""
    # Layer 1: h = relu(adj @ z + b1)
    h = jnp.dot(adj_ref[...], z_ref[...], preferred_element_type=jnp.float32)
    h = jnp.maximum(h + b1_ref[...], 0.0)
    # TODO(synk): dropout(p=0.5) is identity at inference; a training-mode
    # variant would draw a mask via pltpu.prng_seed + pltpu.prng_random_bits.
    # Layer-2 projection (narrow matmul), then second propagation.
    y = jnp.dot(h.astype(jnp.bfloat16), w2_ref[...],
                preferred_element_type=jnp.float32).astype(jnp.bfloat16)
    o_ref[...] = jnp.dot(adj_ref[...], y,
                         preferred_element_type=jnp.float32) + b2_ref[...]


def _layer1_kernel(adj_ref, z_ref, b1_ref, w2_ref, y_ref):
    """One adj row block: y_block = relu(adj_block @ z + b1) @ W2  (bf16 out)."""
    h = jnp.dot(adj_ref[...], z_ref[...], preferred_element_type=jnp.float32)
    h = jnp.maximum(h + b1_ref[...], 0.0)
    # TODO(synk): dropout identity at inference (see above).
    y_ref[...] = jnp.dot(h.astype(jnp.bfloat16), w2_ref[...],
                         preferred_element_type=jnp.float32).astype(y_ref.dtype)


def _layer2_kernel(adj_ref, y_ref, b2_ref, o_ref):
    """One adj row block: out_block = adj_block @ y + b2."""
    o_ref[...] = jnp.dot(adj_ref[...], y_ref[...],
                         preferred_element_type=jnp.float32) + b2_ref[...]


# ----------------------------------------------------------------------------
# Wrapper
# ----------------------------------------------------------------------------
@functools.partial(jax.jit, static_argnames=("block_rows", "adj_resident"))
def simplified_gcn(adj, x, w1, b1, w2, b2, *, block_rows=512, adj_resident=None):
    """adj: [N, N]; x: [N, Cin]; w1: [Cin, H]; b1: [H]; w2: [H, C]; b2: [C].

    Weights are stored pre-transposed ([fan_in, fan_out]) so Linear(x) == x@W+b.
    """
    N, cin = x.shape
    hidden = w1.shape[1]
    cout = w2.shape[1]
    hp = _round_up(hidden, LANES)   # lane-pad hidden dim
    op = _round_up(cout, LANES)     # lane-pad output dim

    # Zero-pad the small matrices so every MXU output is 128-lane dense.
    w1p = jnp.zeros((cin, hp), jnp.float32).at[:, :hidden].set(w1)
    b1p = jnp.zeros((1, hp), jnp.float32).at[:, :hidden].set(b1.reshape(1, -1))
    w2p = jnp.zeros((hp, op), jnp.float32).at[:hidden, :cout].set(w2)
    b2p = jnp.zeros((1, op), jnp.float32).at[:, :cout].set(b2.reshape(1, -1))

    # bf16 MXU operands (f32 accumulation in-kernel); biases stay f32.
    adj_b = adj.astype(jnp.bfloat16)
    w2_b = w2p.astype(jnp.bfloat16)

    # Projection z = x @ W1 hoisted to XLA: a tiny dense matmul that XLA runs at
    # roofline; keeps the wide x matrix out of kernel VMEM entirely.
    z = jnp.dot(x.astype(jnp.bfloat16), w1p.astype(jnp.bfloat16),
                preferred_element_type=jnp.float32).astype(jnp.bfloat16)

    # Conservative residency estimate (adj counted twice: pipeline buffer plus a
    # possibly materialized temporary for the two matmul reads).
    resident_need = (2 * N * N * 2          # adj
                     + N * hp * 2           # z
                     + N * hp * 4           # h (f32 intermediate)
                     + N * op * 2           # y (bf16 intermediate)
                     + N * op * 4           # out
                     + hp * op * 2 + 8 * (hp + op))
    if adj_resident is None:
        adj_resident = resident_need <= _RESIDENT_VMEM_BUDGET

    if adj_resident:
        # -------- Mode A: fused, everything VMEM-resident, adj read once. -----
        out = pl.pallas_call(
            _fused_resident_kernel,
            out_shape=jax.ShapeDtypeStruct((N, op), jnp.float32),
            compiler_params=pltpu.CompilerParams(
                vmem_limit_bytes=_vmem_limit(resident_need)),
        )(adj_b, z, b1p, w2_b, b2p)
        return out[:, :cout]

    # ---------- Mode B: two row-blocked calls, "parallel" row axis. -----------
    tm = _pick_block_rows(N, block_rows)
    assert N % tm == 0
    assert tm == N or tm % 8 == 0, "row block must be a multiple of 8"
    nb = N // tm

    streamed_need = (2 * tm * N * 2         # adj row block, double-buffered
                     + 2 * N * hp * 2       # z resident
                     + 2 * N * op * 2       # y resident (layer-2 call)
                     + 2 * hp * op * 2      # W2
                     + 2 * tm * op * 4      # f32 output block
                     + 2 * tm * op * 2      # bf16 y output block
                     + 8 * (hp + op))
    params = pltpu.CompilerParams(
        dimension_semantics=("parallel",),
        vmem_limit_bytes=_vmem_limit(streamed_need))

    # Layer 1: y = relu(adj @ z + b1) @ W2   (bf16, lane-dense (N, op)).
    y = pl.pallas_call(
        _layer1_kernel,
        out_shape=jax.ShapeDtypeStruct((N, op), jnp.bfloat16),
        grid_spec=pltpu.PrefetchScalarGridSpec(
            num_scalar_prefetch=0,
            grid=(nb,),
            in_specs=[
                pl.BlockSpec((tm, N), lambda i: (i, 0)),    # adj row block
                pl.BlockSpec((N, hp), lambda i: (0, 0)),    # z (resident)
                pl.BlockSpec((1, hp), lambda i: (0, 0)),    # b1
                pl.BlockSpec((hp, op), lambda i: (0, 0)),   # W2
            ],
            out_specs=pl.BlockSpec((tm, op), lambda i: (i, 0)),
        ),
        compiler_params=params,
    )(adj_b, z, b1p, w2_b)

    # Layer 2: out = adj @ y + b2.
    out = pl.pallas_call(
        _layer2_kernel,
        out_shape=jax.ShapeDtypeStruct((N, op), jnp.float32),
        grid_spec=pltpu.PrefetchScalarGridSpec(
            num_scalar_prefetch=0,
            grid=(nb,),
            in_specs=[
                pl.BlockSpec((tm, N), lambda i: (i, 0)),    # adj row block
                pl.BlockSpec((N, op), lambda i: (0, 0)),    # y (resident)
                pl.BlockSpec((1, op), lambda i: (0, 0)),    # b2
            ],
            out_specs=pl.BlockSpec((tm, op), lambda i: (i, 0)),
        ),
        compiler_params=params,
    )(adj_b, y, b2p)

    return out[:, :cout]


def init_linear(kw, kb, fan_in, fan_out):
    # PyTorch nn.Linear default init: U(-1/sqrt(fan_in), 1/sqrt(fan_in)).
    bound = 1.0 / jnp.sqrt(jnp.float32(fan_in))
    w = jax.random.uniform(kw, (fan_in, fan_out), jnp.float32, -bound, bound)
    b = jax.random.uniform(kb, (fan_out,), jnp.float32, -bound, bound)
    return w, b


if __name__ == "__main__":
    # Small, Cora-like shapes: N nodes, wide-ish input features, small hidden /
    # class count (hidden & output lanes are padded to 128 inside the wrapper).
    N = 512
    in_channels = 256
    hidden_channels = 32
    num_classes = 8

    key = jax.random.PRNGKey(0)
    k_x, k_adj, k_w1, k_b1, k_w2, k_b2 = jax.random.split(key, 6)

    x = jax.random.normal(k_x, (N, in_channels), jnp.float32)

    # Symmetric dense adjacency with self loops, row-normalized.
    a = (jax.random.uniform(k_adj, (N, N)) < 0.05).astype(jnp.float32)
    a = jnp.maximum(a, a.T) + jnp.eye(N, dtype=jnp.float32)
    adj = a / jnp.sum(a, axis=1, keepdims=True)

    w1, b1 = init_linear(k_w1, k_b1, in_channels, hidden_channels)
    w2, b2 = init_linear(k_w2, k_b2, hidden_channels, num_classes)

    # Auto mode (adj is VMEM-resident at this size) and forced streamed mode
    # (two row-blocked, parallel pallas_calls).  Both paths must agree.
    out = simplified_gcn(adj, x, w1, b1, w2, b2)
    out = jax.block_until_ready(out)
    out_streamed = simplified_gcn(adj, x, w1, b1, w2, b2,
                                  block_rows=128, adj_resident=False)
    out_streamed = jax.block_until_ready(out_streamed)
    assert out.shape == (N, num_classes)
    assert out_streamed.shape == (N, num_classes)

    # Reference 1: same bf16-operand / f32-accumulation math as the kernels
    # (tight tolerance).
    bf16, f32 = jnp.bfloat16, jnp.float32
    adj_bref = adj.astype(bf16)
    z_r = jnp.dot(x.astype(bf16), w1.astype(bf16),
                  preferred_element_type=f32).astype(bf16)
    h_r = jnp.maximum(jnp.dot(adj_bref, z_r, preferred_element_type=f32) + b1, 0.0)
    y_r = jnp.dot(h_r.astype(bf16), w2.astype(bf16),
                  preferred_element_type=f32).astype(bf16)
    ref_tight = jnp.dot(adj_bref, y_r, preferred_element_type=f32) + b2

    assert jnp.allclose(out, ref_tight, atol=2e-3, rtol=2e-3), (
        float(jnp.max(jnp.abs(out - ref_tight))))
    assert jnp.allclose(out_streamed, ref_tight, atol=2e-3, rtol=2e-3), (
        float(jnp.max(jnp.abs(out_streamed - ref_tight))))
    assert jnp.allclose(out, out_streamed, atol=2e-3, rtol=2e-3), (
        float(jnp.max(jnp.abs(out - out_streamed))))

    # Reference 2: original f32 PyTorch op order (dropout = identity in eval);
    # loose tolerance absorbs the bf16 operand casts.
    ref = adj @ x
    ref = jnp.maximum(ref @ w1 + b1, 0.0)
    ref = adj @ ref
    ref = ref @ w2 + b2
    assert jnp.allclose(out, ref, atol=1e-1, rtol=1e-1), (
        float(jnp.max(jnp.abs(out - ref))))

    print("KERNEL_OK")
</pallas_src>

<mosaic_0001>
module attributes {stable_mosaic.version = 11 : i64} {
  func.func @_fused_resident_kernel(%arg0: memref<512x512xbf16, #tpu.memory_space<vmem>>, %arg1: memref<512x128xbf16, #tpu.memory_space<vmem>>, %arg2: memref<1x128xf32, #tpu.memory_space<vmem>>, %arg3: memref<128x128xbf16, #tpu.memory_space<vmem>>, %arg4: memref<1x128xf32, #tpu.memory_space<vmem>>, %arg5: memref<512x128xf32, #tpu.memory_space<vmem>>) attributes {dimension_semantics = [], scalar_prefetch = 0 : i64, scratch_operands = 0 : i64, tpu.core_type = #tpu.core_type<tc>} {
    %c0 = arith.constant 0 : index
    %c0_0 = arith.constant 0 : index
    %0 = vector.load %arg0[%c0, %c0_0] : memref<512x512xbf16, #tpu.memory_space<vmem>>, vector<512x512xbf16>
    %c0_1 = arith.constant 0 : index
    %c0_2 = arith.constant 0 : index
    %1 = vector.load %arg1[%c0_1, %c0_2] : memref<512x128xbf16, #tpu.memory_space<vmem>>, vector<512x128xbf16>
    %cst = arith.constant dense<0.000000e+00> : vector<512x128xf32>
    %2 = tpu.matmul %0, %1, %cst {dimension_numbers = #tpu.dot_dimension_numbers<[1], [0], [0], [1], [0, 0, 1, 1], [], []>} : vector<512x512xbf16>, vector<512x128xbf16>, vector<512x128xf32> -> vector<512x128xf32>
    %c0_3 = arith.constant 0 : index
    %c0_4 = arith.constant 0 : index
    %3 = vector.load %arg2[%c0_3, %c0_4] : memref<1x128xf32, #tpu.memory_space<vmem>>, vector<1x128xf32>
    %4 = vector.broadcast %3 : vector<1x128xf32> to vector<512x128xf32>
    %5 = arith.addf %2, %4 : vector<512x128xf32>
    %cst_5 = arith.constant 0.000000e+00 : f32
    %6 = vector.broadcast %cst_5 : f32 to vector<512x128xf32>
    %7 = arith.maximumf %5, %6 : vector<512x128xf32>
    %8 = arith.truncf %7 : vector<512x128xf32> to vector<512x128xbf16>
    %c0_6 = arith.constant 0 : index
    %c0_7 = arith.constant 0 : index
    %9 = vector.load %arg3[%c0_6, %c0_7] : memref<128x128xbf16, #tpu.memory_space<vmem>>, vector<128x128xbf16>
    %cst_8 = arith.constant dense<0.000000e+00> : vector<512x128xf32>
    %10 = tpu.matmul %8, %9, %cst_8 {dimension_numbers = #tpu.dot_dimension_numbers<[1], [0], [0], [1], [0, 0, 1, 1], [], []>} : vector<512x128xbf16>, vector<128x128xbf16>, vector<512x128xf32> -> vector<512x128xf32>
    %11 = arith.truncf %10 : vector<512x128xf32> to vector<512x128xbf16>
    %c0_9 = arith.constant 0 : index
    %c0_10 = arith.constant 0 : index
    %12 = vector.load %arg0[%c0_9, %c0_10] : memref<512x512xbf16, #tpu.memory_space<vmem>>, vector<512x512xbf16>
    %cst_11 = arith.constant dense<0.000000e+00> : vector<512x128xf32>
    %13 = tpu.matmul %12, %11, %cst_11 {dimension_numbers = #tpu.dot_dimension_numbers<[1], [0], [0], [1], [0, 0, 1, 1], [], []>} : vector<512x512xbf16>, vector<512x128xbf16>, vector<512x128xf32> -> vector<512x128xf32>
    %c0_12 = arith.constant 0 : index
    %c0_13 = arith.constant 0 : index
    %14 = vector.load %arg4[%c0_12, %c0_13] : memref<1x128xf32, #tpu.memory_space<vmem>>, vector<1x128xf32>
    %15 = vector.broadcast %14 : vector<1x128xf32> to vector<512x128xf32>
    %16 = arith.addf %13, %15 : vector<512x128xf32>
    %c0_14 = arith.constant 0 : index
    %c0_15 = arith.constant 0 : index
    %17 = vector.load %arg5[%c0_14, %c0_15] : memref<512x128xf32, #tpu.memory_space<vmem>>, vector<512x128xf32>
    tpu.vector_store %arg5[%c0_14, %c0_15], %16 {strides = array<i32>} : memref<512x128xf32, #tpu.memory_space<vmem>>, vector<512x128xf32>,
    return
  }
}

</mosaic_0001>

<bundles_post_ra>
// kernel: simplified_gcn.1
= control target key start
LH: loop header
LB: loop body
LE: loop exit
PB: predicated region body
PF: predicated region fallthrough
CT: control target
= control target key end

     0   :  { %s5756_s1 = inlined_call_operand.vmem [shape: bf16[512,128], index: 1, kind: input, shape index: {}]   ;;  %s5757_s2 = inlined_call_operand.vmem [shape: f32[1,128], index: 2, kind: input, shape index: {}]   ;;  %s5758_s0 = inlined_call_operand.vmem [shape: bf16[512,512], index: 0, kind: input, shape index: {}]   ;;  %s5759_s3 = inlined_call_operand.vmem [shape: bf16[128,128], index: 3, kind: input, shape index: {}]   ;;  %s5760_s4 = inlined_call_operand.vmem [shape: f32[1,128], index: 4, kind: input, shape index: {}]   ;;  %s5761_s5 = inlined_call_operand.vmem [shape: f32[512,128], index: 5, kind: output, shape index: {}]  }
   0x1   :  { %v3640_v0 = vld [vmem:[%s5756_s1 + $0x38] sm:$0xff]  ;;  %v3639_v1 = vld [vmem:[%s5756_s1 + $0x30] sm:$0xff]  ;;  %v3638_v2 = vld [vmem:[%s5756_s1 + $0x28] sm:$0xff] }
   0x2   :  { %3673 = vmatpush.bf16.msra.mxu1 %v3640_v0  ;;  %3674 = vmatpush.bf16.msra.mxu2 %v3640_v0  ;;  %v3637_v3 = vld [vmem:[%s5756_s1 + $0x20] sm:$0xff]  ;;  %v3636_v4 = vld [vmem:[%s5756_s1 + $0x18] sm:$0xff]  ;;  %v3635_v5 = vld [vmem:[%s5756_s1 + $0x10] sm:$0xff] }
   0x3   :  { %3675 = vmatpush.bf16.msra.mxu3 %v3640_v0  ;;  %1048 = vmatpush.bf16.msra.mxu0 %v3640_v0  ;;  %v3634_v6 = vld [vmem:[%s5756_s1 + $0x8] sm:$0xff]  ;;  %v3633_v7 = vld [vmem:[%s5756_s1] sm:$0xff]  ;;  %v3539_v9 = vld [vmem:[%s5758_s0 + $0x10c] sm:$0xf0] }
   0x4   :  { %v2963_v8 = vld [vmem:[%s5758_s0 + $0x100] sm:$0xf]  ;;  %v3571_v11 = vld [vmem:[%s5758_s0 + $0x20c] sm:$0xf0]  ;;  %v3648_v53 = vld [vmem:[%s5756_s1 + $0x78] sm:$0xff] }
   0x5   :  { %v3091_v10 = vld [vmem:[%s5758_s0 + $0x200] sm:$0xf]  ;;  %v3603_v13 = vld [vmem:[%s5758_s0 + $0x30c] sm:$0xf0]  ;;  %v3773_v14 = vor.u32 %v3539_v9, %v2963_v8  ;;  %v3656_v54 = vld [vmem:[%s5756_s1 + $0xb8] sm:$0xff] }
   0x6   :  { %3676 = vmatpush.bf16.msra.mxu1 %v3639_v1  ;;  %3677 = vmatpush.bf16.msra.mxu2 %v3639_v1  ;;  %v3219_v12 = vld [vmem:[%s5758_s0 + $0x300] sm:$0xf]  ;;  %v3775_v15 = vor.u32 %v3571_v11, %v3091_v10  ;;  %v3543_v18 = vld [vmem:[%s5758_s0 + $0x12c] sm:$0xf0]  ;;  %v3664_v55 = vld [vmem:[%s5756_s1 + $0xf8] sm:$0xff] }
   0x7   :  { %3678 = vmatpush.bf16.msra.mxu3 %v3639_v1  ;;  %1049 = vmatpush.bf16.msra.mxu0 %v3639_v1  ;;  %5866 = vst [vmem:[#allocation2_spill] sm:$0xff] %v3773_v14  ;;  %v3777_v16 = vor.u32 %v3603_v13, %v3219_v12  ;;  %v2979_v17 = vld [vmem:[%s5758_s0 + $0x120] sm:$0xf]  ;;  %v3575_v20 = vld [vmem:[%s5758_s0 + $0x22c] sm:$0xf0]  ;;  %v3646_v59 = vld [vmem:[%s5756_s1 + $0x68] sm:$0xff] }
   0x8   :  { %5867 = vst [vmem:[#allocation3_spill] sm:$0xff] %v3775_v15  ;;  %v3107_v19 = vld [vmem:[%s5758_s0 + $0x220] sm:$0xf]  ;;  %v3607_v22 = vld [vmem:[%s5758_s0 + $0x32c] sm:$0xf0]  ;;  %v3800_v23 = vor.u32 %v3543_v18, %v2979_v17  ;;  %v3654_v60 = vld [vmem:[%s5756_s1 + $0xa8] sm:$0xff] }
   0x9   :  { %5868 = vst [vmem:[#allocation4_spill] sm:$0xff] %v3777_v16  ;;  %v3235_v21 = vld [vmem:[%s5758_s0 + $0x320] sm:$0xf]  ;;  %v3802_v24 = vor.u32 %v3575_v20, %v3107_v19  ;;  %v3547_v27 = vld [vmem:[%s5758_s0 + $0x14c] sm:$0xf0]  ;;  %v3662_v61 = vld [vmem:[%s5756_s1 + $0xe8] sm:$0xff] }
   0xa   :  { %3679 = vmatpush.bf16.msra.mxu1 %v3638_v2  ;;  %3680 = vmatpush.bf16.msra.mxu2 %v3638_v2  ;;  %5869 = vst [vmem:[#allocation5_spill] sm:$0xff] %v3800_v23  ;;  %v3804_v25 = vor.u32 %v3607_v22, %v3235_v21  ;;  %v2995_v26 = vld [vmem:[%s5758_s0 + $0x140] sm:$0xf]  ;;  %v3579_v29 = vld [vmem:[%s5758_s0 + $0x24c] sm:$0xf0]  ;;  %v3644_v10 = vld [vmem:[%s5756_s1 + $0x58] sm:$0xff] }
   0xb   :  { %3681 = vmatpush.bf16.msra.mxu3 %v3638_v2  ;;  %1050 = vmatpush.bf16.msra.mxu0 %v3638_v2  ;;  %5870 = vst [vmem:[#allocation6_spill] sm:$0xff] %v3802_v24  ;;  %v3123_v28 = vld [vmem:[%s5758_s0 + $0x240] sm:$0xf]  ;;  %v3611_v31 = vld [vmem:[%s5758_s0 + $0x34c] sm:$0xf0]  ;;  %v3827_v32 = vor.u32 %v3547_v27, %v2995_v26  ;;  %v3652_v11 = vld [vmem:[%s5756_s1 + $0x98] sm:$0xff] }
   0xc   :  { %5871 = vst [vmem:[#allocation7_spill] sm:$0xff] %v3804_v25  ;;  %v3251_v30 = vld [vmem:[%s5758_s0 + $0x340] sm:$0xf]  ;;  %v3829_v33 = vor.u32 %v3579_v29, %v3123_v28  ;;  %v3551_v36 = vld [vmem:[%s5758_s0 + $0x16c] sm:$0xf0]  ;;  %v3660_v12 = vld [vmem:[%s5756_s1 + $0xd8] sm:$0xff] }
   0xd   :  { %5872 = vst [vmem:[#allocation8_spill] sm:$0xff] %v3827_v32  ;;  %v3831_v34 = vor.u32 %v3611_v31, %v3251_v30  ;;  %v3011_v35 = vld [vmem:[%s5758_s0 + $0x160] sm:$0xf]  ;;  %v3583_v38 = vld [vmem:[%s5758_s0 + $0x26c] sm:$0xf0]  ;;  %v3642_v22 = vld [vmem:[%s5756_s1 + $0x48] sm:$0xff] }
   0xe   :  { %3682 = vmatpush.bf16.msra.mxu1 %v3637_v3  ;;  %3683 = vmatpush.bf16.msra.mxu2 %v3637_v3  ;;  %5873 = vst [vmem:[#allocation9_spill] sm:$0xff] %v3829_v33  ;;  %v3139_v37 = vld [vmem:[%s5758_s0 + $0x260] sm:$0xf]  ;;  %v3615_v40 = vld [vmem:[%s5758_s0 + $0x36c] sm:$0xf0]  ;;  %v3854_v41 = vor.u32 %v3551_v36, %v3011_v35  ;;  %v3650_v26 = vld [vmem:[%s5756_s1 + $0x88] sm:$0xff] }
   0xf   :  { %3684 = vmatpush.bf16.msra.mxu3 %v3637_v3  ;;  %1051 = vmatpush.bf16.msra.mxu0 %v3637_v3  ;;  %5874 = vst [vmem:[#allocation10_spill] sm:$0xff] %v3831_v34  ;;  %v3267_v39 = vld [vmem:[%s5758_s0 + $0x360] sm:$0xf]  ;;  %v3856_v42 = vor.u32 %v3583_v38, %v3139_v37  ;;  %v3555_v45 = vld [vmem:[%s5758_s0 + $0x18c] sm:$0xf0]  ;;  %v3658_v27 = vld [vmem:[%s5756_s1 + $0xc8] sm:$0xff] }
  0x10   :  { %5875 = vst [vmem:[#allocation11_spill] sm:$0xff] %v3854_v41  ;;  %v3858_v43 = vor.u32 %v3615_v40, %v3267_v39  ;;  %v3027_v44 = vld [vmem:[%s5758_s0 + $0x180] sm:$0xf]  ;;  %v3587_v47 = vld [vmem:[%s5758_s0 + $0x28c] sm:$0xf0] }
  0x11   :  { %5876 = vst [vmem:[#allocation12_spill] sm:$0xff] %v3856_v42  ;;  %v3155_v46 = vld [vmem:[%s5758_s0 + $0x280] sm:$0xf]  ;;  %v3619_v49 = vld [vmem:[%s5758_s0 + $0x38c] sm:$0xf0]  ;;  %v3881_v50 = vor.u32 %v3555_v45, %v3027_v44 }
  0x12   :  { %3685 = vmatpush.bf16.msra.mxu1 %v3636_v4  ;;  %3686 = vmatpush.bf16.msra.mxu2 %v3636_v4  ;;  %5877 = vst [vmem:[#allocation13_spill] sm:$0xff] %v3858_v43  ;;  %v3283_v48 = vld [vmem:[%s5758_s0 + $0x380] sm:$0xf]  ;;  %v3883_v51 = vor.u32 %v3587_v47, %v3155_v46  ;;  %v3647_v56 = vld [vmem:[%s5756_s1 + $0x70] sm:$0xff] }
  0x13   :  { %3687 = vmatpush.bf16.msra.mxu3 %v3636_v4  ;;  %1052 = vmatpush.bf16.msra.mxu0 %v3636_v4  ;;  %5878 = vst [vmem:[#allocation14_spill] sm:$0xff] %v3881_v50  ;;  %v3885_v52 = vor.u32 %v3619_v49, %v3283_v48  ;;  %v3655_v57 = vld [vmem:[%s5756_s1 + $0xb0] sm:$0xff]  ;;  %v3043_v62 = vld [vmem:[%s5758_s0 + $0x1a0] sm:$0xf] }
  0x14   :  { %5879 = vst [vmem:[#allocation15_spill] sm:$0xff] %v3883_v51  ;;  %v3663_v58 = vld [vmem:[%s5756_s1 + $0xf0] sm:$0xff]  ;;  %v3171_v0 = vld [vmem:[%s5758_s0 + $0x2a0] sm:$0xf] }
  0x15   :  { %5880 = vst [vmem:[#allocation16_spill] sm:$0xff] %v3885_v52  ;;  %v3559_v63 = vld [vmem:[%s5758_s0 + $0x1ac] sm:$0xf0]  ;;  %v3299_v2 = vld [vmem:[%s5758_s0 + $0x3a0] sm:$0xf] }
  0x16   :  { %3688 = vmatpush.bf16.msra.mxu1 %v3635_v5  ;;  %3689 = vmatpush.bf16.msra.mxu2 %v3635_v5  ;;  %v3591_v1 = vld [vmem:[%s5758_s0 + $0x2ac] sm:$0xf0]  ;;  %v3645_v4 = vld [vmem:[%s5756_s1 + $0x60] sm:$0xff] }
  0x17   :  { %3690 = vmatpush.bf16.msra.mxu3 %v3635_v5  ;;  %1053 = vmatpush.bf16.msra.mxu0 %v3635_v5  ;;  %v3623_v3 = vld [vmem:[%s5758_s0 + $0x3ac] sm:$0xf0]  ;;  %v3653_v5 = vld [vmem:[%s5756_s1 + $0xa0] sm:$0xff]  ;;  %v3946_v8 = vor.u32 %v3591_v1, %v3171_v0  ;;  %v2837_v1 = vld [vmem:[%s5758_s0 + $0x10] sm:$0xf0] }
  0x18   :  { %v3948_v9 = vor.u32 %v3623_v3, %v3299_v2  ;;  %v3643_v13 = vld [vmem:[%s5756_s1 + $0x50] sm:$0xff]  ;;  %v2835_v19 = vld [vmem:[%s5758_s0] sm:$0xf]  ;;  %v3505_v0 = vld [vmem:[%s5758_s0 + $0x4] sm:$0xf] }
  0x19   :  { %5882 = vst [vmem:[#allocation18_spill] sm:$0xff] %v3946_v8  ;;  %v3651_v17 = vld [vmem:[%s5756_s1 + $0x90] sm:$0xff]  ;;  %v3059_v28 = vld [vmem:[%s5758_s0 + $0x1c0] sm:$0xf]  ;;  %v2843_v2 = vld [vmem:[%s5758_s0 + $0x8] sm:$0xf] }
  0x1a   :  { %3691 = vmatpush.bf16.msra.mxu1 %v3634_v6  ;;  %3692 = vmatpush.bf16.msra.mxu2 %v3634_v6  ;;  %5883 = vst [vmem:[#allocation19_spill] sm:$0xff] %v3948_v9  ;;  %v3659_v18 = vld [vmem:[%s5756_s1 + $0xd0] sm:$0xff]  ;;  %v3187_v30 = vld [vmem:[%s5758_s0 + $0x2c0] sm:$0xf]  ;;  %v3508_v3 = vld [vmem:[%s5758_s0 + $0x14] sm:$0xf0] }
  0x1b   :  { %3693 = vmatpush.bf16.msra.mxu3 %v3634_v6  ;;  %1054 = vmatpush.bf16.msra.mxu0 %v3634_v6  ;;  %v3661_v6 = vld [vmem:[%s5756_s1 + $0xe0] sm:$0xff]  ;;  %v3507_v20 = vld [vmem:[%s5758_s0 + $0xc] sm:$0xf0] }
  0x1c   :  { %v3977_v21 = vor.u32 %v3507_v20, %v2835_v19  ;;  %v3563_v29 = vld [vmem:[%s5758_s0 + $0x1cc] sm:$0xf0]  ;;  %v3315_v35 = vld [vmem:[%s5758_s0 + $0x3c0] sm:$0xf] }
  0x1d   :  { %v3595_v31 = vld [vmem:[%s5758_s0 + $0x2cc] sm:$0xf0]  ;;  %v4007_v37 = vor.u32 %v3563_v29, %v3059_v28  ;;  %v3641_v39 = vld [vmem:[%s5756_s1 + $0x40] sm:$0xff]  ;;  %v2859_v28 = vld [vmem:[%s5758_s0 + $0x28] sm:$0xf] }
  0x1e   :  { %3694 = vmatpush.bf16.msra.mxu1 %v3633_v7  ;;  %3695 = vmatpush.bf16.msra.mxu2 %v3633_v7  ;;  %v3627_v36 = vld [vmem:[%s5758_s0 + $0x3cc] sm:$0xf0]  ;;  %v4009_v38 = vor.u32 %v3595_v31, %v3187_v30  ;;  %v3649_v40 = vld [vmem:[%s5756_s1 + $0x80] sm:$0xff]  ;;  %v3512_v29 = vld [vmem:[%s5758_s0 + $0x34] sm:$0xf0] }
  0x1f   :  { %3696 = vmatpush.bf16.msra.mxu3 %v3633_v7  ;;  %1055 = vmatpush.bf16.msra.mxu0 %v3633_v7  ;;  %v3944_v7 = vor.u32 %v3559_v63, %v3043_v62  ;;  %5884 = vst [vmem:[#allocation20_spill] sm:$0xff] %v4007_v37  ;;  %v3657_v44 = vld [vmem:[%s5756_s1 + $0xc0] sm:$0xff]  ;;  %v4020_v45 = vor.u32 %v3627_v36, %v3315_v35  ;;  %v3511_v47 = vld [vmem:[%s5758_s0 + $0x2c] sm:$0xf0]  ;;  %v3510_v30 = vld [vmem:[%s5758_s0 + $0x2c] sm:$0xf] }
  0x20   :  { %5885 = vst [vmem:[#allocation21_spill] sm:$0xff] %v4009_v38  ;;  %v2851_v46 = vld [vmem:[%s5758_s0 + $0x20] sm:$0xf]  ;;  %v3515_v62 = vld [vmem:[%s5758_s0 + $0x4c] sm:$0xf0] }
  0x21   :  { %1096 = vmatmul.bf16.vlgmr.msra.gmra.mxu1 %v3773_v14  ;;  %1136 = vmatmul.bf16.vlgmr.msra.gmra.mxu2 %v3775_v15  ;;  %5881 = vst [vmem:[#allocation17_spill] sm:$0xff] %v3944_v7  ;;  %v4031_v48 = vor.u32 %v3511_v47, %v2851_v46  ;;  %v3075_v49 = vld [vmem:[%s5758_s0 + $0x1e0] sm:$0xf]  ;;  %v3519_v20 = vld [vmem:[%s5758_s0 + $0x6c] sm:$0xf0] }
  0x22   :  { %1176 = vmatmul.bf16.vlgmr.msra.gmra.mxu3 %v3777_v16  ;;  %1217 = vmatpush.bf16.msrb.mxu1 %v3648_v53  ;;  %5886 = vst [vmem:[#allocation22_spill] sm:$0xff] %v4020_v45  ;;  %v3567_v53 = vld [vmem:[%s5758_s0 + $0x1ec] sm:$0xf0]  ;;  %v2883_v19 = vld [vmem:[%s5758_s0 + $0x60] sm:$0xf] }
  0x23   :  { %1386 = vmatpush.bf16.msrb.mxu2 %v3656_v54  ;;  %1555 = vmatpush.bf16.msrb.mxu3 %v3664_v55  ;;  %v3203_v54 = vld [vmem:[%s5758_s0 + $0x2e0] sm:$0xf]  ;;  %v3599_v55 = vld [vmem:[%s5758_s0 + $0x2ec] sm:$0xf0]  ;;  %v2861_v31 = vld [vmem:[%s5758_s0 + $0x38] sm:$0xf0] }
  0x24   :  { %1056 = vmatmul.bf16.vlgmr.msra.gmra.mxu0 %v3977_v21  ;;  %v4142_v46 = vor.u32 %v3510_v30, %v2861_v31  ;;  %v2915_v30 = vld [vmem:[%s5758_s0 + $0xa0] sm:$0xf]  ;;  %v3527_v31 = vld [vmem:[%s5758_s0 + $0xac] sm:$0xf0] }
  0x26   :  { %1218 = vmatpush.bf16.msrb.mxu1 %v3647_v56  ;;  %v3331_v56 = vld [vmem:[%s5758_s0 + $0x3e0] sm:$0xf]  ;;  %5896 = vst [vmem:[#allocation32_spill] sm:$0xff] %v4142_v46 }
  0x27   :  { %1387 = vmatpush.bf16.msrb.mxu2 %v3655_v57  ;;  %1556 = vmatpush.bf16.msrb.mxu3 %v3663_v58  ;;  %v3631_v57 = vld [vmem:[%s5758_s0 + $0x3ec] sm:$0xf0]  ;;  %v4052_v58 = vor.u32 %v3567_v53, %v3075_v49 }
  0x29   :  { %5887 = vst [vmem:[#allocation23_spill] sm:$0xff] %v4052_v58 }
  0x2a   :  { %1219 = vmatpush.bf16.msrb.mxu1 %v3646_v59  ;;  %v4054_v59 = vor.u32 %v3599_v55, %v3203_v54  ;;  %v2899_v54 = vld [vmem:[%s5758_s0 + $0x80] sm:$0xf]  ;;  %v3523_v55 = vld [vmem:[%s5758_s0 + $0x8c] sm:$0xf0] }
  0x2b   :  { %1388 = vmatpush.bf16.msrb.mxu2 %v3654_v60  ;;  %1557 = vmatpush.bf16.msrb.mxu3 %v3662_v61  ;;  %v4056_v60 = vor.u32 %v3631_v57, %v3331_v56  ;;  %v2867_v61 = vld [vmem:[%s5758_s0 + $0x40] sm:$0xf]  ;;  %v4159_v56 = vor.u32 %v3523_v55, %v2899_v54  ;;  %v3513_v57 = vld [vmem:[%s5758_s0 + $0x44] sm:$0xf]  ;;  %v4207_v54 = vor.u32 %v3527_v31, %v2915_v30 }
  0x2c   :  { %5888 = vst [vmem:[#allocation24_spill] sm:$0xff] %v4054_v59  ;;  %v4067_v63 = vor.u32 %v3515_v62, %v2867_v61  ;;  %v2869_v61 = vld [vmem:[%s5758_s0 + $0x50] sm:$0xf0]  ;;  %v2875_v62 = vld [vmem:[%s5758_s0 + $0x48] sm:$0xf] }
  0x2d   :  { %5889 = vst [vmem:[#allocation25_spill] sm:$0xff] %v4056_v60  ;;  %v3517_v55 = vld [vmem:[%s5758_s0 + $0x64] sm:$0xf] }
  0x2e   :  { %1220 = vmatpush.bf16.msrb.mxu1 %v3645_v4  ;;  %v3506_v4 = vld [vmem:[%s5758_s0 + $0xc] sm:$0xf]  ;;  %5897 = vst [vmem:[#allocation33_spill] sm:$0xff] %v4159_v56 }
  0x2f   :  { %1389 = vmatpush.bf16.msrb.mxu2 %v3653_v5  ;;  %1558 = vmatpush.bf16.msrb.mxu3 %v3661_v6  ;;  %v2845_v5 = vld [vmem:[%s5758_s0 + $0x18] sm:$0xf0]  ;;  %v4088_v6 = vor.u32 %v3505_v0, %v2837_v1  ;;  %v3516_v0 = vld [vmem:[%s5758_s0 + $0x54] sm:$0xf0]  ;;  %v3514_v1 = vld [vmem:[%s5758_s0 + $0x4c] sm:$0xf] }
  0x30   :  { %5902 = vst [vmem:[#allocation38_spill] sm:$0xff] %v4207_v54 }
  0x31   :  { %1101 = vmatmul.bf16.gmra.mxu1 %v3800_v23  ;;  %1141 = vmatmul.bf16.gmra.mxu2 %v3802_v24  ;;  %5890 = vst [vmem:[#allocation26_spill] sm:$0xff] %v4088_v6 }
  0x32   :  { %1181 = vmatmul.bf16.gmra.mxu3 %v3804_v25  ;;  %1221 = vmatpush.bf16.msrb.mxu1 %v3644_v10  ;;  %v4090_v10 = vor.u32 %v3508_v3, %v2843_v2  ;;  %v2877_v2 = vld [vmem:[%s5758_s0 + $0x58] sm:$0xf0]  ;;  %v3524_v25 = vld [vmem:[%s5758_s0 + $0x94] sm:$0xf0] }
  0x33   :  { %1390 = vmatpush.bf16.msrb.mxu2 %v3652_v11  ;;  %1559 = vmatpush.bf16.msrb.mxu3 %v3660_v12  ;;  %v4094_v12 = vor.u32 %v3506_v4, %v2845_v5  ;;  %v4184_v5 = vor.u32 %v3513_v57, %v2869_v61  ;;  %v2885_v57 = vld [vmem:[%s5758_s0 + $0x70] sm:$0xf0]  ;;  %v2891_v61 = vld [vmem:[%s5758_s0 + $0x68] sm:$0xf] }
  0x34   :  { %1061 = vmatmul.bf16.gmra.mxu0 %v4031_v48  ;;  %5891 = vst [vmem:[#allocation27_spill] sm:$0xff] %v4090_v10  ;;  %v4232_v31 = vor.u32 %v3517_v55, %v2885_v57  ;;  %v2931_v55 = vld [vmem:[%s5758_s0 + $0xc0] sm:$0xf]  ;;  %v3531_v57 = vld [vmem:[%s5758_s0 + $0xcc] sm:$0xf0] }
  0x35   :  { %5892 = vst [vmem:[#allocation28_spill] sm:$0xff] %v4094_v12 }
  0x36   :  { %1222 = vmatpush.bf16.msrb.mxu1 %v3643_v13  ;;  %5898 = vst [vmem:[#allocation34_spill] sm:$0xff] %v4184_v5 }
  0x37   :  { %1391 = vmatpush.bf16.msrb.mxu2 %v3651_v17  ;;  %1560 = vmatpush.bf16.msrb.mxu3 %v3659_v18  ;;  %5904 = vst [vmem:[#allocation40_spill] sm:$0xff] %v4232_v31 }
  0x3a   :  { %1223 = vmatpush.bf16.msrb.mxu1 %v3642_v22  ;;  %v4111_v22 = vor.u32 %v3519_v20, %v2883_v19  ;;  %v4186_v19 = vor.u32 %v3516_v0, %v2875_v62  ;;  %v3520_v62 = vld [vmem:[%s5758_s0 + $0x74] sm:$0xf0]  ;;  %v3518_v0 = vld [vmem:[%s5758_s0 + $0x6c] sm:$0xf] }
  0x3b   :  { %1392 = vmatpush.bf16.msrb.mxu2 %v3650_v26  ;;  %1561 = vmatpush.bf16.msrb.mxu3 %v3658_v27  ;;  %v3509_v26 = vld [vmem:[%s5758_s0 + $0x24] sm:$0xf]  ;;  %v2853_v27 = vld [vmem:[%s5758_s0 + $0x30] sm:$0xf0] }
  0x3c   :  { %5893 = vst [vmem:[#allocation29_spill] sm:$0xff] %v4111_v22 }
  0x3d   :  { %5899 = vst [vmem:[#allocation35_spill] sm:$0xff] %v4186_v19 }
  0x3e   :  { %1224 = vmatpush.bf16.msrb.mxu1 %v3641_v39  ;;  %v4136_v39 = vor.u32 %v3509_v26, %v2853_v27  ;;  %v4190_v26 = vor.u32 %v3514_v1, %v2877_v2  ;;  %v2893_v1 = vld [vmem:[%s5758_s0 + $0x78] sm:$0xf0] }
  0x3f   :  { %1393 = vmatpush.bf16.msrb.mxu2 %v3649_v40  ;;  %1562 = vmatpush.bf16.msrb.mxu3 %v3657_v44  ;;  %v4138_v40 = vor.u32 %v3512_v29, %v2859_v28 }
  0x40   :  { %5894 = vst [vmem:[#allocation30_spill] sm:$0xff] %v4136_v39 }
  0x41   :  { %1106 = vmatmul.bf16.gmra.mxu1 %v3827_v32  ;;  %1146 = vmatmul.bf16.gmra.mxu2 %v3829_v33  ;;  %5895 = vst [vmem:[#allocation31_spill] sm:$0xff] %v4138_v40 }
  0x42   :  { %1186 = vmatmul.bf16.gmra.mxu3 %v3831_v34  ;;  %5900 = vst [vmem:[#allocation36_spill] sm:$0xff] %v4190_v26 }
  0x44   :  { %1066 = vmatmul.bf16.gmra.mxu0 %v4067_v63 }
  0x51   :  { %1111 = vmatmul.bf16.gmra.mxu1 %v3854_v41  ;;  %1151 = vmatmul.bf16.gmra.mxu2 %v3856_v42  ;;  %v3670_v41 = vld [vmem:[%s5759_s3 + $0x28] sm:$0xff] }
  0x52   :  { %1191 = vmatmul.bf16.gmra.mxu3 %v3858_v43 }
  0x54   :  { %1071 = vmatmul.bf16.gmra.mxu0 %v4111_v22 }
  0x61   :  { %1116 = vmatmul.bf16.gmra.mxu1 %v3881_v50  ;;  %1156 = vmatmul.bf16.gmra.mxu2 %v3883_v51 }
  0x62   :  { %1196 = vmatmul.bf16.gmra.mxu3 %v3885_v52 }
  0x64   :  { %1076 = vmatmul.bf16.gmra.mxu0 %v4159_v56  ;;  %v3541_v56 = vld [vmem:[%s5758_s0 + $0x124] sm:$0xf] }
  0x71   :  { %1121 = vmatmul.bf16.gmra.mxu1 %v3944_v7  ;;  %1161 = vmatmul.bf16.gmra.mxu2 %v3946_v8 }
  0x72   :  { %1201 = vmatmul.bf16.gmra.mxu3 %v3948_v9  ;;  %v4238_v9 = vor.u32 %v3518_v0, %v2893_v1  ;;  %v2901_v0 = vld [vmem:[%s5758_s0 + $0x90] sm:$0xf0]  ;;  %v2907_v1 = vld [vmem:[%s5758_s0 + $0x88] sm:$0xf] }
  0x73   :  { %v4282_v8 = vor.u32 %v3524_v25, %v2907_v1  ;;  %v2947_v25 = vld [vmem:[%s5758_s0 + $0xe0] sm:$0xf]  ;;  %v3525_v1 = vld [vmem:[%s5758_s0 + $0xa4] sm:$0xf] }
  0x74   :  { %1081 = vmatmul.bf16.gmra.mxu0 %v4207_v54  ;;  %5906 = vst [vmem:[#allocation42_spill] sm:$0xff] %v4238_v9 }
  0x75   :  { %5911 = vst [vmem:[#allocation47_spill] sm:$0xff] %v4282_v8 }
  0x81   :  { %1126 = vmatmul.bf16.gmra.mxu1 %v4007_v37  ;;  %1166 = vmatmul.bf16.gmra.mxu2 %v4009_v38 }
  0x82   :  { %1206 = vmatmul.bf16.gmra.mxu3 %v4020_v45 }
  0x91   :  { %1131 = vmatmul.bf16.gmra.mxu1 %v4052_v58  ;;  %1171 = vmatmul.bf16.gmra.mxu2 %v4054_v59  ;;  %v3528_v58 = vld [vmem:[%s5758_s0 + $0xb4] sm:$0xf0] }
  0x92   :  { %1211 = vmatmul.bf16.gmra.mxu3 %v4056_v60  ;;  %v4234_v60 = vor.u32 %v3520_v62, %v2891_v61  ;;  %v4255_v61 = vor.u32 %v3531_v57, %v2931_v55  ;;  %v3521_v62 = vld [vmem:[%s5758_s0 + $0x84] sm:$0xf]  ;;  %v3522_v55 = vld [vmem:[%s5758_s0 + $0x8c] sm:$0xf]  ;;  %v2909_v57 = vld [vmem:[%s5758_s0 + $0x98] sm:$0xf0] }
  0x93   :  { %v4280_v38 = vor.u32 %v3521_v62, %v2901_v0  ;;  %v4286_v42 = vor.u32 %v3522_v55, %v2909_v57  ;;  %v3535_v62 = vld [vmem:[%s5758_s0 + $0xec] sm:$0xf0]  ;;  %v2917_v55 = vld [vmem:[%s5758_s0 + $0xb0] sm:$0xf0]  ;;  %v2923_v57 = vld [vmem:[%s5758_s0 + $0xa8] sm:$0xf] }
  0x94   :  { %5905 = vst [vmem:[#allocation41_spill] sm:$0xff] %v4234_v60  ;;  %1086 = vmatmul.bf16.gmra.mxu0 %v4255_v61  ;;  %v4303_v0 = vor.u32 %v3535_v62, %v2947_v25  ;;  %v3526_v25 = vld [vmem:[%s5758_s0 + $0xac] sm:$0xf]  ;;  %v2925_v62 = vld [vmem:[%s5758_s0 + $0xb8] sm:$0xf0]  ;;  %v4328_v50 = vor.u32 %v3525_v1, %v2917_v55  ;;  %v3671_v55 = vld [vmem:[%s5759_s3 + $0x30] sm:$0xff] }
  0x95   :  { %5908 = vst [vmem:[#allocation44_spill] sm:$0xff] %v4255_v61  ;;  %v3672_v1 = vld [vmem:[%s5759_s3 + $0x38] sm:$0xff] }
  0x96   :  { %5910 = vst [vmem:[#allocation46_spill] sm:$0xff] %v4280_v38  ;;  %1884 = vmatpush.bf16.msrb.mxu0 %v3672_v1  ;;  %v3532_v1 = vld [vmem:[%s5758_s0 + $0xd4] sm:$0xf0] }
  0x97   :  { %5912 = vst [vmem:[#allocation48_spill] sm:$0xff] %v4286_v42 }
  0x98   :  { %5914 = vst [vmem:[#allocation50_spill] sm:$0xff] %v4303_v0 }
  0x99   :  { %5916 = vst [vmem:[#allocation52_spill] sm:$0xff] %v4328_v50 }
  0x9a   :  { %1885 = vmatpush.bf16.msrb.mxu0 %v3671_v55  ;;  %v3669_v55 = vld [vmem:[%s5759_s3 + $0x20] sm:$0xff] }
  0x9e   :  { %v4092_v11 = vpop.f32.mrf.mxu1  ;;  %1886 = vmatpush.bf16.msrb.mxu0 %v3670_v41  ;;  %v3668_v41 = vld [vmem:[%s5759_s3 + $0x18] sm:$0xff] }
  0xa1   :  { %1225 = vmatmul.bf16.vlgmr.msrb.gmra.mxu1 %v4088_v6  ;;  %1394 = vmatmul.bf16.vlgmr.msrb.gmra.mxu2 %v4090_v10  ;;  %v1057_v23 = vpop.f32.mrf.mxu0 }
  0xa2   :  { %1563 = vmatmul.bf16.vlgmr.msrb.gmra.mxu3 %v4094_v12  ;;  %1887 = vmatpush.bf16.msrb.mxu0 %v3669_v55  ;;  %v2955_v55 = vld [vmem:[%s5758_s0 + $0xe8] sm:$0xf] }
  0xa4   :  { %v4099_v13 = vpop.f32.mrf.mxu2  ;;  %1091 = vmatmul.bf16.gmra.mxu0 %v4303_v0 }
  0xa5   :  { %v4101_v17 = vpop.f32.mrf.mxu3 }
  0xa6   :  { %v4103_v18 = vpop.f32.mrf.mxu1  ;;  %1888 = vmatpush.bf16.msrb.mxu0 %v3668_v41  ;;  %v3536_v41 = vld [vmem:[%s5758_s0 + $0xf4] sm:$0xf0] }
  0xac   :  { %v4132_v35 = vpop.f32.mrf.mxu2 }
  0xad   :  { %v4134_v36 = vpop.f32.mrf.mxu3 }
  0xae   :  { %v4140_v44 = vpop.f32.mrf.mxu1 }
  0xb1   :  { %1230 = vmatmul.bf16.gmra.mxu1 %v4136_v39  ;;  %1399 = vmatmul.bf16.gmra.mxu2 %v4138_v40 }
  0xb2   :  { %1568 = vmatmul.bf16.gmra.mxu3 %v4142_v46 }
  0xb4   :  { %v4147_v47 = vpop.f32.mrf.mxu2 }
  0xb5   :  { %v4149_v49 = vpop.f32.mrf.mxu3 }
  0xb6   :  { %v4151_v53 = vpop.f32.mrf.mxu1 }
  0xbc   :  { %v4180_v3 = vpop.f32.mrf.mxu2 }
  0xbd   :  { %v4182_v4 = vpop.f32.mrf.mxu3 }
  0xbe   :  { %v4188_v20 = vpop.f32.mrf.mxu1 }
  0xc1   :  { %1235 = vmatmul.bf16.gmra.mxu1 %v4184_v5  ;;  %1404 = vmatmul.bf16.gmra.mxu2 %v4186_v19 }
  0xc2   :  { %1573 = vmatmul.bf16.gmra.mxu3 %v4190_v26  ;;  %v4334_v26 = vor.u32 %v3526_v25, %v2925_v62  ;;  %v2933_v25 = vld [vmem:[%s5758_s0 + $0xd0] sm:$0xf0]  ;;  %v2939_v62 = vld [vmem:[%s5758_s0 + $0xc8] sm:$0xf] }
  0xc3   :  { %v4375_v40 = vor.u32 %v3532_v1, %v2939_v62  ;;  %v3667_v62 = vld [vmem:[%s5759_s3 + $0x10] sm:$0xff] }
  0xc4   :  { %v4195_v27 = vpop.f32.mrf.mxu2  ;;  %5918 = vst [vmem:[#allocation54_spill] sm:$0xff] %v4334_v26  ;;  %v2949_v1 = vld [vmem:[%s5758_s0 + $0xf0] sm:$0xf0]  ;;  %1889 = vmatpush.bf16.msrb.mxu0 %v3667_v62 }
  0xc5   :  { %v4197_v28 = vpop.f32.mrf.mxu3  ;;  %5922 = vst [vmem:[#allocation58_spill] sm:$0xff] %v4375_v40 }
  0xc6   :  { %5901 = vst [vmem:[#allocation37_spill] sm:$0xff] %v4197_v28  ;;  %v4199_v29 = vpop.f32.mrf.mxu1 }
  0xcc   :  { %v4228_v2 = vpop.f32.mrf.mxu2 }
  0xcd   :  { %v4230_v30 = vpop.f32.mrf.mxu3 }
  0xce   :  { %5903 = vst [vmem:[#allocation39_spill] sm:$0xff] %v4230_v30  ;;  %v4236_v45 = vpop.f32.mrf.mxu1 }
  0xd1   :  { %1240 = vmatmul.bf16.gmra.mxu1 %v4232_v31  ;;  %1409 = vmatmul.bf16.gmra.mxu2 %v4234_v60 }
  0xd2   :  { %1578 = vmatmul.bf16.gmra.mxu3 %v4238_v9 }
  0xd4   :  { %v4243_v52 = vpop.f32.mrf.mxu2 }
  0xd5   :  { %v4245_v43 = vpop.f32.mrf.mxu3 }
  0xd6   :  { %5907 = vst [vmem:[#allocation43_spill] sm:$0xff] %v4245_v43  ;;  %v4247_v34 = vpop.f32.mrf.mxu1 }
  0xdc   :  { %v4276_v16 = vpop.f32.mrf.mxu2 }
  0xdd   :  { %v4278_v59 = vpop.f32.mrf.mxu3 }
  0xde   :  { %5909 = vst [vmem:[#allocation45_spill] sm:$0xff] %v4278_v59  ;;  %v4284_v51 = vpop.f32.mrf.mxu1 }
  0xe1   :  { %1245 = vmatmul.bf16.gmra.mxu1 %v4280_v38  ;;  %1414 = vmatmul.bf16.gmra.mxu2 %v4282_v8  ;;  %v4426_v38 = vor.u32 %v3536_v41, %v2955_v55 }
  0xe2   :  { %1583 = vmatmul.bf16.gmra.mxu3 %v4286_v42  ;;  %v4330_v42 = vor.u32 %v3528_v58, %v2923_v57  ;;  %v3529_v57 = vld [vmem:[%s5758_s0 + $0xc4] sm:$0xf] }
  0xe3   :  { %v4373_v19 = vor.u32 %v3529_v57, %v2933_v25  ;;  %5927 = vst [vmem:[#allocation63_spill] sm:$0xff] %v4426_v38 }
  0xe4   :  { %v4291_v33 = vpop.f32.mrf.mxu2  ;;  %5917 = vst [vmem:[#allocation53_spill] sm:$0xff] %v4330_v42 }
  0xe5   :  { %v4293_v24 = vpop.f32.mrf.mxu3  ;;  %5921 = vst [vmem:[#allocation57_spill] sm:$0xff] %v4373_v19 }
  0xe6   :  { %5913 = vst [vmem:[#allocation49_spill] sm:$0xff] %v4293_v24  ;;  %v4295_v15 = vpop.f32.mrf.mxu1 }
  0xec   :  { %v4324_v37 = vpop.f32.mrf.mxu2 }
  0xed   :  { %v4326_v7 = vpop.f32.mrf.mxu3 }
  0xee   :  { %5915 = vst [vmem:[#allocation51_spill] sm:$0xff] %v4326_v7  ;;  %v4332_v9 = vpop.f32.mrf.mxu1  ;;  %v4478_v7 = vld [vmem:[%s5757_s2] ss:$0 sm:$0xff] }
  0xef   :  { %v1058_v24 = vadd.f32 %v4478_v7, %v1057_v23  ;;  %v2981_v23 = vld [vmem:[%s5758_s0 + $0x130] sm:$0xf0] }
  0xf0   :  { %v4503_v59 = vor.u32 %v3541_v56, %v2981_v23 }
  0xf1   :  { %1250 = vmatmul.bf16.gmra.mxu1 %v4328_v50  ;;  %1419 = vmatmul.bf16.gmra.mxu2 %v4330_v42  ;;  %v2941_v42 = vld [vmem:[%s5758_s0 + $0xd8] sm:$0xf0] }
  0xf2   :  { %1588 = vmatmul.bf16.gmra.mxu3 %v4334_v26  ;;  %v3530_v26 = vld [vmem:[%s5758_s0 + $0xcc] sm:$0xf]  ;;  %5934 = vst [vmem:[#allocation70_spill] sm:$0xff] %v4503_v59 }
  0xf3   :  { %v4382_v32 = vor.u32 %v3530_v26, %v2941_v42  ;;  %v3533_v26 = vld [vmem:[%s5758_s0 + $0xe4] sm:$0xf] }
  0xf4   :  { %v4339_v46 = vpop.f32.mrf.mxu2  ;;  %v4424_v0 = vor.u32 %v3533_v26, %v2949_v1  ;;  %v3665_v26 = vld [vmem:[%s5759_s3] sm:$0xff] }
  0xf5   :  { %v4341_v12 = vpop.f32.mrf.mxu3  ;;  %5923 = vst [vmem:[#allocation59_spill] sm:$0xff] %v4382_v32 }
  0xf6   :  { %5919 = vst [vmem:[#allocation55_spill] sm:$0xff] %v4341_v12  ;;  %v4346_v58 = vpop.f32.mrf.mxu1 }
  0xf7   :  { %5926 = vst [vmem:[#allocation62_spill] sm:$0xff] %v4424_v0 }
  0xfc   :  { %v4369_v8 = vpop.f32.mrf.mxu2 }
  0xfd   :  { %v4371_v60 = vpop.f32.mrf.mxu3 }
  0xfe   :  { %5920 = vst [vmem:[#allocation56_spill] sm:$0xff] %v4371_v60  ;;  %v4380_v10 = vpop.f32.mrf.mxu1 }
 0x101   :  { %1255 = vmatmul.bf16.gmra.mxu1 %v4373_v19  ;;  %1424 = vmatmul.bf16.gmra.mxu2 %v4375_v40  ;;  %v3534_v40 = vld [vmem:[%s5758_s0 + $0xec] sm:$0xf]  ;;  %v2957_v19 = vld [vmem:[%s5758_s0 + $0xf8] sm:$0xf0] }
 0x102   :  { %1593 = vmatmul.bf16.gmra.mxu3 %v4382_v32  ;;  %v1059_v32 = vpop.f32.mrf.mxu0  ;;  %v4433_v31 = vor.u32 %v3534_v40, %v2957_v19  ;;  %v3537_v40 = vld [vmem:[%s5758_s0 + $0x104] sm:$0xf]  ;;  %v2965_v19 = vld [vmem:[%s5758_s0 + $0x110] sm:$0xf0] }
 0x104   :  { %v4390_v57 = vpop.f32.mrf.mxu2  ;;  %5928 = vst [vmem:[#allocation64_spill] sm:$0xff] %v4433_v31 }
 0x105   :  { %v4392_v25 = vpop.f32.mrf.mxu3 }
 0x106   :  { %5924 = vst [vmem:[#allocation60_spill] sm:$0xff] %v4392_v25  ;;  %v4397_v42 = vpop.f32.mrf.mxu1  ;;  %v3666_v25 = vld [vmem:[%s5759_s3 + $0x8] sm:$0xff] }
 0x107   :  { %1890 = vmatpush.bf16.msrb.mxu0 %v3666_v25  ;;  %v2971_v25 = vld [vmem:[%s5758_s0 + $0x108] sm:$0xf] }
 0x10a   :  { %v1062_v1 = vpop.f32.mrf.mxu0 }
 0x10b   :  { %1891 = vmatpush.bf16.msrb.mxu0 %v3665_v26  ;;  %v3540_v26 = vld [vmem:[%s5758_s0 + $0x114] sm:$0xf0]  ;;  %v1063_v30 = vadd.f32 %v4478_v7, %v1062_v1  ;;  %v3005_v1 = vld [vmem:[%s5758_s0 + $0x158] sm:$0xf0] }
 0x10c   :  { %v4420_v14 = vpop.f32.mrf.mxu2  ;;  %v4471_v60 = vor.u32 %v3540_v26, %v2971_v25 }
 0x10d   :  { %v4422_v50 = vpop.f32.mrf.mxu3 }
 0x10e   :  { %5925 = vst [vmem:[#allocation61_spill] sm:$0xff] %v4422_v50  ;;  %v4431_v61 = vpop.f32.mrf.mxu1  ;;  %v4469_v50 = vor.u32 %v3537_v40, %v2965_v19 }
 0x10f   :  { %5932 = vst [vmem:[#allocation68_spill] sm:$0xff] %v4471_v60 }
 0x110   :  { %5931 = vst [vmem:[#allocation67_spill] sm:$0xff] %v4469_v50 }
 0x111   :  { %1260 = vmatmul.bf16.gmra.mxu1 %v4424_v0  ;;  %1429 = vmatmul.bf16.gmra.mxu2 %v4426_v38  ;;  %v2973_v38 = vld [vmem:[%s5758_s0 + $0x118] sm:$0xf0] }
 0x112   :  { %1598 = vmatmul.bf16.gmra.mxu3 %v4433_v31  ;;  %v3538_v31 = vld [vmem:[%s5758_s0 + $0x10c] sm:$0xf]  ;;  %v1064_v5 = vpop.f32.mrf.mxu0 }
 0x113   :  { %v4473_v54 = vor.u32 %v3538_v31, %v2973_v38  ;;  %v1060_v31 = vadd.f32 %v4478_v7, %v1059_v32  ;;  %v3542_v32 = vld [vmem:[%s5758_s0 + $0x12c] sm:$0xf] }
 0x114   :  { %v4441_v62 = vpop.f32.mrf.mxu2 }
 0x115   :  { %v4443_v55 = vpop.f32.mrf.mxu3  ;;  %5933 = vst [vmem:[#allocation69_spill] sm:$0xff] %v4473_v54 }
 0x116   :  { %5929 = vst [vmem:[#allocation65_spill] sm:$0xff] %v4443_v55  ;;  %v4445_v41 = vpop.f32.mrf.mxu1 }
 0x11a   :  { %v1067_v38 = vpop.f32.mrf.mxu0 }
 0x11c   :  { %v4465_v0 = vpop.f32.mrf.mxu2 }
 0x11d   :  { %v4467_v55 = vpop.f32.mrf.mxu3 }
 0x11e   :  { %5930 = vst [vmem:[#allocation66_spill] sm:$0xff] %v4467_v55  ;;  %v1226_v12 = vpop.f32.mrf.mxu1 }
 0x11f   :  { %v1227_v19 = vadd.f32 %v1226_v12, %v1058_v24  ;;  %v3544_v24 = vld [vmem:[%s5758_s0 + $0x134] sm:$0xf0] }
 0x121   :  { %1265 = vmatmul.bf16.gmra.mxu1 %v4469_v50  ;;  %1434 = vmatmul.bf16.gmra.mxu2 %v4471_v60 }
 0x122   :  { %1603 = vmatmul.bf16.gmra.mxu3 %v4473_v54  ;;  %v2987_v54 = vld [vmem:[%s5758_s0 + $0x128] sm:$0xf] }
 0x123   :  { %v4505_v43 = vor.u32 %v3544_v24, %v2987_v54 }
 0x124   :  { %v1395_v40 = vpop.f32.mrf.mxu2 }
 0x125   :  { %v1564_v25 = vpop.f32.mrf.mxu3  ;;  %v1396_v55 = vadd.f32 %v1395_v40, %v1227_v19  ;;  %v2989_v40 = vld [vmem:[%s5758_s0 + $0x138] sm:$0xf0]  ;;  %5935 = vst [vmem:[#allocation71_spill] sm:$0xff] %v4505_v43 }
 0x126   :  { %v1228_v26 = vpop.f32.mrf.mxu1  ;;  %v4507_v6 = vor.u32 %v3542_v32, %v2989_v40 }
 0x127   :  { %v1229_v12 = vadd.f32 %v1228_v26, %v1060_v31  ;;  %v1565_v60 = vadd.f32 %v1564_v25, %v1396_v55  ;;  %v1069_v55 = vpop.f32.mrf.mxu0 }
 0x128   :  { %5936 = vst [vmem:[#allocation72_spill] sm:$0xff] %v4507_v6 }
 0x129   :  { %v1724_v31 = vmax.f32 %v1565_v60, 0.0  ;;  %v3545_v60 = vld [vmem:[%s5758_s0 + $0x144] sm:$0xf] }
 0x12c   :  { %v1397_v19 = vpop.f32.mrf.mxu2 }
 0x12d   :  { %v1398_v50 = vadd.f32 %v1397_v19, %v1229_v12  ;;  %v1566_v39 = vpop.f32.mrf.mxu3  ;;  %v1065_v12 = vadd.f32 %v4478_v7, %v1064_v5  ;;  %v3546_v5 = vld [vmem:[%s5758_s0 + $0x14c] sm:$0xf] }
 0x12e   :  { %v1231_v22 = vpop.f32.mrf.mxu1 }
 0x12f   :  { %v1567_v26 = vadd.f32 %v1566_v39, %v1398_v50  ;;  %v1232_v23 = vadd.f32 %v1231_v22, %v1063_v30  ;;  %v2997_v39 = vld [vmem:[%s5758_s0 + $0x150] sm:$0xf0]  ;;  %v3548_v22 = vld [vmem:[%s5758_s0 + $0x154] sm:$0xf0]  ;;  %v1072_v40 = vpop.f32.mrf.mxu0 }
 0x131   :  { %v1725_v28 = vmax.f32 %v1567_v26, 0.0  ;;  %1270 = vmatmul.bf16.gmra.mxu1 %v4503_v59  ;;  %1439 = vmatmul.bf16.gmra.mxu2 %v4505_v43  ;;  %v1068_v43 = vadd.f32 %v4478_v7, %v1067_v38  ;;  %v3549_v38 = vld [vmem:[%s5758_s0 + $0x164] sm:$0xf] }
 0x132   :  { %1608 = vmatmul.bf16.gmra.mxu3 %v4507_v6  ;;  %v4536_v6 = vor.u32 %v3546_v5, %v3005_v1  ;;  %v3013_v1 = vld [vmem:[%s5758_s0 + $0x170] sm:$0xf0] }
 0x133   :  { %v1788_v25 = vpack.c.bf16 %v1725_v28, %v1724_v31  ;;  %v3003_v28 = vld [vmem:[%s5758_s0 + $0x148] sm:$0xf] }
 0x134   :  { %v1400_v56 = vpop.f32.mrf.mxu2  ;;  %5939 = vst [vmem:[#allocation75_spill] sm:$0xff] %v4536_v6 }
 0x135   :  { %v1569_v54 = vpop.f32.mrf.mxu3  ;;  %1892 = vmatmul.bf16.vlgmr.msrb.gmra.mxu0 %v1788_v25  ;;  %v1401_v50 = vadd.f32 %v1400_v56, %v1232_v23  ;;  %v4532_v25 = vor.u32 %v3545_v60, %v2997_v39  ;;  %v4534_v56 = vor.u32 %v3548_v22, %v3003_v28 }
 0x136   :  { %v1233_v24 = vpop.f32.mrf.mxu1 }
 0x137   :  { %v1234_v30 = vadd.f32 %v1233_v24, %v1065_v12  ;;  %v1570_v19 = vadd.f32 %v1569_v54, %v1401_v50  ;;  %5937 = vst [vmem:[#allocation73_spill] sm:$0xff] %v4532_v25  ;;  %v1074_v22 = vpop.f32.mrf.mxu0 }
 0x138   :  { %5938 = vst [vmem:[#allocation74_spill] sm:$0xff] %v4534_v56 }
 0x139   :  { %v1726_v12 = vmax.f32 %v1570_v19, 0.0  ;;  %v3021_v19 = vld [vmem:[%s5758_s0 + $0x178] sm:$0xf0] }
 0x13c   :  { %v1402_v32 = vpop.f32.mrf.mxu2 }
 0x13d   :  { %v1403_v26 = vadd.f32 %v1402_v32, %v1234_v30  ;;  %v1571_v31 = vpop.f32.mrf.mxu3  ;;  %v1070_v30 = vadd.f32 %v4478_v7, %v1069_v55  ;;  %v3550_v55 = vld [vmem:[%s5758_s0 + $0x16c] sm:$0xf] }
 0x13e   :  { %v1236_v23 = vpop.f32.mrf.mxu1 }
 0x13f   :  { %v1572_v24 = vadd.f32 %v1571_v31, %v1403_v26  ;;  %v1237_v60 = vadd.f32 %v1236_v23, %v1068_v43  ;;  %v3552_v43 = vld [vmem:[%s5758_s0 + $0x174] sm:$0xf0] }
 0x141   :  { %v1727_v59 = vmax.f32 %v1572_v24, 0.0  ;;  %1275 = vmatmul.bf16.gmra.mxu1 %v4532_v25  ;;  %1444 = vmatmul.bf16.gmra.mxu2 %v4534_v56  ;;  %v1073_v56 = vadd.f32 %v4478_v7, %v1072_v40  ;;  %v3553_v40 = vld [vmem:[%s5758_s0 + $0x184] sm:$0xf] }
 0x142   :  { %1613 = vmatmul.bf16.gmra.mxu3 %v4536_v6 }
 0x143   :  { %v1789_v54 = vpack.c.bf16 %v1727_v59, %v1726_v12  ;;  %v3019_v59 = vld [vmem:[%s5758_s0 + $0x168] sm:$0xf]  ;;  %v4561_v12 = vor.u32 %v3549_v38, %v3013_v1 }
 0x144   :  { %v1405_v50 = vpop.f32.mrf.mxu2 }
 0x145   :  { %v1574_v39 = vpop.f32.mrf.mxu3  ;;  %1897 = vmatmul.bf16.gmra.mxu0 %v1789_v54  ;;  %v1406_v5 = vadd.f32 %v1405_v50, %v1237_v60  ;;  %v4563_v54 = vor.u32 %v3552_v43, %v3019_v59  ;;  %v4565_v60 = vor.u32 %v3550_v55, %v3021_v19  ;;  %v1075_v43 = vadd.f32 %v4478_v7, %v1074_v22  ;;  %v3029_v19 = vld [vmem:[%s5758_s0 + $0x190] sm:$0xf0]  ;;  %v3554_v22 = vld [vmem:[%s5758_s0 + $0x18c] sm:$0xf] }
 0x146   :  { %v1238_v28 = vpop.f32.mrf.mxu1 }
 0x147   :  { %v1239_v32 = vadd.f32 %v1238_v28, %v1070_v30  ;;  %v1575_v31 = vadd.f32 %v1574_v39, %v1406_v5  ;;  %5940 = vst [vmem:[#allocation76_spill] sm:$0xff] %v4563_v54  ;;  %v1077_v30 = vpop.f32.mrf.mxu0 }
 0x148   :  { %5941 = vst [vmem:[#allocation77_spill] sm:$0xff] %v4565_v60 }
 0x149   :  { %v1728_v6 = vmax.f32 %v1575_v31, 0.0 }
 0x14c   :  { %v1407_v26 = vpop.f32.mrf.mxu2 }
 0x14d   :  { %v1408_v23 = vadd.f32 %v1407_v26, %v1239_v32  ;;  %v1576_v24 = vpop.f32.mrf.mxu3  ;;  %v3037_v26 = vld [vmem:[%s5758_s0 + $0x198] sm:$0xf0] }
 0x14e   :  { %v1241_v50 = vpop.f32.mrf.mxu1 }
 0x14f   :  { %v1577_v28 = vadd.f32 %v1576_v24, %v1408_v23  ;;  %v1242_v38 = vadd.f32 %v1241_v50, %v1073_v56  ;;  %v1079_v55 = vpop.f32.mrf.mxu0 }
 0x151   :  { %v1729_v25 = vmax.f32 %v1577_v28, 0.0  ;;  %1280 = vmatmul.bf16.gmra.mxu1 %v4561_v12  ;;  %1449 = vmatmul.bf16.gmra.mxu2 %v4563_v54  ;;  %v4590_v28 = vor.u32 %v3553_v40, %v3029_v19 }
 0x152   :  { %1618 = vmatmul.bf16.gmra.mxu3 %v4565_v60  ;;  %v1078_v60 = vadd.f32 %v4478_v7, %v1077_v30  ;;  %v3557_v30 = vld [vmem:[%s5758_s0 + $0x1a4] sm:$0xf] }
 0x153   :  { %v1790_v39 = vpack.c.bf16 %v1729_v25, %v1728_v6  ;;  %v3035_v6 = vld [vmem:[%s5758_s0 + $0x188] sm:$0xf]  ;;  %v3556_v25 = vld [vmem:[%s5758_s0 + $0x194] sm:$0xf0]  ;;  %5942 = vst [vmem:[#allocation78_spill] sm:$0xff] %v4590_v28 }
 0x154   :  { %v1410_v5 = vpop.f32.mrf.mxu2 }
 0x155   :  { %v1579_v1 = vpop.f32.mrf.mxu3  ;;  %1902 = vmatmul.bf16.gmra.mxu0 %v1790_v39  ;;  %v1411_v32 = vadd.f32 %v1410_v5, %v1242_v38  ;;  %v4592_v39 = vor.u32 %v3556_v25, %v3035_v6  ;;  %v4594_v38 = vor.u32 %v3554_v22, %v3037_v26  ;;  %v3045_v26 = vld [vmem:[%s5758_s0 + $0x1b0] sm:$0xf0] }
 0x156   :  { %v1243_v59 = vpop.f32.mrf.mxu1 }
 0x157   :  { %v1244_v56 = vadd.f32 %v1243_v59, %v1075_v43  ;;  %v1580_v23 = vadd.f32 %v1579_v1, %v1411_v32  ;;  %5943 = vst [vmem:[#allocation79_spill] sm:$0xff] %v4592_v39  ;;  %v1082_v40 = vpop.f32.mrf.mxu0 }
 0x158   :  { %5944 = vst [vmem:[#allocation80_spill] sm:$0xff] %v4594_v38 }
 0x159   :  { %v1730_v43 = vmax.f32 %v1580_v23, 0.0  ;;  %v3053_v23 = vld [vmem:[%s5758_s0 + $0x1b8] sm:$0xf0] }
 0x15c   :  { %v1412_v31 = vpop.f32.mrf.mxu2 }
 0x15d   :  { %v1413_v24 = vadd.f32 %v1412_v31, %v1244_v56  ;;  %v1581_v50 = vpop.f32.mrf.mxu3  ;;  %v1080_v56 = vadd.f32 %v4478_v7, %v1079_v55  ;;  %v3558_v55 = vld [vmem:[%s5758_s0 + $0x1ac] sm:$0xf] }
 0x15e   :  { %v1246_v5 = vpop.f32.mrf.mxu1 }
 0x15f   :  { %v1582_v59 = vadd.f32 %v1581_v50, %v1413_v24  ;;  %v1247_v19 = vadd.f32 %v1246_v5, %v1078_v60  ;;  %v3560_v60 = vld [vmem:[%s5758_s0 + $0x1b4] sm:$0xf0] }
 0x161   :  { %v1731_v54 = vmax.f32 %v1582_v59, 0.0  ;;  %1285 = vmatmul.bf16.gmra.mxu1 %v4590_v28  ;;  %1454 = vmatmul.bf16.gmra.mxu2 %v4592_v39  ;;  %v1083_v39 = vadd.f32 %v4478_v7, %v1082_v40  ;;  %v3561_v40 = vld [vmem:[%s5758_s0 + $0x1c4] sm:$0xf] }
 0x162   :  { %1623 = vmatmul.bf16.gmra.mxu3 %v4594_v38  ;;  %v4623_v38 = vor.u32 %v3558_v55, %v3053_v23  ;;  %v3061_v23 = vld [vmem:[%s5758_s0 + $0x1d0] sm:$0xf0] }
 0x163   :  { %v1791_v1 = vpack.c.bf16 %v1731_v54, %v1730_v43  ;;  %v3051_v54 = vld [vmem:[%s5758_s0 + $0x1a8] sm:$0xf]  ;;  %v4619_v43 = vor.u32 %v3557_v30, %v3045_v26 }
 0x164   :  { %v1415_v32 = vpop.f32.mrf.mxu2  ;;  %5947 = vst [vmem:[#allocation83_spill] sm:$0xff] %v4623_v38 }
 0x165   :  { %v1584_v6 = vpop.f32.mrf.mxu3  ;;  %1907 = vmatmul.bf16.gmra.mxu0 %v1791_v1  ;;  %v1416_v22 = vadd.f32 %v1415_v32, %v1247_v19  ;;  %5945 = vst [vmem:[#allocation81_spill] sm:$0xff] %v4619_v43  ;;  %v4621_v1 = vor.u32 %v3560_v60, %v3051_v54  ;;  %v1084_v19 = vpop.f32.mrf.mxu0 }
 0x166   :  { %v1248_v25 = vpop.f32.mrf.mxu1 }
 0x167   :  { %v1249_v31 = vadd.f32 %v1248_v25, %v1080_v56  ;;  %v1585_v50 = vadd.f32 %v1584_v6, %v1416_v22  ;;  %5946 = vst [vmem:[#allocation82_spill] sm:$0xff] %v4621_v1 }
 0x169   :  { %v1732_v56 = vmax.f32 %v1585_v50, 0.0  ;;  %v3562_v50 = vld [vmem:[%s5758_s0 + $0x1cc] sm:$0xf] }
 0x16c   :  { %v1417_v24 = vpop.f32.mrf.mxu2 }
 0x16d   :  { %v1418_v5 = vadd.f32 %v1417_v24, %v1249_v31  ;;  %v1586_v59 = vpop.f32.mrf.mxu3  ;;  %v1087_v60 = vpop.f32.mrf.mxu0  ;;  %v1085_v31 = vadd.f32 %v4478_v7, %v1084_v19 }
 0x16e   :  { %v1251_v32 = vpop.f32.mrf.mxu1 }
 0x16f   :  { %v1587_v25 = vadd.f32 %v1586_v59, %v1418_v5  ;;  %v1252_v30 = vadd.f32 %v1251_v32, %v1083_v39  ;;  %v3564_v39 = vld [vmem:[%s5758_s0 + $0x1d4] sm:$0xf0]  ;;  %v3069_v5 = vld [vmem:[%s5758_s0 + $0x1d8] sm:$0xf0] }
 0x171   :  { %v1733_v28 = vmax.f32 %v1587_v25, 0.0  ;;  %1290 = vmatmul.bf16.gmra.mxu1 %v4619_v43  ;;  %1459 = vmatmul.bf16.gmra.mxu2 %v4621_v1 }
 0x172   :  { %1628 = vmatmul.bf16.gmra.mxu3 %v4623_v38  ;;  %v1088_v38 = vadd.f32 %v4478_v7, %v1087_v60  ;;  %v3565_v60 = vld [vmem:[%s5758_s0 + $0x1e4] sm:$0xf] }
 0x173   :  { %v1792_v6 = vpack.c.bf16 %v1733_v28, %v1732_v56  ;;  %v3067_v28 = vld [vmem:[%s5758_s0 + $0x1c8] sm:$0xf]  ;;  %v4648_v56 = vor.u32 %v3561_v40, %v3061_v23 }
 0x174   :  { %v1420_v22 = vpop.f32.mrf.mxu2 }
 0x175   :  { %v1589_v26 = vpop.f32.mrf.mxu3  ;;  %1912 = vmatmul.bf16.gmra.mxu0 %v1792_v6  ;;  %v1421_v55 = vadd.f32 %v1420_v22, %v1252_v30  ;;  %v4650_v6 = vor.u32 %v3564_v39, %v3067_v28  ;;  %v4652_v30 = vor.u32 %v3562_v50, %v3069_v5  ;;  %v1089_v43 = vpop.f32.mrf.mxu0  ;;  %v3077_v50 = vld [vmem:[%s5758_s0 + $0x1f0] sm:$0xf0] }
 0x176   :  { %v1253_v54 = vpop.f32.mrf.mxu1  ;;  %v1090_v39 = vadd.f32 %v4478_v7, %v1089_v43  ;;  %v3566_v43 = vld [vmem:[%s5758_s0 + $0x1ec] sm:$0xf] }
 0x177   :  { %v1254_v24 = vadd.f32 %v1253_v54, %v1085_v31  ;;  %v1590_v32 = vadd.f32 %v1589_v26, %v1421_v55  ;;  %5948 = vst [vmem:[#allocation84_spill] sm:$0xff] %v4650_v6 }
 0x178   :  { %5949 = vst [vmem:[#allocation85_spill] sm:$0xff] %v4652_v30 }
 0x179   :  { %v1734_v31 = vmax.f32 %v1590_v32, 0.0 }
 0x17c   :  { %v1422_v59 = vpop.f32.mrf.mxu2 }
 0x17d   :  { %v1423_v19 = vadd.f32 %v1422_v59, %v1254_v24  ;;  %v1591_v25 = vpop.f32.mrf.mxu3  ;;  %v3085_v59 = vld [vmem:[%s5758_s0 + $0x1f8] sm:$0xf0]  ;;  %v1092_v32 = vpop.f32.mrf.mxu0 }
 0x17e   :  { %v1256_v22 = vpop.f32.mrf.mxu1 }
 0x17f   :  { %v1592_v54 = vadd.f32 %v1591_v25, %v1423_v19  ;;  %v1257_v40 = vadd.f32 %v1256_v22, %v1088_v38  ;;  %v3568_v38 = vld [vmem:[%s5758_s0 + $0x1f4] sm:$0xf0] }
 0x181   :  { %v1735_v1 = vmax.f32 %v1592_v54, 0.0  ;;  %1295 = vmatmul.bf16.gmra.mxu1 %v4648_v56  ;;  %1464 = vmatmul.bf16.gmra.mxu2 %v4650_v6 }
 0x182   :  { %1633 = vmatmul.bf16.gmra.mxu3 %v4652_v30  ;;  %v1093_v30 = vadd.f32 %v4478_v7, %v1092_v32  ;;  %v3093_v32 = vld [vmem:[%s5758_s0 + $0x210] sm:$0xf0] }
 0x183   :  { %v1793_v26 = vpack.c.bf16 %v1735_v1, %v1734_v31  ;;  %v3083_v1 = vld [vmem:[%s5758_s0 + $0x1e8] sm:$0xf]  ;;  %v4677_v31 = vor.u32 %v3565_v60, %v3077_v50 }
 0x184   :  { %v1425_v55 = vpop.f32.mrf.mxu2 }
 0x185   :  { %v1594_v23 = vpop.f32.mrf.mxu3  ;;  %1917 = vmatmul.bf16.gmra.mxu0 %v1793_v26  ;;  %v1426_v24 = vadd.f32 %v1425_v55, %v1257_v40  ;;  %v4679_v26 = vor.u32 %v3568_v38, %v3083_v1  ;;  %v4681_v40 = vor.u32 %v3566_v43, %v3085_v59  ;;  %v1094_v1 = vpop.f32.mrf.mxu0  ;;  %v3569_v59 = vld [vmem:[%s5758_s0 + $0x204] sm:$0xf] }
 0x186   :  { %v1258_v28 = vpop.f32.mrf.mxu1 }
 0x187   :  { %v1259_v5 = vadd.f32 %v1258_v28, %v1090_v39  ;;  %v1595_v25 = vadd.f32 %v1594_v23, %v1426_v24  ;;  %5950 = vst [vmem:[#allocation86_spill] sm:$0xff] %v4679_v26 }
 0x188   :  { %5951 = vst [vmem:[#allocation87_spill] sm:$0xff] %v4681_v40 }
 0x189   :  { %v1736_v39 = vmax.f32 %v1595_v25, 0.0  ;;  %v3570_v25 = vld [vmem:[%s5758_s0 + $0x20c] sm:$0xf] }
 0x18c   :  { %v1427_v19 = vpop.f32.mrf.mxu2 }
 0x18d   :  { %v1428_v22 = vadd.f32 %v1427_v19, %v1259_v5  ;;  %v1596_v54 = vpop.f32.mrf.mxu3  ;;  %v1095_v5 = vadd.f32 %v4478_v7, %v1094_v1 }
 0x18e   :  { %v1261_v55 = vpop.f32.mrf.mxu1 }
 0x18f   :  { %v1597_v28 = vadd.f32 %v1596_v54, %v1428_v22  ;;  %v1262_v60 = vadd.f32 %v1261_v55, %v1093_v30  ;;  %v3572_v30 = vld [vmem:[%s5758_s0 + $0x214] sm:$0xf0]  ;;  %v3101_v22 = vld [vmem:[%s5758_s0 + $0x218] sm:$0xf0] }
 0x190   :  { %v4710_v1 = vor.u32 %v3570_v25, %v3101_v22  ;;  %v3573_v25 = vld [vmem:[%s5758_s0 + $0x224] sm:$0xf] }
 0x191   :  { %v1737_v6 = vmax.f32 %v1597_v28, 0.0  ;;  %1300 = vmatmul.bf16.gmra.mxu1 %v4677_v31  ;;  %1469 = vmatmul.bf16.gmra.mxu2 %v4679_v26 }
 0x192   :  { %1638 = vmatmul.bf16.gmra.mxu3 %v4681_v40  ;;  %5952 = vst [vmem:[#allocation88_spill] sm:$0xff] %v4710_v1 }
 0x193   :  { %v1794_v23 = vpack.c.bf16 %v1737_v6, %v1736_v39  ;;  %v3099_v6 = vld [vmem:[%s5758_s0 + $0x208] sm:$0xf] }
 0x194   :  { %v1430_v24 = vpop.f32.mrf.mxu2 }
 0x195   :  { %v1599_v50 = vpop.f32.mrf.mxu3  ;;  %1922 = vmatmul.bf16.gmra.mxu0 %v1794_v23  ;;  %v1431_v43 = vadd.f32 %v1430_v24, %v1262_v60  ;;  %v4706_v23 = vor.u32 %v3569_v59, %v3093_v32  ;;  %v4708_v24 = vor.u32 %v3572_v30, %v3099_v6  ;;  %v1100_v30 = vadd.f32 %v4478_v7, %v4103_v18  ;;  %v3574_v18 = vld [vmem:[%s5758_s0 + $0x22c] sm:$0xf] }
 0x196   :  { %v1263_v38 = vpop.f32.mrf.mxu1 }
 0x197   :  { %v1264_v19 = vadd.f32 %v1263_v38, %v1095_v5  ;;  %v1600_v55 = vadd.f32 %v1599_v50, %v1431_v43  ;;  %v1098_v43 = vadd.f32 %v4478_v7, %v4092_v11  ;;  %v3115_v11 = vld [vmem:[%s5758_s0 + $0x228] sm:$0xf] }
 0x199   :  { %v1738_v5 = vmax.f32 %v1600_v55, 0.0 }
 0x19c   :  { %v1432_v54 = vpop.f32.mrf.mxu2 }
 0x19d   :  { %v1433_v28 = vadd.f32 %v1432_v54, %v1264_v19  ;;  %v1601_v39 = vpop.f32.mrf.mxu3  ;;  %v3117_v54 = vld [vmem:[%s5758_s0 + $0x238] sm:$0xf0] }
 0x19e   :  { %v1266_v60 = vpop.f32.mrf.mxu1 }
 0x19f   :  { %v1602_v38 = vadd.f32 %v1601_v39, %v1433_v28  ;;  %v1267_v6 = vadd.f32 %v1266_v60, %v1098_v43  ;;  %v4741_v43 = vor.u32 %v3574_v18, %v3117_v54  ;;  %v3577_v54 = vld [vmem:[%s5758_s0 + $0x244] sm:$0xf] }
 0x1a1   :  { %v1739_v40 = vmax.f32 %v1602_v38, 0.0  ;;  %1305 = vmatmul.bf16.gmra.mxu1 %v4706_v23  ;;  %1474 = vmatmul.bf16.gmra.mxu2 %v4708_v24  ;;  %5955 = vst [vmem:[#allocation91_spill] sm:$0xff] %v4741_v43 }
 0x1a2   :  { %1643 = vmatmul.bf16.gmra.mxu3 %v4710_v1 }
 0x1a3   :  { %v1795_v26 = vpack.c.bf16 %v1739_v40, %v1738_v5  ;;  %v3109_v40 = vld [vmem:[%s5758_s0 + $0x230] sm:$0xf0] }
 0x1a4   :  { %v1435_v50 = vpop.f32.mrf.mxu2  ;;  %v4737_v38 = vor.u32 %v3573_v25, %v3109_v40  ;;  %v1103_v25 = vadd.f32 %v4478_v7, %v4140_v44  ;;  %v3131_v44 = vld [vmem:[%s5758_s0 + $0x248] sm:$0xf] }
 0x1a5   :  { %v1604_v59 = vpop.f32.mrf.mxu3  ;;  %1927 = vmatmul.bf16.gmra.mxu0 %v1795_v26  ;;  %v1436_v19 = vadd.f32 %v1435_v50, %v1267_v6  ;;  %v3576_v26 = vld [vmem:[%s5758_s0 + $0x234] sm:$0xf0] }
 0x1a6   :  { %v1268_v32 = vpop.f32.mrf.mxu1  ;;  %5953 = vst [vmem:[#allocation89_spill] sm:$0xff] %v4737_v38  ;;  %v4739_v5 = vor.u32 %v3576_v26, %v3115_v11 }
 0x1a7   :  { %v1269_v22 = vadd.f32 %v1268_v32, %v1100_v30  ;;  %v1605_v28 = vadd.f32 %v1604_v59, %v1436_v19 }
 0x1a8   :  { %5954 = vst [vmem:[#allocation90_spill] sm:$0xff] %v4739_v5 }
 0x1a9   :  { %v1740_v6 = vmax.f32 %v1605_v28, 0.0  ;;  %v3125_v28 = vld [vmem:[%s5758_s0 + $0x250] sm:$0xf0] }
 0x1ac   :  { %v1437_v55 = vpop.f32.mrf.mxu2 }
 0x1ad   :  { %v1438_v39 = vadd.f32 %v1437_v55, %v1269_v22  ;;  %v1606_v60 = vpop.f32.mrf.mxu3  ;;  %v1105_v22 = vadd.f32 %v4478_v7, %v4151_v53 }
 0x1ae   :  { %v1271_v50 = vpop.f32.mrf.mxu1 }
 0x1af   :  { %v1607_v32 = vadd.f32 %v1606_v60, %v1438_v39  ;;  %v1272_v26 = vadd.f32 %v1271_v50, %v1103_v25  ;;  %v3580_v39 = vld [vmem:[%s5758_s0 + $0x254] sm:$0xf0]  ;;  %v3578_v50 = vld [vmem:[%s5758_s0 + $0x24c] sm:$0xf]  ;;  %v4774_v25 = vor.u32 %v3577_v54, %v3125_v28  ;;  %v1108_v54 = vadd.f32 %v4478_v7, %v4188_v20  ;;  %v3147_v20 = vld [vmem:[%s5758_s0 + $0x268] sm:$0xf] }
 0x1b1   :  { %v1741_v30 = vmax.f32 %v1607_v32, 0.0  ;;  %1310 = vmatmul.bf16.gmra.mxu1 %v4737_v38  ;;  %1479 = vmatmul.bf16.gmra.mxu2 %v4739_v5  ;;  %v3133_v32 = vld [vmem:[%s5758_s0 + $0x258] sm:$0xf0]  ;;  %5956 = vst [vmem:[#allocation92_spill] sm:$0xff] %v4774_v25 }
 0x1b2   :  { %1648 = vmatmul.bf16.gmra.mxu3 %v4741_v43  ;;  %v4746_v1 = vpop.f32.mrf.mxu0 }
 0x1b3   :  { %v1796_v59 = vpack.c.bf16 %v1741_v30, %v1740_v6 }
 0x1b4   :  { %v1440_v19 = vpop.f32.mrf.mxu2 }
 0x1b5   :  { %v1609_v40 = vpop.f32.mrf.mxu3  ;;  %1932 = vmatmul.bf16.gmra.mxu0 %v1796_v59  ;;  %v1441_v18 = vadd.f32 %v1440_v19, %v1272_v26  ;;  %v4776_v26 = vor.u32 %v3580_v39, %v3131_v44 }
 0x1b6   :  { %v1273_v11 = vpop.f32.mrf.mxu1 }
 0x1b7   :  { %v1274_v53 = vadd.f32 %v1273_v11, %v1105_v22  ;;  %v1610_v30 = vadd.f32 %v1609_v40, %v1441_v18  ;;  %5957 = vst [vmem:[#allocation93_spill] sm:$0xff] %v4776_v26  ;;  %v4778_v22 = vor.u32 %v3578_v50, %v3133_v32  ;;  %v3581_v50 = vld [vmem:[%s5758_s0 + $0x264] sm:$0xf] }
 0x1b9   :  { %5958 = vst [vmem:[#allocation94_spill] sm:$0xff] %v4778_v22  ;;  %v1742_v43 = vmax.f32 %v1610_v30, 0.0  ;;  %v3582_v30 = vld [vmem:[%s5758_s0 + $0x26c] sm:$0xf] }
 0x1ba   :  { %v4755_v55 = vpop.f32.mrf.mxu0 }
 0x1bc   :  { %v1442_v6 = vpop.f32.mrf.mxu2 }
 0x1bd   :  { %v1443_v59 = vadd.f32 %v1442_v6, %v1274_v53  ;;  %v1611_v19 = vpop.f32.mrf.mxu3  ;;  %v1110_v53 = vadd.f32 %v4478_v7, %v4199_v29 }
 0x1be   :  { %v1276_v11 = vpop.f32.mrf.mxu1 }
 0x1bf   :  { %v1612_v60 = vadd.f32 %v1611_v19, %v1443_v59  ;;  %v1277_v39 = vadd.f32 %v1276_v11, %v1108_v54  ;;  %v3149_v59 = vld [vmem:[%s5758_s0 + $0x278] sm:$0xf0] }
 0x1c1   :  { %v1743_v5 = vmax.f32 %v1612_v60, 0.0  ;;  %1315 = vmatmul.bf16.gmra.mxu1 %v4774_v25  ;;  %1484 = vmatmul.bf16.gmra.mxu2 %v4776_v26 }
 0x1c2   :  { %1653 = vmatmul.bf16.gmra.mxu3 %v4778_v22  ;;  %v4783_v38 = vpop.f32.mrf.mxu0 }
 0x1c3   :  { %v1797_v40 = vpack.c.bf16 %v1743_v5, %v1742_v43  ;;  %v3141_v5 = vld [vmem:[%s5758_s0 + $0x270] sm:$0xf0]  ;;  %v3584_v43 = vld [vmem:[%s5758_s0 + $0x274] sm:$0xf0] }
 0x1c4   :  { %v1445_v18 = vpop.f32.mrf.mxu2  ;;  %v4811_v54 = vor.u32 %v3581_v50, %v3141_v5  ;;  %v1113_v50 = vadd.f32 %v4478_v7, %v4236_v45  ;;  %v3163_v45 = vld [vmem:[%s5758_s0 + $0x288] sm:$0xf] }
 0x1c5   :  { %v1614_v28 = vpop.f32.mrf.mxu3  ;;  %1937 = vmatmul.bf16.gmra.mxu0 %v1797_v40  ;;  %v1446_v60 = vadd.f32 %v1445_v18, %v1277_v39  ;;  %v4813_v39 = vor.u32 %v3584_v43, %v3147_v20 }
 0x1c6   :  { %v1278_v44 = vpop.f32.mrf.mxu1  ;;  %5959 = vst [vmem:[#allocation95_spill] sm:$0xff] %v4811_v54 }
 0x1c7   :  { %v1279_v29 = vadd.f32 %v1278_v44, %v1110_v53  ;;  %v1615_v11 = vadd.f32 %v1614_v28, %v1446_v60  ;;  %5960 = vst [vmem:[#allocation96_spill] sm:$0xff] %v4813_v39  ;;  %v4815_v53 = vor.u32 %v3582_v30, %v3149_v59  ;;  %v3585_v30 = vld [vmem:[%s5758_s0 + $0x284] sm:$0xf] }
 0x1c9   :  { %5961 = vst [vmem:[#allocation97_spill] sm:$0xff] %v4815_v53  ;;  %v1744_v22 = vmax.f32 %v1615_v11, 0.0  ;;  %v3586_v11 = vld [vmem:[%s5758_s0 + $0x28c] sm:$0xf] }
 0x1ca   :  { %v4792_v32 = vpop.f32.mrf.mxu0 }
 0x1cc   :  { %v1447_v19 = vpop.f32.mrf.mxu2 }
 0x1cd   :  { %v1448_v40 = vadd.f32 %v1447_v19, %v1279_v29  ;;  %v1616_v18 = vpop.f32.mrf.mxu3  ;;  %v1115_v29 = vadd.f32 %v4478_v7, %v4247_v34 }
 0x1ce   :  { %v1281_v44 = vpop.f32.mrf.mxu1 }
 0x1cf   :  { %v1617_v6 = vadd.f32 %v1616_v18, %v1448_v40  ;;  %v1282_v43 = vadd.f32 %v1281_v44, %v1113_v50  ;;  %v3165_v40 = vld [vmem:[%s5758_s0 + $0x298] sm:$0xf0] }
 0x1d1   :  { %v1745_v26 = vmax.f32 %v1617_v6, 0.0  ;;  %1320 = vmatmul.bf16.gmra.mxu1 %v4811_v54  ;;  %1489 = vmatmul.bf16.gmra.mxu2 %v4813_v39 }
 0x1d2   :  { %1658 = vmatmul.bf16.gmra.mxu3 %v4815_v53  ;;  %v4820_v25 = vpop.f32.mrf.mxu0 }
 0x1d3   :  { %v1798_v28 = vpack.c.bf16 %v1745_v26, %v1744_v22  ;;  %v3157_v26 = vld [vmem:[%s5758_s0 + $0x290] sm:$0xf0]  ;;  %v3588_v22 = vld [vmem:[%s5758_s0 + $0x294] sm:$0xf0] }
 0x1d4   :  { %v1450_v60 = vpop.f32.mrf.mxu2  ;;  %v4848_v50 = vor.u32 %v3585_v30, %v3157_v26  ;;  %v1118_v30 = vadd.f32 %v4478_v7, %v4284_v51  ;;  %v3179_v51 = vld [vmem:[%s5758_s0 + $0x2a8] sm:$0xf] }
 0x1d5   :  { %v1619_v5 = vpop.f32.mrf.mxu3  ;;  %1942 = vmatmul.bf16.gmra.mxu0 %v1798_v28  ;;  %v1451_v6 = vadd.f32 %v1450_v60, %v1282_v43  ;;  %v4850_v43 = vor.u32 %v3588_v22, %v3163_v45 }
 0x1d6   :  { %v1283_v20 = vpop.f32.mrf.mxu1  ;;  %5962 = vst [vmem:[#allocation98_spill] sm:$0xff] %v4848_v50 }
 0x1d7   :  { %v1284_v34 = vadd.f32 %v1283_v20, %v1115_v29  ;;  %v1620_v44 = vadd.f32 %v1619_v5, %v1451_v6  ;;  %5963 = vst [vmem:[#allocation99_spill] sm:$0xff] %v4850_v43  ;;  %v4852_v29 = vor.u32 %v3586_v11, %v3165_v40  ;;  %v3589_v11 = vld [vmem:[%s5758_s0 + $0x2a4] sm:$0xf] }
 0x1d9   :  { %5964 = vst [vmem:[#allocation100_spill] sm:$0xff] %v4852_v29  ;;  %v1746_v53 = vmax.f32 %v1620_v44, 0.0  ;;  %v3590_v44 = vld [vmem:[%s5758_s0 + $0x2ac] sm:$0xf] }
 0x1da   :  { %v4829_v59 = vpop.f32.mrf.mxu0 }
 0x1dc   :  { %v1452_v18 = vpop.f32.mrf.mxu2 }
 0x1dd   :  { %v1453_v28 = vadd.f32 %v1452_v18, %v1284_v34  ;;  %v1621_v60 = vpop.f32.mrf.mxu3  ;;  %v1120_v34 = vadd.f32 %v4478_v7, %v4295_v15 }
 0x1de   :  { %v1286_v20 = vpop.f32.mrf.mxu1 }
 0x1df   :  { %v1622_v19 = vadd.f32 %v1621_v60, %v1453_v28  ;;  %v1287_v22 = vadd.f32 %v1286_v20, %v1118_v30  ;;  %v3181_v28 = vld [vmem:[%s5758_s0 + $0x2b8] sm:$0xf0] }
 0x1e1   :  { %v1747_v39 = vmax.f32 %v1622_v19, 0.0  ;;  %1325 = vmatmul.bf16.gmra.mxu1 %v4848_v50  ;;  %1494 = vmatmul.bf16.gmra.mxu2 %v4850_v43 }
 0x1e2   :  { %1663 = vmatmul.bf16.gmra.mxu3 %v4852_v29  ;;  %v4857_v54 = vpop.f32.mrf.mxu0 }
 0x1e3   :  { %v1799_v5 = vpack.c.bf16 %v1747_v39, %v1746_v53  ;;  %v3173_v39 = vld [vmem:[%s5758_s0 + $0x2b0] sm:$0xf0]  ;;  %v3592_v53 = vld [vmem:[%s5758_s0 + $0x2b4] sm:$0xf0] }
 0x1e4   :  { %v1455_v6 = vpop.f32.mrf.mxu2  ;;  %v4885_v30 = vor.u32 %v3589_v11, %v3173_v39  ;;  %v1123_v11 = vadd.f32 %v4478_v7, %v4332_v9  ;;  %v3195_v9 = vld [vmem:[%s5758_s0 + $0x2c8] sm:$0xf] }
 0x1e5   :  { %v1624_v26 = vpop.f32.mrf.mxu3  ;;  %1947 = vmatmul.bf16.gmra.mxu0 %v1799_v5  ;;  %v1456_v19 = vadd.f32 %v1455_v6, %v1287_v22  ;;  %v4887_v22 = vor.u32 %v3592_v53, %v3179_v51 }
 0x1e6   :  { %v1288_v45 = vpop.f32.mrf.mxu1  ;;  %5965 = vst [vmem:[#allocation101_spill] sm:$0xff] %v4885_v30 }
 0x1e7   :  { %v1289_v15 = vadd.f32 %v1288_v45, %v1120_v34  ;;  %v1625_v20 = vadd.f32 %v1624_v26, %v1456_v19  ;;  %5966 = vst [vmem:[#allocation102_spill] sm:$0xff] %v4887_v22  ;;  %v4889_v34 = vor.u32 %v3590_v44, %v3181_v28  ;;  %v3593_v44 = vld [vmem:[%s5758_s0 + $0x2c4] sm:$0xf] }
 0x1e9   :  { %5967 = vst [vmem:[#allocation103_spill] sm:$0xff] %v4889_v34  ;;  %v1748_v29 = vmax.f32 %v1625_v20, 0.0  ;;  %v3197_v20 = vld [vmem:[%s5758_s0 + $0x2d8] sm:$0xf0] }
 0x1ea   :  { %v4866_v40 = vpop.f32.mrf.mxu0 }
 0x1ec   :  { %v1457_v60 = vpop.f32.mrf.mxu2 }
 0x1ed   :  { %v1458_v5 = vadd.f32 %v1457_v60, %v1289_v15  ;;  %v1626_v6 = vpop.f32.mrf.mxu3  ;;  %v1125_v15 = vadd.f32 %v4478_v7, %v4346_v58  ;;  %v3594_v60 = vld [vmem:[%s5758_s0 + $0x2cc] sm:$0xf] }
 0x1ee   :  { %v1291_v45 = vpop.f32.mrf.mxu1 }
 0x1ef   :  { %v1627_v18 = vadd.f32 %v1626_v6, %v1458_v5  ;;  %v1292_v53 = vadd.f32 %v1291_v45, %v1123_v11 }
 0x1f1   :  { %v1749_v43 = vmax.f32 %v1627_v18, 0.0  ;;  %1330 = vmatmul.bf16.gmra.mxu1 %v4885_v30  ;;  %1499 = vmatmul.bf16.gmra.mxu2 %v4887_v22 }
 0x1f2   :  { %1668 = vmatmul.bf16.gmra.mxu3 %v4889_v34  ;;  %v4894_v50 = vpop.f32.mrf.mxu0  ;;  %v4924_v34 = vor.u32 %v3594_v60, %v3197_v20  ;;  %v3597_v20 = vld [vmem:[%s5758_s0 + $0x2e4] sm:$0xf] }
 0x1f3   :  { %v1800_v26 = vpack.c.bf16 %v1749_v43, %v1748_v29  ;;  %v3189_v43 = vld [vmem:[%s5758_s0 + $0x2d0] sm:$0xf0]  ;;  %v3596_v29 = vld [vmem:[%s5758_s0 + $0x2d4] sm:$0xf0] }
 0x1f4   :  { %v1460_v19 = vpop.f32.mrf.mxu2  ;;  %v4922_v11 = vor.u32 %v3596_v29, %v3195_v9  ;;  %5970 = vst [vmem:[#allocation106_spill] sm:$0xff] %v4924_v34 }
 0x1f5   :  { %v1629_v39 = vpop.f32.mrf.mxu3  ;;  %1952 = vmatmul.bf16.gmra.mxu0 %v1800_v26  ;;  %v1461_v18 = vadd.f32 %v1460_v19, %v1292_v53  ;;  %v4920_v19 = vor.u32 %v3593_v44, %v3189_v43  ;;  %v1128_v44 = vadd.f32 %v4478_v7, %v4380_v10  ;;  %v3211_v10 = vld [vmem:[%s5758_s0 + $0x2e8] sm:$0xf] }
 0x1f6   :  { %v1293_v51 = vpop.f32.mrf.mxu1  ;;  %5969 = vst [vmem:[#allocation105_spill] sm:$0xff] %v4922_v11 }
 0x1f7   :  { %v1294_v58 = vadd.f32 %v1293_v51, %v1125_v15  ;;  %v1630_v6 = vadd.f32 %v1629_v39, %v1461_v18  ;;  %5968 = vst [vmem:[#allocation104_spill] sm:$0xff] %v4920_v19 }
 0x1f9   :  { %v1750_v15 = vmax.f32 %v1630_v6, 0.0  ;;  %v3600_v6 = vld [vmem:[%s5758_s0 + $0x2f4] sm:$0xf0] }
 0x1fa   :  { %v4903_v28 = vpop.f32.mrf.mxu0 }
 0x1fc   :  { %v1462_v5 = vpop.f32.mrf.mxu2 }
 0x1fd   :  { %v1463_v45 = vadd.f32 %v1462_v5, %v1294_v58  ;;  %v1631_v26 = vpop.f32.mrf.mxu3  ;;  %v1130_v58 = vadd.f32 %v4478_v7, %v4397_v42 }
 0x1fe   :  { %v1296_v53 = vpop.f32.mrf.mxu1 }
 0x1ff   :  { %v1632_v51 = vadd.f32 %v1631_v26, %v1463_v45  ;;  %v1297_v29 = vadd.f32 %v1296_v53, %v1128_v44  ;;  %v3598_v45 = vld [vmem:[%s5758_s0 + $0x2ec] sm:$0xf]  ;;  %v3213_v26 = vld [vmem:[%s5758_s0 + $0x2f8] sm:$0xf0]  ;;  %v4957_v44 = vor.u32 %v3600_v6, %v3211_v10 }
 0x201   :  { %v1751_v22 = vmax.f32 %v1632_v51, 0.0  ;;  %1335 = vmatmul.bf16.gmra.mxu1 %v4920_v19  ;;  %1504 = vmatmul.bf16.gmra.mxu2 %v4922_v11  ;;  %5971 = vst [vmem:[#allocation107_spill] sm:$0xff] %v4957_v44 }
 0x202   :  { %1673 = vmatmul.bf16.gmra.mxu3 %v4924_v34  ;;  %v4929_v30 = vpop.f32.mrf.mxu0  ;;  %v4959_v34 = vor.u32 %v3598_v45, %v3213_v26  ;;  %v3601_v26 = vld [vmem:[%s5758_s0 + $0x304] sm:$0xf] }
 0x203   :  { %v1801_v39 = vpack.c.bf16 %v1751_v22, %v1750_v15  ;;  %v3205_v22 = vld [vmem:[%s5758_s0 + $0x2f0] sm:$0xf0] }
 0x204   :  { %v1465_v18 = vpop.f32.mrf.mxu2  ;;  %5972 = vst [vmem:[#allocation108_spill] sm:$0xff] %v4959_v34 }
 0x205   :  { %v1634_v43 = vpop.f32.mrf.mxu3  ;;  %1957 = vmatmul.bf16.gmra.mxu0 %v1801_v39  ;;  %v1466_v60 = vadd.f32 %v1465_v18, %v1297_v29  ;;  %v4955_v18 = vor.u32 %v3597_v20, %v3205_v22  ;;  %v1133_v20 = vadd.f32 %v4478_v7, %v4431_v61  ;;  %v3227_v61 = vld [vmem:[%s5758_s0 + $0x308] sm:$0xf] }
 0x206   :  { %v1298_v9 = vpop.f32.mrf.mxu1 }
 0x207   :  { %v1299_v42 = vadd.f32 %v1298_v9, %v1130_v58  ;;  %v1635_v51 = vadd.f32 %v1634_v43, %v1466_v60 }
 0x209   :  { %v1752_v58 = vmax.f32 %v1635_v51, 0.0  ;;  %v3604_v51 = vld [vmem:[%s5758_s0 + $0x314] sm:$0xf0] }
 0x20a   :  { %v4938_v5 = vpop.f32.mrf.mxu0 }
 0x20c   :  { %v1467_v53 = vpop.f32.mrf.mxu2 }
 0x20d   :  { %v1468_v15 = vadd.f32 %v1467_v53, %v1299_v42  ;;  %v1636_v39 = vpop.f32.mrf.mxu3  ;;  %v1135_v42 = vadd.f32 %v4478_v7, %v4445_v41  ;;  %v3602_v7 = vld [vmem:[%s5758_s0 + $0x30c] sm:$0xf]  ;;  %v3229_v41 = vld [vmem:[%s5758_s0 + $0x318] sm:$0xf0] }
 0x20e   :  { %v1301_v29 = vpop.f32.mrf.mxu1 }
 0x20f   :  { %v1637_v9 = vadd.f32 %v1636_v39, %v1468_v15  ;;  %v1302_v6 = vadd.f32 %v1301_v29, %v1133_v20 }
 0x211   :  { %v1753_v11 = vmax.f32 %v1637_v9, 0.0  ;;  %1340 = vmatmul.bf16.gmra.mxu1 %v4955_v18  ;;  %1509 = vmatmul.bf16.gmra.mxu2 %v4957_v44 }
 0x212   :  { %1678 = vmatmul.bf16.gmra.mxu3 %v4959_v34  ;;  %v4964_v19 = vpop.f32.mrf.mxu0 }
 0x213   :  { %v1802_v43 = vpack.c.bf16 %v1753_v11, %v1752_v58  ;;  %v3221_v11 = vld [vmem:[%s5758_s0 + $0x310] sm:$0xf0] }
 0x214   :  { %v1470_v60 = vpop.f32.mrf.mxu2 }
 0x215   :  { %v1639_v22 = vpop.f32.mrf.mxu3  ;;  %1962 = vmatmul.bf16.gmra.mxu0 %v1802_v43  ;;  %v1471_v45 = vadd.f32 %v1470_v60, %v1302_v6  ;;  %v4988_v43 = vor.u32 %v3601_v26, %v3221_v11  ;;  %v4990_v60 = vor.u32 %v3604_v51, %v3227_v61  ;;  %v4992_v6 = vor.u32 %v3602_v7, %v3229_v41  ;;  %v5000_v26 = vld [vmem:[%s5757_s2] ss:$0 sm:$0xff] }
 0x216   :  { %v1303_v10 = vpop.f32.mrf.mxu1  ;;  %v1138_v11 = vadd.f32 %v5000_v26, %v4099_v13  ;;  %v1140_v7 = vadd.f32 %v5000_v26, %v4132_v35  ;;  %v3243_v13 = vld [vmem:[%s5758_s0 + $0x328] sm:$0xf] }
 0x217   :  { %v1304_v15 = vadd.f32 %v1303_v10, %v1135_v42  ;;  %v1640_v29 = vadd.f32 %v1639_v22, %v1471_v45  ;;  %5973 = vst [vmem:[#allocation109_spill] sm:$0xff] %v4988_v43 }
 0x218   :  { %5974 = vst [vmem:[#allocation110_spill] sm:$0xff] %v4990_v60 }
 0x219   :  { %5975 = vst [vmem:[#allocation111_spill] sm:$0xff] %v4992_v6  ;;  %v1754_v42 = vmax.f32 %v1640_v29, 0.0  ;;  %v3237_v29 = vld [vmem:[%s5758_s0 + $0x330] sm:$0xf0] }
 0x21a   :  { %v1925_v53 = vpop.f32.mrf.mxu0 }
 0x21c   :  { %v1472_v39 = vpop.f32.mrf.mxu2 }
 0x21d   :  { %v1473_v9 = vadd.f32 %v1472_v39, %v1304_v15  ;;  %v1641_v58 = vpop.f32.mrf.mxu3 }
 0x21e   :  { %v1306_v20 = vpop.f32.mrf.mxu1 }
 0x21f   :  { %v1642_v10 = vadd.f32 %v1641_v58, %v1473_v9  ;;  %v1307_v15 = vadd.f32 %v1306_v20, %v1138_v11  ;;  %v3608_v9 = vld [vmem:[%s5758_s0 + $0x334] sm:$0xf0]  ;;  %v3606_v20 = vld [vmem:[%s5758_s0 + $0x32c] sm:$0xf] }
 0x221   :  { %v1755_v34 = vmax.f32 %v1642_v10, 0.0  ;;  %1345 = vmatmul.bf16.gmra.mxu1 %v4988_v43  ;;  %1514 = vmatmul.bf16.gmra.mxu2 %v4990_v60  ;;  %v3245_v10 = vld [vmem:[%s5758_s0 + $0x338] sm:$0xf0] }
 0x222   :  { %1683 = vmatmul.bf16.gmra.mxu3 %v4992_v6  ;;  %v1928_v44 = vpop.f32.mrf.mxu0  ;;  %v5026_v6 = vor.u32 %v3608_v9, %v3243_v13  ;;  %v1143_v13 = vadd.f32 %v5000_v26, %v4147_v47  ;;  %v3253_v47 = vld [vmem:[%s5758_s0 + $0x350] sm:$0xf0] }
 0x223   :  { %v1803_v22 = vpack.c.bf16 %v1755_v34, %v1754_v42  ;;  %v3605_v34 = vld [vmem:[%s5758_s0 + $0x324] sm:$0xf] }
 0x224   :  { %v1475_v45 = vpop.f32.mrf.mxu2 }
 0x225   :  { %v1644_v61 = vpop.f32.mrf.mxu3  ;;  %1967 = vmatmul.bf16.gmra.mxu0 %v1803_v22  ;;  %v1476_v41 = vadd.f32 %v1475_v45, %v1307_v15  ;;  %v5024_v15 = vor.u32 %v3605_v34, %v3237_v29  ;;  %v2058_v34 = vpack.c.bf16 %v4938_v5, %v4929_v30  ;;  %v3609_v30 = vld [vmem:[%s5758_s0 + $0x344] sm:$0xf] }
 0x226   :  { %v1308_v51 = vpop.f32.mrf.mxu1 }
 0x227   :  { %v1309_v58 = vadd.f32 %v1308_v51, %v1140_v7  ;;  %v1645_v22 = vadd.f32 %v1644_v61, %v1476_v41  ;;  %v5028_v51 = vor.u32 %v3606_v20, %v3245_v10  ;;  %v2059_v7 = vpack.c.bf16 %v1925_v53, %v4964_v19  ;;  %v3261_v10 = vld [vmem:[%s5758_s0 + $0x358] sm:$0xf0] }
 0x22a   :  { %v1930_v39 = vpop.f32.mrf.mxu0 }
 0x22b   :  { %v2060_v35 = vpack.c.bf16 %v1930_v39, %v1928_v44  ;;  %v1756_v39 = vmax.f32 %v1645_v22, 0.0 }
 0x22c   :  { %v1477_v42 = vpop.f32.mrf.mxu2 }
 0x22d   :  { %v1478_v45 = vadd.f32 %v1477_v42, %v1309_v58  ;;  %v1646_v11 = vpop.f32.mrf.mxu3  ;;  %2089 = vmatpush.bf16.msra.mxu1 %v2060_v35  ;;  %v2057_v58 = vpack.c.bf16 %v4903_v28, %v4894_v50  ;;  %v1145_v35 = vadd.f32 %v5000_v26, %v4180_v3  ;;  %v3612_v3 = vld [vmem:[%s5758_s0 + $0x354] sm:$0xf0] }
 0x22e   :  { %v1311_v60 = vpop.f32.mrf.mxu1 }
 0x22f   :  { %v1647_v44 = vadd.f32 %v1646_v11, %v1478_v45  ;;  %v1312_v9 = vadd.f32 %v1311_v60, %v1143_v13  ;;  %v3610_v60 = vld [vmem:[%s5758_s0 + $0x34c] sm:$0xf] }
 0x231   :  { %v1757_v43 = vmax.f32 %v1647_v44, 0.0  ;;  %1350 = vmatmul.bf16.gmra.mxu1 %v5024_v15  ;;  %1519 = vmatmul.bf16.gmra.mxu2 %v5026_v6  ;;  %v5066_v44 = vor.u32 %v3609_v30, %v3253_v47 }
 0x232   :  { %1688 = vmatmul.bf16.gmra.mxu3 %v5028_v51  ;;  %2090 = vmatpush.bf16.msra.mxu1 %v2059_v7  ;;  %v5034_v61 = vpop.f32.mrf.mxu0 }
 0x233   :  { %v1804_v41 = vpack.c.bf16 %v1757_v43, %v1756_v39  ;;  %v3259_v43 = vld [vmem:[%s5758_s0 + $0x348] sm:$0xf]  ;;  %v5976_v39 = vpack.c.bf16 %v4866_v40, %v4857_v54 }
 0x234   :  { %v1480_v29 = vpop.f32.mrf.mxu2  ;;  %v5068_v7 = vor.u32 %v3612_v3, %v3259_v43  ;;  %v1150_v43 = vadd.f32 %v5000_v26, %v4228_v2  ;;  %v5980_v3 = vpack.c.bf16 %v4755_v55, %v4746_v1  ;;  %v3616_v2 = vld [vmem:[%s5758_s0 + $0x374] sm:$0xf0]  ;;  %v3614_v1 = vld [vmem:[%s5758_s0 + $0x36c] sm:$0xf]  ;;  %v3277_v55 = vld [vmem:[%s5758_s0 + $0x378] sm:$0xf0] }
 0x235   :  { %v1649_v19 = vpop.f32.mrf.mxu3  ;;  %1972 = vmatmul.bf16.gmra.mxu0 %v1804_v41  ;;  %v1481_v20 = vadd.f32 %v1480_v29, %v1312_v9 }
 0x236   :  { %2091 = vmatpush.bf16.msra.mxu1 %v2058_v34  ;;  %v1313_v53 = vpop.f32.mrf.mxu1  ;;  %v5073_v34 = vor.u32 %v3610_v60, %v3261_v10 }
 0x237   :  { %v1314_v50 = vadd.f32 %v1313_v53, %v1145_v35  ;;  %v1650_v22 = vadd.f32 %v1649_v19, %v1481_v20  ;;  %v5978_v19 = vpack.c.bf16 %v4829_v59, %v4820_v25  ;;  %v5979_v20 = vpack.c.bf16 %v4792_v32, %v4783_v38  ;;  %v3613_v59 = vld [vmem:[%s5758_s0 + $0x364] sm:$0xf]  ;;  %v3269_v38 = vld [vmem:[%s5758_s0 + $0x370] sm:$0xf0]  ;;  %v3275_v32 = vld [vmem:[%s5758_s0 + $0x368] sm:$0xf] }
 0x238   :  { %5977 = vst [vmem:[#allocation112_spill] sm:$0xff] %v5073_v34 }
 0x239   :  { %v1758_v13 = vmax.f32 %v1650_v22, 0.0 }
 0x23a   :  { %2092 = vmatpush.bf16.msra.mxu1 %v2057_v58  ;;  %v5047_v5 = vpop.f32.mrf.mxu0  ;;  %v1148_v58 = vadd.f32 %v5000_v26, %v4195_v27 }
 0x23c   :  { %v1482_v42 = vpop.f32.mrf.mxu2 }
 0x23d   :  { %v1483_v45 = vadd.f32 %v1482_v42, %v1314_v50  ;;  %v1651_v11 = vpop.f32.mrf.mxu3 }
 0x23e   :  { %2093 = vmatpush.bf16.msra.mxu1 %v5976_v39  ;;  %v1316_v41 = vpop.f32.mrf.mxu1  ;;  %v5117_v39 = vor.u32 %v3616_v2, %v3275_v32  ;;  %v3620_v32 = vld [vmem:[%s5758_s0 + $0x394] sm:$0xf0] }
 0x23f   :  { %v1652_v29 = vadd.f32 %v1651_v11, %v1483_v45  ;;  %v1317_v47 = vadd.f32 %v1316_v41, %v1148_v58  ;;  %v5115_v11 = vor.u32 %v3613_v59, %v3269_v38  ;;  %v3617_v59 = vld [vmem:[%s5758_s0 + $0x384] sm:$0xf]  ;;  %v3285_v38 = vld [vmem:[%s5758_s0 + $0x390] sm:$0xf0] }
 0x241   :  { %v1759_v53 = vmax.f32 %v1652_v29, 0.0  ;;  %1355 = vmatmul.bf16.gmra.mxu1 %v5066_v44  ;;  %1524 = vmatmul.bf16.gmra.mxu2 %v5068_v7  ;;  %v5119_v29 = vor.u32 %v3614_v1, %v3277_v55  ;;  %v3293_v1 = vld [vmem:[%s5758_s0 + $0x398] sm:$0xf0] }
 0x242   :  { %1693 = vmatmul.bf16.gmra.mxu3 %v5073_v34  ;;  %2094 = vmatpush.bf16.msra.mxu1 %v5978_v19  ;;  %v5081_v9 = vpop.f32.mrf.mxu0 }
 0x243   :  { %v1805_v54 = vpack.c.bf16 %v1759_v53, %v1758_v13  ;;  %5981 = vst [vmem:[#allocation113_spill] sm:$0xff] %v5119_v29 }
 0x244   :  { %v1485_v40 = vpop.f32.mrf.mxu2 }
 0x245   :  { %v1654_v35 = vpop.f32.mrf.mxu3  ;;  %1977 = vmatmul.bf16.gmra.mxu0 %v1805_v54  ;;  %v1486_v25 = vadd.f32 %v1485_v40, %v1317_v47 }
 0x246   :  { %2095 = vmatpush.bf16.msra.mxu1 %v5979_v20  ;;  %v1318_v30 = vpop.f32.mrf.mxu1 }
 0x247   :  { %v1319_v50 = vadd.f32 %v1318_v30, %v1150_v43  ;;  %v1655_v42 = vadd.f32 %v1654_v35, %v1486_v25  ;;  %v1153_v35 = vadd.f32 %v5000_v26, %v4243_v52  ;;  %v1155_v43 = vadd.f32 %v5000_v26, %v4276_v16  ;;  %v3291_v52 = vld [vmem:[%s5758_s0 + $0x388] sm:$0xf] }
 0x249   :  { %v1760_v53 = vmax.f32 %v1655_v42, 0.0 }
 0x24a   :  { %2096 = vmatpush.bf16.msra.mxu1 %v5980_v3  ;;  %v5096_v27 = vpop.f32.mrf.mxu0 }
 0x24c   :  { %v1487_v10 = vpop.f32.mrf.mxu2 }
 0x24d   :  { %v1488_v22 = vadd.f32 %v1487_v10, %v1319_v50  ;;  %v1656_v45 = vpop.f32.mrf.mxu3  ;;  %v3618_v50 = vld [vmem:[%s5758_s0 + $0x38c] sm:$0xf] }
 0x24e   :  { %v1321_v41 = vpop.f32.mrf.mxu1 }
 0x24f   :  { %v1657_v13 = vadd.f32 %v1656_v45, %v1488_v22  ;;  %v1322_v47 = vadd.f32 %v1321_v41, %v1153_v35  ;;  %v5152_v45 = vor.u32 %v3617_v59, %v3285_v38  ;;  %v5154_v41 = vor.u32 %v3620_v32, %v3291_v52  ;;  %v3621_v32 = vld [vmem:[%s5758_s0 + $0x3a4] sm:$0xf] }
 0x250   :  { %v1160_v38 = vadd.f32 %v5000_v26, %v4324_v37 }
 0x251   :  { %v1761_v19 = vmax.f32 %v1657_v13, 0.0  ;;  %1360 = vmatmul.bf16.gmra.mxu1 %v5115_v11  ;;  %1529 = vmatmul.bf16.gmra.mxu2 %v5117_v39 }
 0x252   :  { %1698 = vmatmul.bf16.gmra.mxu3 %v5119_v29  ;;  %v5124_v54 = vpop.f32.mrf.mxu0 }
 0x253   :  { %v1806_v40 = vpack.c.bf16 %v1761_v19, %v1760_v53  ;;  %v5156_v53 = vor.u32 %v3618_v50, %v3293_v1  ;;  %v3301_v50 = vld [vmem:[%s5758_s0 + $0x3b0] sm:$0xf0]  ;;  %v3624_v1 = vld [vmem:[%s5758_s0 + $0x3b4] sm:$0xf0] }
 0x254   :  { %v1490_v58 = vpop.f32.mrf.mxu2 }
 0x255   :  { %v1659_v20 = vpop.f32.mrf.mxu3  ;;  %1982 = vmatmul.bf16.gmra.mxu0 %v1806_v40  ;;  %v1491_v25 = vadd.f32 %v1490_v58, %v1322_v47  ;;  %5982 = vst [vmem:[#allocation114_spill] sm:$0xff] %v5156_v53  ;;  %v1158_v47 = vadd.f32 %v5000_v26, %v4291_v33  ;;  %v3307_v33 = vld [vmem:[%s5758_s0 + $0x3a8] sm:$0xf] }
 0x256   :  { %v1323_v30 = vpop.f32.mrf.mxu1 }
 0x257   :  { %v1324_v16 = vadd.f32 %v1323_v30, %v1155_v43  ;;  %v1660_v10 = vadd.f32 %v1659_v20, %v1491_v25 }
 0x259   :  { %v1762_v40 = vmax.f32 %v1660_v10, 0.0  ;;  %v3622_v10 = vld [vmem:[%s5758_s0 + $0x3ac] sm:$0xf] }
 0x25a   :  { %v5133_v3 = vpop.f32.mrf.mxu0 }
 0x25c   :  { %v1492_v55 = vpop.f32.mrf.mxu2 }
 0x25d   :  { %v1493_v42 = vadd.f32 %v1492_v55, %v1324_v16  ;;  %v1661_v22 = vpop.f32.mrf.mxu3 }
 0x25e   :  { %v1326_v13 = vpop.f32.mrf.mxu1 }
 0x25f   :  { %v1662_v19 = vadd.f32 %v1661_v22, %v1493_v42  ;;  %v1327_v59 = vadd.f32 %v1326_v13, %v1158_v47  ;;  %v3309_v42 = vld [vmem:[%s5758_s0 + $0x3b8] sm:$0xf0] }
 0x260   :  { %v5193_v47 = vor.u32 %v3622_v10, %v3309_v42  ;;  %v3625_v42 = vld [vmem:[%s5758_s0 + $0x3c4] sm:$0xf] }
 0x261   :  { %v1763_v58 = vmax.f32 %v1662_v19, 0.0  ;;  %1365 = vmatmul.bf16.gmra.mxu1 %v5152_v45  ;;  %1534 = vmatmul.bf16.gmra.mxu2 %v5154_v41 }
 0x262   :  { %1703 = vmatmul.bf16.gmra.mxu3 %v5156_v53  ;;  %v5161_v35 = vpop.f32.mrf.mxu0  ;;  %5983 = vst [vmem:[#allocation115_spill] sm:$0xff] %v5193_v47 }
 0x263   :  { %v1807_v20 = vpack.c.bf16 %v1763_v58, %v1762_v40  ;;  %v5189_v58 = vor.u32 %v3621_v32, %v3301_v50  ;;  %v1163_v32 = vadd.f32 %v5000_v26, %v4339_v46  ;;  %v3323_v46 = vld [vmem:[%s5758_s0 + $0x3c8] sm:$0xf] }
 0x264   :  { %v1495_v30 = vpop.f32.mrf.mxu2 }
 0x265   :  { %v1664_v43 = vpop.f32.mrf.mxu3  ;;  %1987 = vmatmul.bf16.gmra.mxu0 %v1807_v20  ;;  %v1496_v52 = vadd.f32 %v1495_v30, %v1327_v59  ;;  %v5191_v20 = vor.u32 %v3624_v1, %v3307_v33 }
 0x266   :  { %v1328_v25 = vpop.f32.mrf.mxu1 }
 0x267   :  { %v1329_v37 = vadd.f32 %v1328_v25, %v1160_v38  ;;  %v1665_v13 = vadd.f32 %v1664_v43, %v1496_v52 }
 0x269   :  { %v1764_v59 = vmax.f32 %v1665_v13, 0.0  ;;  %v3317_v13 = vld [vmem:[%s5758_s0 + $0x3d0] sm:$0xf0] }
 0x26a   :  { %v5170_v16 = vpop.f32.mrf.mxu0 }
 0x26c   :  { %v1497_v22 = vpop.f32.mrf.mxu2 }
 0x26d   :  { %v1498_v19 = vadd.f32 %v1497_v22, %v1329_v37  ;;  %v1666_v40 = vpop.f32.mrf.mxu3  ;;  %v1165_v37 = vadd.f32 %v5000_v26, %v4369_v8 }
 0x26e   :  { %v1331_v30 = vpop.f32.mrf.mxu1 }
 0x26f   :  { %v1667_v25 = vadd.f32 %v1666_v40, %v1498_v19  ;;  %v1332_v1 = vadd.f32 %v1331_v30, %v1163_v32  ;;  %v3628_v19 = vld [vmem:[%s5758_s0 + $0x3d4] sm:$0xf0]  ;;  %v3626_v40 = vld [vmem:[%s5758_s0 + $0x3cc] sm:$0xf]  ;;  %v3325_v30 = vld [vmem:[%s5758_s0 + $0x3d8] sm:$0xf0] }
 0x270   :  { %v5226_v32 = vor.u32 %v3628_v19, %v3323_v46  ;;  %v5228_v60 = vor.u32 %v3626_v40, %v3325_v30  ;;  %v3629_v30 = vld [vmem:[%s5758_s0 + $0x3e4] sm:$0xf] }
 0x271   :  { %v1765_v38 = vmax.f32 %v1667_v25, 0.0  ;;  %1370 = vmatmul.bf16.gmra.mxu1 %v5189_v58  ;;  %1539 = vmatmul.bf16.gmra.mxu2 %v5191_v20 }
 0x272   :  { %1708 = vmatmul.bf16.gmra.mxu3 %v5193_v47  ;;  %v5198_v28 = vpop.f32.mrf.mxu0  ;;  %5984 = vst [vmem:[#allocation116_spill] sm:$0xff] %v5228_v60 }
 0x273   :  { %v1808_v43 = vpack.c.bf16 %v1765_v38, %v1764_v59 }
 0x274   :  { %v1500_v52 = vpop.f32.mrf.mxu2 }
 0x275   :  { %v1669_v50 = vpop.f32.mrf.mxu3  ;;  %1992 = vmatmul.bf16.gmra.mxu0 %v1808_v43  ;;  %v1501_v10 = vadd.f32 %v1500_v52, %v1332_v1  ;;  %v5224_v52 = vor.u32 %v3625_v42, %v3317_v13  ;;  %v1168_v42 = vadd.f32 %v5000_v26, %v4390_v57  ;;  %v3339_v57 = vld [vmem:[%s5758_s0 + $0x3e8] sm:$0xf] }
 0x276   :  { %v1333_v33 = vpop.f32.mrf.mxu1 }
 0x277   :  { %v1334_v8 = vadd.f32 %v1333_v33, %v1165_v37  ;;  %v1670_v59 = vadd.f32 %v1669_v50, %v1501_v10 }
 0x279   :  { %v1766_v37 = vmax.f32 %v1670_v59, 0.0  ;;  %v3632_v59 = vld [vmem:[%s5758_s0 + $0x3f4] sm:$0xf0] }
 0x27a   :  { %v5207_v22 = vpop.f32.mrf.mxu0 }
 0x27c   :  { %v1502_v25 = vpop.f32.mrf.mxu2 }
 0x27d   :  { %v1503_v38 = vadd.f32 %v1502_v25, %v1334_v8  ;;  %v1671_v43 = vpop.f32.mrf.mxu3  ;;  %v1170_v8 = vadd.f32 %v5000_v26, %v4420_v14 }
 0x27e   :  { %v1336_v1 = vpop.f32.mrf.mxu1 }
 0x27f   :  { %v1672_v33 = vadd.f32 %v1671_v43, %v1503_v38  ;;  %v1337_v19 = vadd.f32 %v1336_v1, %v1168_v42  ;;  %v3630_v38 = vld [vmem:[%s5758_s0 + $0x3ec] sm:$0xf]  ;;  %v3341_v43 = vld [vmem:[%s5758_s0 + $0x3f8] sm:$0xf0]  ;;  %v5261_v42 = vor.u32 %v3632_v59, %v3339_v57 }
 0x281   :  { %v1767_v2 = vmax.f32 %v1672_v33, 0.0  ;;  %1375 = vmatmul.bf16.gmra.mxu1 %v5224_v52  ;;  %1544 = vmatmul.bf16.gmra.mxu2 %v5226_v32 }
 0x282   :  { %1713 = vmatmul.bf16.gmra.mxu3 %v5228_v60  ;;  %v5233_v55 = vpop.f32.mrf.mxu0  ;;  %v5263_v60 = vor.u32 %v3630_v38, %v3341_v43 }
 0x283   :  { %v1809_v50 = vpack.c.bf16 %v1767_v2, %v1766_v37  ;;  %v3333_v2 = vld [vmem:[%s5758_s0 + $0x3f0] sm:$0xf0] }
 0x284   :  { %v1505_v10 = vpop.f32.mrf.mxu2  ;;  %5985 = vst [vmem:[#allocation117_spill] sm:$0xff] %v5263_v60 }
 0x285   :  { %v1674_v13 = vpop.f32.mrf.mxu3  ;;  %1997 = vmatmul.bf16.gmra.mxu0 %v1809_v50  ;;  %v1506_v40 = vadd.f32 %v1505_v10, %v1337_v19  ;;  %v5259_v10 = vor.u32 %v3629_v30, %v3333_v2  ;;  %v1173_v30 = vadd.f32 %v5000_v26, %v4441_v62 }
 0x286   :  { %v1338_v46 = vpop.f32.mrf.mxu1 }
 0x287   :  { %v1339_v14 = vadd.f32 %v1338_v46, %v1170_v8  ;;  %v1675_v33 = vadd.f32 %v1674_v13, %v1506_v40 }
 0x289   :  { %v1768_v8 = vmax.f32 %v1675_v33, 0.0 }
 0x28a   :  { %v5242_v25 = vpop.f32.mrf.mxu0 }
 0x28c   :  { %v1507_v1 = vpop.f32.mrf.mxu2 }
 0x28d   :  { %v1508_v37 = vadd.f32 %v1507_v1, %v1339_v14  ;;  %v1676_v50 = vpop.f32.mrf.mxu3  ;;  %v1175_v14 = vadd.f32 %v5000_v26, %v4465_v0 }
 0x28e   :  { %v1341_v19 = vpop.f32.mrf.mxu1 }
 0x28f   :  { %v1677_v46 = vadd.f32 %v1676_v50, %v1508_v37  ;;  %v1342_v59 = vadd.f32 %v1341_v19, %v1173_v30  ;;  %v1178_v19 = vadd.f32 %v5000_v26, %v4101_v17 }
 0x291   :  { %v1769_v47 = vmax.f32 %v1677_v46, 0.0  ;;  %1380 = vmatmul.bf16.gmra.mxu1 %v5259_v10  ;;  %1549 = vmatmul.bf16.gmra.mxu2 %v5261_v42 }
 0x292   :  { %1718 = vmatmul.bf16.gmra.mxu3 %v5263_v60  ;;  %v1963_v53 = vpop.f32.mrf.mxu0 }
 0x293   :  { %v1810_v13 = vpack.c.bf16 %v1769_v47, %v1768_v8 }
 0x294   :  { %v1510_v40 = vpop.f32.mrf.mxu2 }
 0x295   :  { %v1679_v2 = vpop.f32.mrf.mxu3  ;;  %2002 = vmatmul.bf16.gmra.mxu0 %v1810_v13  ;;  %v1511_v38 = vadd.f32 %v1510_v40, %v1342_v59 }
 0x296   :  { %v1343_v57 = vpop.f32.mrf.mxu1 }
 0x297   :  { %v1344_v1 = vadd.f32 %v1343_v57, %v1175_v14  ;;  %v1680_v37 = vadd.f32 %v1679_v2, %v1511_v38  ;;  %v1180_v2 = vadd.f32 %v5000_v26, %v4134_v36  ;;  %v2066_v36 = vpack.c.bf16 %v5242_v25, %v5233_v55 }
 0x299   :  { %v1770_v8 = vmax.f32 %v1680_v37, 0.0 }
 0x29a   :  { %v1965_v43 = vpop.f32.mrf.mxu0 }
 0x29c   :  { %v1512_v33 = vpop.f32.mrf.mxu2 }
 0x29d   :  { %v1513_v50 = vadd.f32 %v1512_v33, %v1344_v1  ;;  %v1681_v46 = vpop.f32.mrf.mxu3 }
 0x29e   :  { %v1346_v60 = vpop.f32.mrf.mxu1 }
 0x29f   :  { %v1682_v47 = vadd.f32 %v1681_v46, %v1513_v50  ;;  %v1347_v30 = vadd.f32 %v1346_v60, %v1178_v19  ;;  %v2067_v50 = vpack.c.bf16 %v1965_v43, %v1963_v53  ;;  %v2065_v43 = vpack.c.bf16 %v5207_v22, %v5198_v28 }
 0x2a1   :  { %v1771_v29 = vmax.f32 %v1682_v47, 0.0  ;;  %2097 = vmatmul.bf16.vlgmr.msra.gmra.mxu1 %v3977_v21 }
 0x2a2   :  { %v1968_v62 = vpop.f32.mrf.mxu0 }
 0x2a3   :  { %v1811_v13 = vpack.c.bf16 %v1771_v29, %v1770_v8 }
 0x2a4   :  { %v1515_v34 = vpop.f32.mrf.mxu2 }
 0x2a5   :  { %v1684_v0 = vpop.f32.mrf.mxu3  ;;  %2007 = vmatmul.bf16.gmra.mxu0 %v1811_v13  ;;  %v1516_v57 = vadd.f32 %v1515_v34, %v1347_v30 }
 0x2a6   :  { %v1348_v40 = vpop.f32.mrf.mxu1 }
 0x2a7   :  { %v1349_v14 = vadd.f32 %v1348_v40, %v1180_v2  ;;  %v1685_v33 = vadd.f32 %v1684_v0, %v1516_v57 }
 0x2a9   :  { %v1772_v17 = vmax.f32 %v1685_v33, 0.0 }
 0x2aa   :  { %v1970_v59 = vpop.f32.mrf.mxu0 }
 0x2ab   :  { %v2068_v38 = vpack.c.bf16 %v1970_v59, %v1968_v62  ;;  %v1183_v62 = vadd.f32 %v5000_v26, %v4149_v49  ;;  %v5986_v59 = vpack.c.bf16 %v5170_v16, %v5161_v35  ;;  %v5989_v35 = vpack.c.bf16 %v5096_v27, %v5081_v9 }
 0x2ac   :  { %v1517_v1 = vpop.f32.mrf.mxu2 }
 0x2ad   :  { %v1518_v21 = vadd.f32 %v1517_v1, %v1349_v14  ;;  %v1686_v37 = vpop.f32.mrf.mxu3  ;;  %2258 = vmatpush.bf16.msra.mxu2 %v2068_v38  ;;  %v5987_v38 = vpack.c.bf16 %v5133_v3, %v5124_v54 }
 0x2ae   :  { %v1351_v29 = vpop.f32.mrf.mxu1 }
 0x2af   :  { %v1687_v46 = vadd.f32 %v1686_v37, %v1518_v21  ;;  %v1352_v19 = vadd.f32 %v1351_v29, %v1183_v62  ;;  %v5988_v37 = vld [vmem:[#allocation37_spill] sm:$0xff]  ;;  %v5992_v62 = vld [vmem:[#allocation26_spill] sm:$0xff] }
 0x2b0   :  { %v1188_v29 = vadd.f32 %v5000_v26, %v5988_v37  ;;  %v5996_v37 = vld [vmem:[#allocation30_spill] sm:$0xff] }
 0x2b1   :  { %v1773_v47 = vmax.f32 %v1687_v46, 0.0  ;;  %2259 = vmatpush.bf16.msra.mxu2 %v2067_v50  ;;  %2102 = vmatmul.bf16.gmra.mxu1 %v4031_v48  ;;  %v1185_v48 = vadd.f32 %v5000_v26, %v4182_v4 }
 0x2b2   :  { %v5278_v60 = vpop.f32.mrf.mxu0 }
 0x2b3   :  { %v1812_v34 = vpack.c.bf16 %v1773_v47, %v1772_v17  ;;  %v5990_v17 = vld [vmem:[#allocation39_spill] sm:$0xff] }
 0x2b4   :  { %v1520_v8 = vpop.f32.mrf.mxu2  ;;  %v1190_v54 = vadd.f32 %v5000_v26, %v5990_v17 }
 0x2b5   :  { %v1689_v13 = vpop.f32.mrf.mxu3  ;;  %2012 = vmatmul.bf16.gmra.mxu0 %v1812_v34  ;;  %2260 = vmatpush.bf16.msra.mxu2 %v2066_v36  ;;  %v1521_v0 = vadd.f32 %v1520_v8, %v1352_v19 }
 0x2b6   :  { %v1353_v53 = vpop.f32.mrf.mxu1 }
 0x2b7   :  { %v1354_v55 = vadd.f32 %v1353_v53, %v1185_v48  ;;  %v1690_v30 = vadd.f32 %v1689_v13, %v1521_v0  ;;  %v5993_v0 = vld [vmem:[#allocation29_spill] sm:$0xff] }
 0x2b9   :  { %2261 = vmatpush.bf16.msra.mxu2 %v2065_v43  ;;  %v1774_v14 = vmax.f32 %v1690_v30, 0.0 }
 0x2ba   :  { %v5288_v40 = vpop.f32.mrf.mxu0 }
 0x2bb   :  { %v2069_v25 = vpack.c.bf16 %v5288_v40, %v5278_v60 }
 0x2bc   :  { %v1522_v49 = vpop.f32.mrf.mxu2 }
 0x2bd   :  { %v1523_v2 = vadd.f32 %v1522_v49, %v1354_v55  ;;  %v1691_v57 = vpop.f32.mrf.mxu3  ;;  %2262 = vmatpush.bf16.msra.mxu2 %v5986_v59  ;;  %v5994_v49 = vld [vmem:[#allocation43_spill] sm:$0xff] }
 0x2be   :  { %v1356_v28 = vpop.f32.mrf.mxu1  ;;  %v1193_v30 = vadd.f32 %v5000_v26, %v5994_v49 }
 0x2bf   :  { %v1692_v22 = vadd.f32 %v1691_v57, %v1523_v2  ;;  %v1357_v46 = vadd.f32 %v1356_v28, %v1188_v29  ;;  %v5995_v28 = vld [vmem:[#allocation45_spill] sm:$0xff] }
 0x2c1   :  { %v1775_v4 = vmax.f32 %v1692_v22, 0.0  ;;  %2263 = vmatpush.bf16.msra.mxu2 %v5987_v38  ;;  %2107 = vmatmul.bf16.gmra.mxu1 %v4067_v63  ;;  %v5991_v63 = vpack.c.bf16 %v5047_v5, %v5034_v61  ;;  %v1195_v22 = vadd.f32 %v5000_v26, %v5995_v28 }
 0x2c2   :  { %v5299_v1 = vpop.f32.mrf.mxu0 }
 0x2c3   :  { %v1813_v33 = vpack.c.bf16 %v1775_v4, %v1774_v14 }
 0x2c4   :  { %v1525_v21 = vpop.f32.mrf.mxu2 }
 0x2c5   :  { %v1694_v50 = vpop.f32.mrf.mxu3  ;;  %2017 = vmatmul.bf16.gmra.mxu0 %v1813_v33  ;;  %2264 = vmatpush.bf16.msra.mxu2 %v5989_v35  ;;  %v1526_v3 = vadd.f32 %v1525_v21, %v1357_v46 }
 0x2c6   :  { %v1358_v16 = vpop.f32.mrf.mxu1 }
 0x2c7   :  { %v1359_v36 = vadd.f32 %v1358_v16, %v1190_v54  ;;  %v1695_v9 = vadd.f32 %v1694_v50, %v1526_v3  ;;  %v5997_v3 = vld [vmem:[#allocation33_spill] sm:$0xff] }
 0x2c9   :  { %2265 = vmatpush.bf16.msra.mxu2 %v5991_v63  ;;  %v1776_v19 = vmax.f32 %v1695_v9, 0.0 }
 0x2ca   :  { %v5311_v47 = vpop.f32.mrf.mxu0 }
 0x2cb   :  { %v2070_v34 = vpack.c.bf16 %v5311_v47, %v5299_v1  ;;  %v6023_v47 = vld [vmem:[#allocation35_spill] sm:$0xff] }
 0x2cc   :  { %v1527_v8 = vpop.f32.mrf.mxu2  ;;  %2266 = vmatmul.bf16.vlgmr.msra.gmra.mxu2 %v5992_v62  ;;  %v5998_v62 = vld [vmem:[#allocation49_spill] sm:$0xff] }
 0x2cd   :  { %v1528_v27 = vadd.f32 %v1527_v8, %v1359_v36  ;;  %v1696_v13 = vpop.f32.mrf.mxu3  ;;  %v1198_v9 = vadd.f32 %v5000_v26, %v5998_v62 }
 0x2ce   :  { %v1361_v53 = vpop.f32.mrf.mxu1 }
 0x2cf   :  { %v1697_v43 = vadd.f32 %v1696_v13, %v1528_v27  ;;  %v1362_v59 = vadd.f32 %v1361_v53, %v1193_v30  ;;  %v6000_v30 = vld [vmem:[#allocation34_spill] sm:$0xff] }
 0x2d1   :  { %v1777_v48 = vmax.f32 %v1697_v43, 0.0  ;;  %2112 = vmatmul.bf16.gmra.mxu1 %v5993_v0  ;;  %v5999_v43 = vld [vmem:[#allocation51_spill] sm:$0xff] }
 0x2d2   :  { %v5317_v61 = vpop.f32.mrf.mxu0 }
 0x2d3   :  { %v1814_v5 = vpack.c.bf16 %v1777_v48, %v1776_v19  ;;  %v1200_v19 = vadd.f32 %v5000_v26, %v5999_v43 }
 0x2d4   :  { %v1530_v55 = vpop.f32.mrf.mxu2 }
 0x2d5   :  { %v1699_v2 = vpop.f32.mrf.mxu3  ;;  %2022 = vmatmul.bf16.gmra.mxu0 %v1814_v5  ;;  %v1531_v14 = vadd.f32 %v1530_v55, %v1362_v59 }
 0x2d6   :  { %v1363_v57 = vpop.f32.mrf.mxu1 }
 0x2d7   :  { %v1364_v38 = vadd.f32 %v1363_v57, %v1195_v22  ;;  %v1700_v29 = vadd.f32 %v1699_v2, %v1531_v14 }
 0x2d9   :  { %v1778_v17 = vmax.f32 %v1700_v29, 0.0 }
 0x2da   :  { %v5323_v4 = vpop.f32.mrf.mxu0 }
 0x2db   :  { %v2071_v33 = vpack.c.bf16 %v5323_v4, %v5317_v61 }
 0x2dc   :  { %v1532_v21 = vpop.f32.mrf.mxu2  ;;  %2271 = vmatmul.bf16.gmra.mxu2 %v5996_v37 }
 0x2dd   :  { %v1533_v50 = vadd.f32 %v1532_v21, %v1364_v38  ;;  %v1701_v35 = vpop.f32.mrf.mxu3  ;;  %v6001_v21 = vld [vmem:[#allocation38_spill] sm:$0xff] }
 0x2de   :  { %v1366_v16 = vpop.f32.mrf.mxu1 }
 0x2df   :  { %v1702_v46 = vadd.f32 %v1701_v35, %v1533_v50  ;;  %v1367_v53 = vadd.f32 %v1366_v16, %v1198_v9  ;;  %v6002_v35 = vld [vmem:[#allocation55_spill] sm:$0xff] }
 0x2e0   :  { %v1203_v16 = vadd.f32 %v5000_v26, %v6002_v35 }
 0x2e1   :  { %v1779_v54 = vmax.f32 %v1702_v46, 0.0  ;;  %2117 = vmatmul.bf16.gmra.mxu1 %v5997_v3  ;;  %v6003_v3 = vld [vmem:[#allocation56_spill] sm:$0xff] }
 0x2e2   :  { %v5329_v63 = vpop.f32.mrf.mxu0 }
 0x2e3   :  { %v1815_v36 = vpack.c.bf16 %v1779_v54, %v1778_v17 }
 0x2e4   :  { %v1535_v8 = vpop.f32.mrf.mxu2 }
 0x2e5   :  { %v1704_v27 = vpop.f32.mrf.mxu3  ;;  %2027 = vmatmul.bf16.gmra.mxu0 %v1815_v36  ;;  %v1536_v48 = vadd.f32 %v1535_v8, %v1367_v53  ;;  %v1205_v36 = vadd.f32 %v5000_v26, %v6003_v3  ;;  %v6008_v3 = vld [vmem:[#allocation46_spill] sm:$0xff] }
 0x2e6   :  { %v1368_v13 = vpop.f32.mrf.mxu1 }
 0x2e7   :  { %v1369_v5 = vadd.f32 %v1368_v13, %v1200_v19  ;;  %v1705_v2 = vadd.f32 %v1704_v27, %v1536_v48  ;;  %v6004_v13 = vld [vmem:[#allocation40_spill] sm:$0xff] }
 0x2e9   :  { %v1780_v14 = vmax.f32 %v1705_v2, 0.0  ;;  %v6005_v2 = vld [vmem:[#allocation44_spill] sm:$0xff] }
 0x2ea   :  { %v5335_v0 = vpop.f32.mrf.mxu0 }
 0x2eb   :  { %v2072_v55 = vpack.c.bf16 %v5335_v0, %v5329_v63  ;;  %v6019_v63 = vld [vmem:[#allocation67_spill] sm:$0xff] }
 0x2ec   :  { %v1537_v49 = vpop.f32.mrf.mxu2  ;;  %2276 = vmatmul.bf16.gmra.mxu2 %v6000_v30  ;;  %v6020_v0 = vld [vmem:[#allocation11_spill] sm:$0xff] }
 0x2ed   :  { %v1538_v57 = vadd.f32 %v1537_v49, %v1369_v5  ;;  %v1706_v59 = vpop.f32.mrf.mxu3 }
 0x2ee   :  { %v1371_v28 = vpop.f32.mrf.mxu1 }
 0x2ef   :  { %v1707_v22 = vadd.f32 %v1706_v59, %v1538_v57  ;;  %v1372_v54 = vadd.f32 %v1371_v28, %v1203_v16 }
 0x2f1   :  { %v1781_v38 = vmax.f32 %v1707_v22, 0.0  ;;  %2122 = vmatmul.bf16.gmra.mxu1 %v6001_v21  ;;  %v6006_v22 = vld [vmem:[#allocation60_spill] sm:$0xff] }
 0x2f2   :  { %v5341_v37 = vpop.f32.mrf.mxu0 }
 0x2f3   :  { %v1816_v29 = vpack.c.bf16 %v1781_v38, %v1780_v14  ;;  %v1208_v14 = vadd.f32 %v5000_v26, %v6006_v22 }
 0x2f4   :  { %v1540_v50 = vpop.f32.mrf.mxu2 }
 0x2f5   :  { %v1709_v46 = vpop.f32.mrf.mxu3  ;;  %2032 = vmatmul.bf16.gmra.mxu0 %v1816_v29  ;;  %v1541_v8 = vadd.f32 %v1540_v50, %v1372_v54  ;;  %v6007_v50 = vld [vmem:[#allocation61_spill] sm:$0xff] }
 0x2f6   :  { %v1373_v17 = vpop.f32.mrf.mxu1  ;;  %v1210_v35 = vadd.f32 %v5000_v26, %v6007_v50 }
 0x2f7   :  { %v1374_v9 = vadd.f32 %v1373_v17, %v1205_v36  ;;  %v1710_v53 = vadd.f32 %v1709_v46, %v1541_v8 }
 0x2f9   :  { %v1782_v49 = vmax.f32 %v1710_v53, 0.0 }
 0x2fa   :  { %v5347_v62 = vpop.f32.mrf.mxu0 }
 0x2fc   :  { %v1542_v27 = vpop.f32.mrf.mxu2  ;;  %2281 = vmatmul.bf16.gmra.mxu2 %v6004_v13 }
 0x2fd   :  { %v1543_v43 = vadd.f32 %v1542_v27, %v1374_v9  ;;  %v1711_v19 = vpop.f32.mrf.mxu3 }
 0x2fe   :  { %v1376_v48 = vpop.f32.mrf.mxu1 }
 0x2ff   :  { %v1712_v5 = vadd.f32 %v1711_v19, %v1543_v43  ;;  %v1377_v29 = vadd.f32 %v1376_v48, %v1208_v14  ;;  %v6009_v19 = vld [vmem:[#allocation50_spill] sm:$0xff] }
 0x300   :  { %v6011_v14 = vld [vmem:[#allocation66_spill] sm:$0xff] }
 0x301   :  { %v1783_v30 = vmax.f32 %v1712_v5, 0.0  ;;  %2127 = vmatmul.bf16.gmra.mxu1 %v6005_v2 }
 0x302   :  { %v1998_v57 = vpop.f32.mrf.mxu0 }
 0x303   :  { %v1817_v59 = vpack.c.bf16 %v1783_v30, %v1782_v49  ;;  %v6010_v30 = vld [vmem:[#allocation65_spill] sm:$0xff] }
 0x304   :  { %v1545_v28 = vpop.f32.mrf.mxu2  ;;  %v1213_v2 = vadd.f32 %v5000_v26, %v6010_v30 }
 0x305   :  { %v1714_v38 = vpop.f32.mrf.mxu3  ;;  %2037 = vmatmul.bf16.gmra.mxu0 %v1817_v59  ;;  %v1546_v16 = vadd.f32 %v1545_v28, %v1377_v29 }
 0x306   :  { %v1378_v21 = vpop.f32.mrf.mxu1 }
 0x307   :  { %v1379_v17 = vadd.f32 %v1378_v21, %v1210_v35  ;;  %v1715_v36 = vadd.f32 %v1714_v38, %v1546_v16  ;;  %v1215_v38 = vadd.f32 %v5000_v26, %v6011_v14  ;;  %v6012_v16 = vld [vmem:[#allocation52_spill] sm:$0xff]  ;;  %v6014_v26 = vld [vmem:[#allocation57_spill] sm:$0xff] }
 0x309   :  { %v1784_v53 = vmax.f32 %v1715_v36, 0.0 }
 0x30a   :  { %v2000_v46 = vpop.f32.mrf.mxu0 }
 0x30c   :  { %v1547_v54 = vpop.f32.mrf.mxu2  ;;  %2286 = vmatmul.bf16.gmra.mxu2 %v6008_v3 }
 0x30d   :  { %v1548_v8 = vadd.f32 %v1547_v54, %v1379_v17  ;;  %v1716_v9 = vpop.f32.mrf.mxu3 }
 0x30e   :  { %v1381_v27 = vpop.f32.mrf.mxu1 }
 0x30f   :  { %v1717_v13 = vadd.f32 %v1716_v9, %v1548_v8  ;;  %v1382_v28 = vadd.f32 %v1381_v27, %v1213_v2  ;;  %v2074_v2 = vpack.c.bf16 %v2000_v46, %v1998_v57 }
 0x311   :  { %v1785_v43 = vmax.f32 %v1717_v13, 0.0  ;;  %2132 = vmatmul.bf16.gmra.mxu1 %v6009_v19  ;;  %v6013_v13 = vld [vmem:[#allocation2_spill] sm:$0xff] }
 0x312   :  { %v2003_v5 = vpop.f32.mrf.mxu0 }
 0x313   :  { %v1818_v48 = vpack.c.bf16 %v1785_v43, %v1784_v53 }
 0x314   :  { %v1550_v49 = vpop.f32.mrf.mxu2 }
 0x315   :  { %v1719_v59 = vpop.f32.mrf.mxu3  ;;  %2042 = vmatmul.bf16.gmra.mxu0 %v1818_v48  ;;  %v1551_v21 = vadd.f32 %v1550_v49, %v1382_v28  ;;  %v6015_v49 = vld [vmem:[#allocation5_spill] sm:$0xff] }
 0x316   :  { %v1383_v22 = vpop.f32.mrf.mxu1 }
 0x317   :  { %v1384_v50 = vadd.f32 %v1383_v22, %v1215_v38  ;;  %v1720_v17 = vadd.f32 %v1719_v59, %v1551_v21  ;;  %v2073_v59 = vpack.c.bf16 %v5347_v62, %v5341_v37  ;;  %v6016_v22 = vld [vmem:[#allocation62_spill] sm:$0xff]  ;;  %v6018_v62 = vld [vmem:[#allocation27_spill] sm:$0xff] }
 0x318   :  { %v6026_v21 = vld [vmem:[#allocation47_spill] sm:$0xff] }
 0x319   :  { %v1786_v8 = vmax.f32 %v1720_v17, 0.0 }
 0x31a   :  { %v2005_v29 = vpop.f32.mrf.mxu0 }
 0x31b   :  { %v2075_v48 = vpack.c.bf16 %v2005_v29, %v2003_v5  ;;  %v6017_v5 = vld [vmem:[#allocation8_spill] sm:$0xff] }
 0x31c   :  { %v1552_v35 = vpop.f32.mrf.mxu2  ;;  %2291 = vmatmul.bf16.gmra.mxu2 %v6012_v16 }
 0x31d   :  { %v1553_v54 = vadd.f32 %v1552_v35, %v1384_v50  ;;  %v1721_v3 = vpop.f32.mrf.mxu3  ;;  %v6027_v35 = vld [vmem:[#allocation53_spill] sm:$0xff] }
 0x31f   :  { %v1722_v36 = vadd.f32 %v1721_v3, %v1553_v54  ;;  %v6028_v3 = vld [vmem:[#allocation58_spill] sm:$0xff] }
 0x321   :  { %v1787_v9 = vmax.f32 %v1722_v36, 0.0  ;;  %2137 = vmatmul.bf16.gmra.mxu1 %v6013_v13  ;;  %v6029_v13 = vld [vmem:[#allocation63_spill] sm:$0xff] }
 0x322   :  { %v2008_v53 = vpop.f32.mrf.mxu0 }
 0x323   :  { %v1819_v27 = vpack.c.bf16 %v1787_v9, %v1786_v8 }
 0x325   :  { %2047 = vmatmul.bf16.gmra.mxu0 %v1819_v27 }
 0x32a   :  { %v2010_v43 = vpop.f32.mrf.mxu0 }
 0x32b   :  { %v2076_v19 = vpack.c.bf16 %v2010_v43, %v2008_v53 }
 0x32c   :  { %2296 = vmatmul.bf16.gmra.mxu2 %v6014_v26  ;;  %v6031_v26 = vld [vmem:[#allocation68_spill] sm:$0xff] }
 0x32d   :  { %2427 = vmatpush.bf16.msra.mxu3 %v2076_v19  ;;  %v6030_v19 = vld [vmem:[#allocation28_spill] sm:$0xff] }
 0x331   :  { %2428 = vmatpush.bf16.msra.mxu3 %v2075_v48  ;;  %2142 = vmatmul.bf16.gmra.mxu1 %v6015_v49  ;;  %v6032_v48 = vld [vmem:[#allocation32_spill] sm:$0xff]  ;;  %v6033_v49 = vld [vmem:[#allocation71_spill] sm:$0xff] }
 0x332   :  { %v2013_v30 = vpop.f32.mrf.mxu0 }
 0x335   :  { %2429 = vmatpush.bf16.msra.mxu3 %v2074_v2  ;;  %v6034_v2 = vld [vmem:[#allocation36_spill] sm:$0xff] }
 0x339   :  { %2430 = vmatpush.bf16.msra.mxu3 %v2073_v59  ;;  %v6035_v59 = vld [vmem:[#allocation74_spill] sm:$0xff] }
 0x33a   :  { %v2015_v28 = vpop.f32.mrf.mxu0 }
 0x33b   :  { %v2077_v43 = vpack.c.bf16 %v2015_v28, %v2013_v30  ;;  %v6039_v30 = vld [vmem:[#allocation54_spill] sm:$0xff]  ;;  %v2098_v28 = vpop.f32.mrf.mxu1 }
 0x33c   :  { %2301 = vmatmul.bf16.gmra.mxu2 %v6016_v22  ;;  %v6036_v22 = vld [vmem:[#allocation42_spill] sm:$0xff] }
 0x33d   :  { %2431 = vmatpush.bf16.msra.mxu3 %v2072_v55  ;;  %v6022_v55 = vld [vmem:[#allocation70_spill] sm:$0xff] }
 0x341   :  { %2432 = vmatpush.bf16.msra.mxu3 %v2071_v33  ;;  %2147 = vmatmul.bf16.gmra.mxu1 %v6017_v5  ;;  %v6021_v33 = vld [vmem:[#allocation31_spill] sm:$0xff]  ;;  %v6037_v5 = vld [vmem:[#allocation76_spill] sm:$0xff] }
 0x342   :  { %v2018_v14 = vpop.f32.mrf.mxu0 }
 0x345   :  { %2433 = vmatpush.bf16.msra.mxu3 %v2070_v34  ;;  %v6024_v34 = vld [vmem:[#allocation73_spill] sm:$0xff] }
 0x349   :  { %2434 = vmatpush.bf16.msra.mxu3 %v2069_v25  ;;  %v6025_v25 = vld [vmem:[#allocation41_spill] sm:$0xff] }
 0x34a   :  { %v2020_v37 = vpop.f32.mrf.mxu0 }
 0x34b   :  { %v2078_v27 = vpack.c.bf16 %v2020_v37, %v2018_v14  ;;  %v6038_v14 = vld [vmem:[#allocation48_spill] sm:$0xff] }
 0x34c   :  { %2435 = vmatmul.bf16.vlgmr.msra.gmra.mxu3 %v6018_v62  ;;  %2306 = vmatmul.bf16.gmra.mxu2 %v6019_v63  ;;  %v2100_v63 = vpop.f32.mrf.mxu1 }
 0x34f   :  { %v2267_v37 = vpop.f32.mrf.mxu2 }
 0x351   :  { %2152 = vmatmul.bf16.gmra.mxu1 %v6020_v0  ;;  %v6040_v0 = vld [vmem:[#allocation14_spill] sm:$0xff] }
 0x352   :  { %v2023_v61 = vpop.f32.mrf.mxu0 }
 0x35a   :  { %v2025_v4 = vpop.f32.mrf.mxu0 }
 0x35b   :  { %v2079_v53 = vpack.c.bf16 %v2025_v4, %v2023_v61  ;;  %v2269_v61 = vpop.f32.mrf.mxu2  ;;  %v6041_v4 = vld [vmem:[#allocation78_spill] sm:$0xff] }
 0x35c   :  { %2440 = vmatmul.bf16.gmra.mxu3 %v6021_v33  ;;  %2311 = vmatmul.bf16.gmra.mxu2 %v6022_v55  ;;  %v6042_v55 = vld [vmem:[#allocation79_spill] sm:$0xff] }
 0x361   :  { %2157 = vmatmul.bf16.gmra.mxu1 %v6040_v0 }
 0x362   :  { %v2028_v57 = vpop.f32.mrf.mxu0 }
 0x36a   :  { %v2030_v1 = vpop.f32.mrf.mxu0 }
 0x36c   :  { %2445 = vmatmul.bf16.gmra.mxu3 %v6023_v47  ;;  %2316 = vmatmul.bf16.gmra.mxu2 %v6024_v34  ;;  %v2272_v47 = vpop.f32.mrf.mxu2 }
 0x372   :  { %v2033_v60 = vpop.f32.mrf.mxu0 }
 0x37a   :  { %v2035_v40 = vpop.f32.mrf.mxu0 }
 0x37b   :  { %v2081_v9 = vpack.c.bf16 %v2035_v40, %v2033_v60  ;;  %v6044_v40 = vld [vmem:[#allocation17_spill] sm:$0xff] }
 0x37c   :  { %2450 = vmatmul.bf16.gmra.mxu3 %v6025_v25  ;;  %2321 = vmatmul.bf16.gmra.mxu2 %v4561_v12  ;;  %v2080_v12 = vpack.c.bf16 %v2030_v1, %v2028_v57  ;;  %v6043_v57 = vld [vmem:[#allocation59_spill] sm:$0xff]  ;;  %v2103_v1 = vpop.f32.mrf.mxu1  ;;  %v2274_v25 = vpop.f32.mrf.mxu2 }
 0x382   :  { %v2038_v46 = vpop.f32.mrf.mxu0 }
 0x384   :  { %v2105_v60 = vpop.f32.mrf.mxu1  ;;  %2162 = vmatmul.bf16.gmra.mxu1 %v6044_v40 }
 0x38a   :  { %v2040_v38 = vpop.f32.mrf.mxu0 }
 0x38b   :  { %v2082_v8 = vpack.c.bf16 %v2040_v38, %v2038_v46  ;;  %v6045_v46 = vld [vmem:[#allocation81_spill] sm:$0xff] }
 0x38c   :  { %2455 = vmatmul.bf16.gmra.mxu3 %v6026_v21  ;;  %2326 = vmatmul.bf16.gmra.mxu2 %v6041_v4  ;;  %v6046_v21 = vld [vmem:[#allocation82_spill] sm:$0xff] }
 0x38d   :  { %v6052_v4 = vld [vmem:[#allocation86_spill] sm:$0xff] }
 0x392   :  { %v2043_v29 = vpop.f32.mrf.mxu0 }
 0x39a   :  { %v2045_v50 = vpop.f32.mrf.mxu0 }
 0x39b   :  { %v2083_v36 = vpack.c.bf16 %v2045_v50, %v2043_v29  ;;  %v5414_v29 = vld [vmem:[%s5760_s4] ss:$0 sm:$0xff]  ;;  %v6047_v50 = vld [vmem:[#allocation64_spill] sm:$0xff] }
 0x39c   :  { %2460 = vmatmul.bf16.gmra.mxu3 %v6027_v35  ;;  %2331 = vmatmul.bf16.gmra.mxu2 %v6045_v46  ;;  %v2108_v35 = vpop.f32.mrf.mxu1  ;;  %v2106_v0 = vadd.f32 %v5414_v29, %v2105_v60 }
 0x3a2   :  { %v2048_v16 = vpop.f32.mrf.mxu0 }
 0x3aa   :  { %v2050_v17 = vpop.f32.mrf.mxu0 }
 0x3ab   :  { %v2084_v54 = vpack.c.bf16 %v2050_v17, %v2048_v16  ;;  %v2099_v16 = vadd.f32 %v5414_v29, %v2098_v28  ;;  %v2277_v17 = vpop.f32.mrf.mxu2 }
 0x3ac   :  { %2465 = vmatmul.bf16.gmra.mxu3 %v6028_v3 }
 0x3ad   :  { %2596 = vmatpush.bf16.msra.mxu0 %v2084_v54  ;;  %v2268_v3 = vadd.f32 %v2267_v37, %v2099_v16  ;;  %v6051_v37 = vld [vmem:[#allocation23_spill] sm:$0xff] }
 0x3b1   :  { %2597 = vmatpush.bf16.msra.mxu0 %v2083_v36  ;;  %v2110_v36 = vpop.f32.mrf.mxu1 }
 0x3b5   :  { %2598 = vmatpush.bf16.msra.mxu0 %v2082_v8  ;;  %v6048_v8 = vld [vmem:[#allocation20_spill] sm:$0xff] }
 0x3b6   :  { %2167 = vmatmul.bf16.gmra.mxu1 %v6048_v8 }
 0x3b9   :  { %2599 = vmatpush.bf16.msra.mxu0 %v2081_v9 }
 0x3bc   :  { %2470 = vmatmul.bf16.gmra.mxu3 %v6029_v13  ;;  %v2101_v13 = vadd.f32 %v5414_v29, %v2100_v63 }
 0x3bd   :  { %2600 = vmatpush.bf16.msra.mxu0 %v2080_v12  ;;  %v2279_v12 = vpop.f32.mrf.mxu2  ;;  %2336 = vmatmul.bf16.gmra.mxu2 %v4648_v56 }
 0x3c1   :  { %2601 = vmatpush.bf16.msra.mxu0 %v2079_v53 }
 0x3c5   :  { %2602 = vmatpush.bf16.msra.mxu0 %v2078_v27  ;;  %v6049_v27 = vld [vmem:[#allocation84_spill] sm:$0xff] }
 0x3c9   :  { %2603 = vmatpush.bf16.msra.mxu0 %v2077_v43 }
 0x3cc   :  { %2604 = vmatmul.bf16.vlgmr.msra.gmra.mxu0 %v6030_v19  ;;  %2475 = vmatmul.bf16.gmra.mxu3 %v6031_v26  ;;  %v6050_v26 = vld [vmem:[#allocation69_spill] sm:$0xff] }
 0x3cf   :  { %v2436_v62 = vpop.f32.mrf.mxu3 }
 0x3d0   :  { %v2437_v9 = vadd.f32 %v2436_v62, %v2268_v3  ;;  %v6054_v3 = vld [vmem:[#allocation3_spill] sm:$0xff] }
 0x3d7   :  { %v2438_v33 = vpop.f32.mrf.mxu3 }
 0x3dc   :  { %2609 = vmatmul.bf16.gmra.mxu0 %v6032_v48  ;;  %2480 = vmatmul.bf16.gmra.mxu3 %v6033_v49  ;;  %v2270_v48 = vadd.f32 %v2269_v61, %v2101_v13  ;;  %v2113_v49 = vpop.f32.mrf.mxu1 }
 0x3df   :  { %v2441_v34 = vpop.f32.mrf.mxu3 }
 0x3e4   :  { %v2115_v28 = vpop.f32.mrf.mxu1  ;;  %2172 = vmatmul.bf16.gmra.mxu1 %v6051_v37  ;;  %v6058_v37 = vld [vmem:[#allocation90_spill] sm:$0xff] }
 0x3e7   :  { %v2443_v38 = vpop.f32.mrf.mxu3 }
 0x3ec   :  { %2614 = vmatmul.bf16.gmra.mxu0 %v6034_v2  ;;  %2485 = vmatmul.bf16.gmra.mxu3 %v6035_v59  ;;  %v2104_v2 = vadd.f32 %v5414_v29, %v2103_v1  ;;  %v2282_v59 = vpop.f32.mrf.mxu2  ;;  %v2275_v1 = vadd.f32 %v2274_v25, %v2106_v0  ;;  %v2111_v25 = vadd.f32 %v5414_v29, %v2110_v36 }
 0x3ee   :  { %v2444_v46 = vadd.f32 %v2443_v38, %v2275_v1 }
 0x3ef   :  { %v2446_v54 = vpop.f32.mrf.mxu3 }
 0x3f4   :  { %v2284_v63 = vpop.f32.mrf.mxu2  ;;  %2341 = vmatmul.bf16.gmra.mxu2 %v4677_v31 }
 0x3f7   :  { %v2448_v53 = vpop.f32.mrf.mxu3 }
 0x3fc   :  { %2619 = vmatmul.bf16.gmra.mxu0 %v6036_v22  ;;  %2490 = vmatmul.bf16.gmra.mxu3 %v6037_v5  ;;  %v2439_v22 = vadd.f32 %v2438_v33, %v2270_v48  ;;  %v2287_v40 = vpop.f32.mrf.mxu2 }
 0x3ff   :  { %v2451_v56 = vpop.f32.mrf.mxu3 }
 0x407   :  { %v2453_v61 = vpop.f32.mrf.mxu3 }
 0x40c   :  { %2624 = vmatmul.bf16.gmra.mxu0 %v6038_v14  ;;  %2495 = vmatmul.bf16.gmra.mxu3 %v6042_v55 }
 0x40f   :  { %v2456_v31 = vpop.f32.mrf.mxu3 }
 0x41c   :  { %2629 = vmatmul.bf16.gmra.mxu0 %v6039_v30  ;;  %2500 = vmatmul.bf16.gmra.mxu3 %v6046_v21  ;;  %v2273_v30 = vadd.f32 %v2272_v47, %v2104_v2  ;;  %v2118_v47 = vpop.f32.mrf.mxu1 }
 0x41e   :  { %v2442_v62 = vadd.f32 %v2441_v34, %v2273_v30  ;;  %v2109_v34 = vadd.f32 %v5414_v29, %v2108_v35  ;;  %v2458_v35 = vpop.f32.mrf.mxu3  ;;  %v6057_v30 = vld [vmem:[#allocation89_spill] sm:$0xff] }
 0x424   :  { %v2120_v16 = vpop.f32.mrf.mxu1  ;;  %2177 = vmatmul.bf16.gmra.mxu1 %v6054_v3  ;;  %v6061_v3 = vld [vmem:[#allocation92_spill] sm:$0xff] }
 0x42c   :  { %2634 = vmatmul.bf16.gmra.mxu0 %v6043_v57  ;;  %2505 = vmatmul.bf16.gmra.mxu3 %v6049_v27  ;;  %v6053_v57 = vld [vmem:[#allocation72_spill] sm:$0xff]  ;;  %v2280_v27 = vadd.f32 %v2279_v12, %v2111_v25  ;;  %v2116_v12 = vadd.f32 %v5414_v29, %v2115_v28 }
 0x42e   :  { %v2285_v0 = vadd.f32 %v2284_v63, %v2116_v12  ;;  %v2121_v63 = vadd.f32 %v5414_v29, %v2120_v16  ;;  %v6066_v12 = vld [vmem:[#allocation96_spill] sm:$0xff] }
 0x43c   :  { %2639 = vmatmul.bf16.gmra.mxu0 %v6047_v50  ;;  %2510 = vmatmul.bf16.gmra.mxu3 %v6052_v4  ;;  %v2278_v50 = vadd.f32 %v2277_v17, %v2109_v34  ;;  %v6055_v17 = vld [vmem:[#allocation75_spill] sm:$0xff] }
 0x43e   :  { %v2447_v8 = vadd.f32 %v2446_v54, %v2278_v50  ;;  %v2114_v54 = vadd.f32 %v5414_v29, %v2113_v49 }
 0x440   :  { %v2283_v2 = vadd.f32 %v2282_v59, %v2114_v54  ;;  %v6059_v59 = vld [vmem:[#allocation77_spill] sm:$0xff] }
 0x449   :  { %v2605_v43 = vpop.f32.mrf.mxu0 }
 0x44a   :  { %v2606_v19 = vadd.f32 %v2605_v43, %v2437_v9  ;;  %v2289_v9 = vpop.f32.mrf.mxu2  ;;  %2346 = vmatmul.bf16.gmra.mxu2 %v4706_v23  ;;  %v2123_v43 = vpop.f32.mrf.mxu1 }
 0x44b   :  { %v2461_v23 = vpop.f32.mrf.mxu3 }
 0x44c   :  { %2765 = vst [vmem:[%s5761_s5] sm:$0xff] %v2606_v19  ;;  %2644 = vmatmul.bf16.gmra.mxu0 %v6050_v26  ;;  %2515 = vmatmul.bf16.gmra.mxu3 %v4708_v24  ;;  %v2449_v26 = vadd.f32 %v2448_v53, %v2280_v27 }
 0x451   :  { %v2607_v5 = vpop.f32.mrf.mxu0 }
 0x452   :  { %v2608_v14 = vadd.f32 %v2607_v5, %v2439_v22  ;;  %v2292_v19 = vpop.f32.mrf.mxu2  ;;  %v2125_v24 = vpop.f32.mrf.mxu1  ;;  %v6056_v22 = vld [vmem:[#allocation6_spill] sm:$0xff]  ;;  %v2452_v5 = vadd.f32 %v2451_v56, %v2283_v2  ;;  %v2119_v56 = vadd.f32 %v5414_v29, %v2118_v47  ;;  %v6064_v2 = vld [vmem:[#allocation12_spill] sm:$0xff] }
 0x453   :  { %2182 = vmatmul.bf16.gmra.mxu1 %v6056_v22  ;;  %v2463_v49 = vpop.f32.mrf.mxu3 }
 0x454   :  { %2766 = vst [vmem:[%s5761_s5 + $0x8] sm:$0xff] %v2608_v14  ;;  %v2288_v34 = vadd.f32 %v2287_v40, %v2119_v56  ;;  %v6063_v40 = vld [vmem:[#allocation80_spill] sm:$0xff] }
 0x459   :  { %v2610_v33 = vpop.f32.mrf.mxu0 }
 0x45a   :  { %v2611_v55 = vadd.f32 %v2610_v33, %v2442_v62  ;;  %v2294_v14 = vpop.f32.mrf.mxu2  ;;  %2351 = vmatmul.bf16.gmra.mxu2 %v6057_v30  ;;  %v2128_v4 = vpop.f32.mrf.mxu1  ;;  %v6065_v30 = vld [vmem:[#allocation95_spill] sm:$0xff] }
 0x45c   :  { %2767 = vst [vmem:[%s5761_s5 + $0x10] sm:$0xff] %v2611_v55  ;;  %2649 = vmatmul.bf16.gmra.mxu0 %v6053_v57  ;;  %2520 = vmatmul.bf16.gmra.mxu3 %v6058_v37  ;;  %v2454_v55 = vadd.f32 %v2453_v61, %v2285_v0  ;;  %v2466_v57 = vpop.f32.mrf.mxu3 }
 0x461   :  { %v2612_v21 = vpop.f32.mrf.mxu0 }
 0x462   :  { %v2613_v60 = vadd.f32 %v2612_v21, %v2444_v46  ;;  %v2297_v33 = vpop.f32.mrf.mxu2  ;;  %v2130_v46 = vpop.f32.mrf.mxu1  ;;  %v6060_v21 = vld [vmem:[#allocation9_spill] sm:$0xff] }
 0x463   :  { %2187 = vmatmul.bf16.gmra.mxu1 %v6060_v21 }
 0x464   :  { %2768 = vst [vmem:[%s5761_s5 + $0x18] sm:$0xff] %v2613_v60  ;;  %v2457_v60 = vadd.f32 %v2456_v31, %v2288_v34  ;;  %v2468_v47 = vpop.f32.mrf.mxu3  ;;  %v2124_v31 = vadd.f32 %v5414_v29, %v2123_v43  ;;  %v6068_v34 = vld [vmem:[#allocation15_spill] sm:$0xff] }
 0x469   :  { %v2615_v38 = vpop.f32.mrf.mxu0 }
 0x46a   :  { %v2616_v13 = vadd.f32 %v2615_v38, %v2447_v8  ;;  %v2299_v50 = vpop.f32.mrf.mxu2  ;;  %2356 = vmatmul.bf16.gmra.mxu2 %v6061_v3  ;;  %v6062_v8 = vld [vmem:[#allocation93_spill] sm:$0xff]  ;;  %v2290_v38 = vadd.f32 %v2289_v9, %v2121_v63  ;;  %v2126_v9 = vadd.f32 %v5414_v29, %v2125_v24  ;;  %v6069_v3 = vld [vmem:[#allocation98_spill] sm:$0xff]  ;;  %v6070_v63 = vld [vmem:[#allocation99_spill] sm:$0xff] }
 0x46c   :  { %2769 = vst [vmem:[%s5761_s5 + $0x20] sm:$0xff] %v2616_v13  ;;  %2654 = vmatmul.bf16.gmra.mxu0 %v6055_v17  ;;  %2525 = vmatmul.bf16.gmra.mxu3 %v6062_v8  ;;  %v2133_v13 = vpop.f32.mrf.mxu1  ;;  %v2459_v27 = vadd.f32 %v2458_v35, %v2290_v38  ;;  %v2471_v54 = vpop.f32.mrf.mxu3 }
 0x471   :  { %v2617_v48 = vpop.f32.mrf.mxu0 }
 0x472   :  { %v2618_v36 = vadd.f32 %v2617_v48, %v2449_v26  ;;  %v2302_v17 = vpop.f32.mrf.mxu2  ;;  %v2293_v48 = vadd.f32 %v2292_v19, %v2124_v31  ;;  %v6067_v19 = vld [vmem:[#allocation83_spill] sm:$0xff] }
 0x474   :  { %2770 = vst [vmem:[%s5761_s5 + $0x28] sm:$0xff] %v2618_v36  ;;  %v2135_v36 = vpop.f32.mrf.mxu1  ;;  %2192 = vmatmul.bf16.gmra.mxu1 %v6064_v2  ;;  %v2462_v22 = vadd.f32 %v2461_v23, %v2293_v48  ;;  %v2473_v43 = vpop.f32.mrf.mxu3  ;;  %v2129_v23 = vadd.f32 %v5414_v29, %v2128_v4  ;;  %v6072_v48 = vld [vmem:[#allocation18_spill] sm:$0xff] }
 0x479   :  { %v2620_v53 = vpop.f32.mrf.mxu0 }
 0x47a   :  { %v2621_v62 = vadd.f32 %v2620_v53, %v2452_v5  ;;  %v2304_v5 = vpop.f32.mrf.mxu2  ;;  %2361 = vmatmul.bf16.gmra.mxu2 %v6065_v30  ;;  %v2295_v53 = vadd.f32 %v2294_v14, %v2126_v9  ;;  %v2131_v14 = vadd.f32 %v5414_v29, %v2130_v46  ;;  %v6073_v30 = vld [vmem:[#allocation101_spill] sm:$0xff]  ;;  %v6074_v9 = vld [vmem:[#allocation102_spill] sm:$0xff] }
 0x47c   :  { %2771 = vst [vmem:[%s5761_s5 + $0x30] sm:$0xff] %v2621_v62  ;;  %2659 = vmatmul.bf16.gmra.mxu0 %v6059_v59  ;;  %2530 = vmatmul.bf16.gmra.mxu3 %v6066_v12  ;;  %v2138_v62 = vpop.f32.mrf.mxu1  ;;  %v2464_v0 = vadd.f32 %v2463_v49, %v2295_v53  ;;  %v2476_v56 = vpop.f32.mrf.mxu3 }
 0x481   :  { %v2622_v1 = vpop.f32.mrf.mxu0 }
 0x482   :  { %v2623_v28 = vadd.f32 %v2622_v1, %v2454_v55  ;;  %v2307_v59 = vpop.f32.mrf.mxu2  ;;  %v2298_v1 = vadd.f32 %v2297_v33, %v2129_v23  ;;  %v6071_v33 = vld [vmem:[#allocation85_spill] sm:$0xff] }
 0x484   :  { %2772 = vst [vmem:[%s5761_s5 + $0x38] sm:$0xff] %v2623_v28  ;;  %v2140_v28 = vpop.f32.mrf.mxu1  ;;  %2197 = vmatmul.bf16.gmra.mxu1 %v6068_v34  ;;  %v2467_v21 = vadd.f32 %v2466_v57, %v2298_v1  ;;  %v2478_v4 = vpop.f32.mrf.mxu3  ;;  %v2134_v57 = vadd.f32 %v5414_v29, %v2133_v13  ;;  %v6076_v1 = vld [vmem:[#allocation21_spill] sm:$0xff] }
 0x489   :  { %v2625_v61 = vpop.f32.mrf.mxu0 }
 0x48a   :  { %v2626_v25 = vadd.f32 %v2625_v61, %v2457_v60  ;;  %v2309_v60 = vpop.f32.mrf.mxu2  ;;  %2366 = vmatmul.bf16.gmra.mxu2 %v6069_v3  ;;  %v2300_v61 = vadd.f32 %v2299_v50, %v2131_v14  ;;  %v2136_v50 = vadd.f32 %v5414_v29, %v2135_v36  ;;  %v6077_v3 = vld [vmem:[#allocation104_spill] sm:$0xff]  ;;  %v6078_v14 = vld [vmem:[#allocation105_spill] sm:$0xff] }
 0x48c   :  { %2773 = vst [vmem:[%s5761_s5 + $0x40] sm:$0xff] %v2626_v25  ;;  %2664 = vmatmul.bf16.gmra.mxu0 %v6063_v40  ;;  %2535 = vmatmul.bf16.gmra.mxu3 %v6070_v63  ;;  %v2143_v25 = vpop.f32.mrf.mxu1  ;;  %v2469_v38 = vadd.f32 %v2468_v47, %v2300_v61  ;;  %v2481_v31 = vpop.f32.mrf.mxu3 }
 0x491   :  { %v2627_v26 = vpop.f32.mrf.mxu0 }
 0x492   :  { %v2628_v16 = vadd.f32 %v2627_v26, %v2459_v27  ;;  %v2312_v40 = vpop.f32.mrf.mxu2  ;;  %v2303_v26 = vadd.f32 %v2302_v17, %v2134_v57  ;;  %v6075_v17 = vld [vmem:[#allocation87_spill] sm:$0xff] }
 0x494   :  { %2774 = vst [vmem:[%s5761_s5 + $0x48] sm:$0xff] %v2628_v16  ;;  %v2145_v16 = vpop.f32.mrf.mxu1  ;;  %2202 = vmatmul.bf16.gmra.mxu1 %v6072_v48  ;;  %v2472_v2 = vadd.f32 %v2471_v54, %v2303_v26  ;;  %v2483_v13 = vpop.f32.mrf.mxu3  ;;  %v2139_v54 = vadd.f32 %v5414_v29, %v2138_v62  ;;  %v6080_v26 = vld [vmem:[#allocation24_spill] sm:$0xff] }
 0x499   :  { %v2630_v35 = vpop.f32.mrf.mxu0 }
 0x49a   :  { %v2631_v37 = vadd.f32 %v2630_v35, %v2462_v22  ;;  %v2314_v22 = vpop.f32.mrf.mxu2  ;;  %2371 = vmatmul.bf16.gmra.mxu2 %v6073_v30  ;;  %v2305_v35 = vadd.f32 %v2304_v5, %v2136_v50  ;;  %v2141_v5 = vadd.f32 %v5414_v29, %v2140_v28  ;;  %v6081_v30 = vld [vmem:[#allocation107_spill] sm:$0xff] }
 0x49c   :  { %2775 = vst [vmem:[%s5761_s5 + $0x50] sm:$0xff] %v2631_v37  ;;  %2669 = vmatmul.bf16.gmra.mxu0 %v6067_v19  ;;  %2540 = vmatmul.bf16.gmra.mxu3 %v6074_v9  ;;  %v2148_v37 = vpop.f32.mrf.mxu1  ;;  %v2474_v53 = vadd.f32 %v2473_v43, %v2305_v35  ;;  %v2486_v23 = vpop.f32.mrf.mxu3 }
 0x4a1   :  { %v2632_v55 = vpop.f32.mrf.mxu0 }
 0x4a2   :  { %v2633_v24 = vadd.f32 %v2632_v55, %v2464_v0  ;;  %v2317_v19 = vpop.f32.mrf.mxu2  ;;  %v2308_v55 = vadd.f32 %v2307_v59, %v2139_v54  ;;  %v6079_v59 = vld [vmem:[#allocation88_spill] sm:$0xff] }
 0x4a4   :  { %2776 = vst [vmem:[%s5761_s5 + $0x58] sm:$0xff] %v2633_v24  ;;  %v2150_v24 = vpop.f32.mrf.mxu1  ;;  %2207 = vmatmul.bf16.gmra.mxu1 %v6076_v1  ;;  %v2477_v34 = vadd.f32 %v2476_v56, %v2308_v55  ;;  %v2488_v62 = vpop.f32.mrf.mxu3  ;;  %v2144_v56 = vadd.f32 %v5414_v29, %v2143_v25  ;;  %v6084_v1 = vld [vmem:[#allocation109_spill] sm:$0xff] }
 0x4a9   :  { %v2635_v49 = vpop.f32.mrf.mxu0 }
 0x4aa   :  { %v2636_v8 = vadd.f32 %v2635_v49, %v2467_v21  ;;  %v2319_v21 = vpop.f32.mrf.mxu2  ;;  %2376 = vmatmul.bf16.gmra.mxu2 %v6077_v3  ;;  %v2310_v49 = vadd.f32 %v2309_v60, %v2141_v5  ;;  %v2146_v60 = vadd.f32 %v5414_v29, %v2145_v16 }
 0x4ac   :  { %2777 = vst [vmem:[%s5761_s5 + $0x60] sm:$0xff] %v2636_v8  ;;  %2674 = vmatmul.bf16.gmra.mxu0 %v6071_v33  ;;  %2545 = vmatmul.bf16.gmra.mxu3 %v6078_v14  ;;  %v2153_v8 = vpop.f32.mrf.mxu1  ;;  %v2479_v61 = vadd.f32 %v2478_v4, %v2310_v49  ;;  %v2491_v57 = vpop.f32.mrf.mxu3  ;;  %v2315_v9 = vadd.f32 %v2314_v22, %v2146_v60 }
 0x4ad   :  { %v2151_v22 = vadd.f32 %v5414_v29, %v2150_v24 }
 0x4af   :  { %v2320_v5 = vadd.f32 %v2319_v21, %v2151_v22 }
 0x4b1   :  { %v2637_v27 = vpop.f32.mrf.mxu0 }
 0x4b2   :  { %v2638_v46 = vadd.f32 %v2637_v27, %v2469_v38  ;;  %v2322_v33 = vpop.f32.mrf.mxu2  ;;  %v2313_v27 = vadd.f32 %v2312_v40, %v2144_v56  ;;  %v6082_v40 = vld [vmem:[#allocation91_spill] sm:$0xff] }
 0x4b4   :  { %2778 = vst [vmem:[%s5761_s5 + $0x68] sm:$0xff] %v2638_v46  ;;  %v2155_v46 = vpop.f32.mrf.mxu1  ;;  %2212 = vmatmul.bf16.gmra.mxu1 %v6080_v26  ;;  %v2482_v48 = vadd.f32 %v2481_v31, %v2313_v27  ;;  %v2493_v25 = vpop.f32.mrf.mxu3  ;;  %v2149_v31 = vadd.f32 %v5414_v29, %v2148_v37 }
 0x4b5   :  { %v2156_v21 = vadd.f32 %v5414_v29, %v2155_v46 }
 0x4b6   :  { %v2318_v54 = vadd.f32 %v2317_v19, %v2149_v31  ;;  %v6086_v19 = vld [vmem:[#allocation94_spill] sm:$0xff] }
 0x4b9   :  { %v2640_v47 = vpop.f32.mrf.mxu0 }
 0x4ba   :  { %v2641_v12 = vadd.f32 %v2640_v47, %v2472_v2  ;;  %v2324_v2 = vpop.f32.mrf.mxu2  ;;  %2381 = vmatmul.bf16.gmra.mxu2 %v4955_v18 }
 0x4bc   :  { %2779 = vst [vmem:[%s5761_s5 + $0x70] sm:$0xff] %v2641_v12  ;;  %2679 = vmatmul.bf16.gmra.mxu0 %v6075_v17  ;;  %2550 = vmatmul.bf16.gmra.mxu3 %v6081_v30  ;;  %v2158_v47 = vpop.f32.mrf.mxu1  ;;  %v2484_v17 = vadd.f32 %v2483_v13, %v2315_v9  ;;  %v2496_v18 = vpop.f32.mrf.mxu3  ;;  %v6089_v9 = vld [vmem:[#allocation10_spill] sm:$0xff] }
 0x4c1   :  { %v2642_v0 = vpop.f32.mrf.mxu0 }
 0x4c2   :  { %v2643_v36 = vadd.f32 %v2642_v0, %v2474_v53  ;;  %v2327_v12 = vpop.f32.mrf.mxu2  ;;  %v6083_v0 = vld [vmem:[#allocation4_spill] sm:$0xff] }
 0x4c4   :  { %2780 = vst [vmem:[%s5761_s5 + $0x78] sm:$0xff] %v2643_v36  ;;  %v2160_v53 = vpop.f32.mrf.mxu1  ;;  %2217 = vmatmul.bf16.gmra.mxu1 %v6083_v0  ;;  %v2487_v36 = vadd.f32 %v2486_v23, %v2318_v54  ;;  %v2498_v37 = vpop.f32.mrf.mxu3  ;;  %v2154_v23 = vadd.f32 %v5414_v29, %v2153_v8 }
 0x4c6   :  { %v2323_v56 = vadd.f32 %v2322_v33, %v2154_v23  ;;  %v6088_v33 = vld [vmem:[#allocation97_spill] sm:$0xff] }
 0x4c9   :  { %v2645_v43 = vpop.f32.mrf.mxu0 }
 0x4ca   :  { %v2646_v63 = vadd.f32 %v2645_v43, %v2477_v34  ;;  %v2329_v55 = vpop.f32.mrf.mxu2  ;;  %2386 = vmatmul.bf16.gmra.mxu2 %v6084_v1  ;;  %v6085_v34 = vld [vmem:[#allocation110_spill] sm:$0xff] }
 0x4cc   :  { %2781 = vst [vmem:[%s5761_s5 + $0x80] sm:$0xff] %v2646_v63  ;;  %2684 = vmatmul.bf16.gmra.mxu0 %v6079_v59  ;;  %2555 = vmatmul.bf16.gmra.mxu3 %v6085_v34  ;;  %v2163_v14 = vpop.f32.mrf.mxu1  ;;  %v2489_v63 = vadd.f32 %v2488_v62, %v2320_v5  ;;  %v2501_v59 = vpop.f32.mrf.mxu3  ;;  %v6091_v34 = vld [vmem:[#allocation13_spill] sm:$0xff] }
 0x4d1   :  { %v2647_v38 = vpop.f32.mrf.mxu0 }
 0x4d2   :  { %v2648_v28 = vadd.f32 %v2647_v38, %v2479_v61  ;;  %v2332_v43 = vpop.f32.mrf.mxu2  ;;  %v6087_v38 = vld [vmem:[#allocation7_spill] sm:$0xff] }
 0x4d4   :  { %2782 = vst [vmem:[%s5761_s5 + $0x88] sm:$0xff] %v2648_v28  ;;  %v2165_v61 = vpop.f32.mrf.mxu1  ;;  %2222 = vmatmul.bf16.gmra.mxu1 %v6087_v38  ;;  %v2492_v28 = vadd.f32 %v2491_v57, %v2323_v56  ;;  %v2503_v8 = vpop.f32.mrf.mxu3  ;;  %v2159_v57 = vadd.f32 %v5414_v29, %v2158_v47  ;;  %v6093_v38 = vld [vmem:[#allocation16_spill] sm:$0xff] }
 0x4d9   :  { %v2650_v4 = vpop.f32.mrf.mxu0 }
 0x4da   :  { %v2651_v50 = vadd.f32 %v2650_v4, %v2482_v48  ;;  %v2334_v27 = vpop.f32.mrf.mxu2  ;;  %2391 = vmatmul.bf16.gmra.mxu2 %v5024_v15  ;;  %v2325_v48 = vadd.f32 %v2324_v2, %v2156_v21  ;;  %v2161_v2 = vadd.f32 %v5414_v29, %v2160_v53 }
 0x4dc   :  { %2783 = vst [vmem:[%s5761_s5 + $0x90] sm:$0xff] %v2651_v50  ;;  %2689 = vmatmul.bf16.gmra.mxu0 %v6082_v40  ;;  %2560 = vmatmul.bf16.gmra.mxu3 %v5026_v6  ;;  %v2168_v60 = vpop.f32.mrf.mxu1  ;;  %v2494_v4 = vadd.f32 %v2493_v25, %v2325_v48  ;;  %v2506_v15 = vpop.f32.mrf.mxu3  ;;  %v2328_v40 = vadd.f32 %v2327_v12, %v2159_v57  ;;  %v6090_v12 = vld [vmem:[#allocation100_spill] sm:$0xff] }
 0x4de   :  { %v2497_v31 = vadd.f32 %v2496_v18, %v2328_v40  ;;  %v2164_v18 = vadd.f32 %v5414_v29, %v2163_v14  ;;  %v6092_v14 = vld [vmem:[#allocation103_spill] sm:$0xff] }
 0x4df   :  { %v6095_v40 = vld [vmem:[#allocation19_spill] sm:$0xff] }
 0x4e0   :  { %v2333_v22 = vadd.f32 %v2332_v43, %v2164_v18 }
 0x4e1   :  { %v2652_v35 = vpop.f32.mrf.mxu0 }
 0x4e2   :  { %v2653_v16 = vadd.f32 %v2652_v35, %v2484_v17  ;;  %v2337_v30 = vpop.f32.mrf.mxu2 }
 0x4e4   :  { %2784 = vst [vmem:[%s5761_s5 + $0x98] sm:$0xff] %v2653_v16  ;;  %v2170_v6 = vpop.f32.mrf.mxu1  ;;  %2227 = vmatmul.bf16.gmra.mxu1 %v6089_v9  ;;  %v2508_v47 = vpop.f32.mrf.mxu3  ;;  %v2330_v16 = vadd.f32 %v2329_v55, %v2161_v2  ;;  %v2166_v55 = vadd.f32 %v5414_v29, %v2165_v61 }
 0x4e6   :  { %v2335_v23 = vadd.f32 %v2334_v27, %v2166_v55  ;;  %v2171_v27 = vadd.f32 %v5414_v29, %v2170_v6  ;;  %v6098_v55 = vld [vmem:[#allocation111_spill] sm:$0xff] }
 0x4e9   :  { %v2655_v13 = vpop.f32.mrf.mxu0 }
 0x4ea   :  { %v2656_v3 = vadd.f32 %v2655_v13, %v2487_v36  ;;  %v2339_v17 = vpop.f32.mrf.mxu2  ;;  %2396 = vmatmul.bf16.gmra.mxu2 %v5066_v44  ;;  %v2499_v36 = vadd.f32 %v2498_v37, %v2330_v16  ;;  %v2502_v13 = vadd.f32 %v2501_v59, %v2333_v22 }
 0x4eb   :  { %v2340_v48 = vadd.f32 %v2339_v17, %v2171_v27 }
 0x4ec   :  { %2785 = vst [vmem:[%s5761_s5 + $0xa0] sm:$0xff] %v2656_v3  ;;  %2694 = vmatmul.bf16.gmra.mxu0 %v6086_v19  ;;  %2565 = vmatmul.bf16.gmra.mxu3 %v5068_v7  ;;  %v2173_v54 = vpop.f32.mrf.mxu1  ;;  %v2511_v44 = vpop.f32.mrf.mxu3 }
 0x4ed   :  { %v2174_v57 = vadd.f32 %v5414_v29, %v2173_v54 }
 0x4f1   :  { %v2657_v49 = vpop.f32.mrf.mxu0 }
 0x4f2   :  { %v2658_v24 = vadd.f32 %v2657_v49, %v2489_v63  ;;  %v2342_v0 = vpop.f32.mrf.mxu2  ;;  %v2169_v63 = vadd.f32 %v5414_v29, %v2168_v60  ;;  %v2504_v49 = vadd.f32 %v2503_v8, %v2335_v23 }
 0x4f4   :  { %2786 = vst [vmem:[%s5761_s5 + $0xa8] sm:$0xff] %v2658_v24  ;;  %v2175_v7 = vpop.f32.mrf.mxu1  ;;  %2232 = vmatmul.bf16.gmra.mxu1 %v6091_v34  ;;  %v2513_v19 = vpop.f32.mrf.mxu3  ;;  %v2338_v61 = vadd.f32 %v2337_v30, %v2169_v63 }
 0x4f9   :  { %v2660_v62 = vpop.f32.mrf.mxu0 }
 0x4fa   :  { %v2661_v26 = vadd.f32 %v2660_v62, %v2492_v28  ;;  %v2344_v3 = vpop.f32.mrf.mxu2  ;;  %2401 = vmatmul.bf16.gmra.mxu2 %v5115_v11  ;;  %v2507_v28 = vadd.f32 %v2506_v15, %v2338_v61 }
 0x4fc   :  { %2787 = vst [vmem:[%s5761_s5 + $0xb0] sm:$0xff] %v2661_v26  ;;  %2699 = vmatmul.bf16.gmra.mxu0 %v6088_v33  ;;  %2570 = vmatmul.bf16.gmra.mxu3 %v5117_v39  ;;  %v2178_v43 = vpop.f32.mrf.mxu1  ;;  %v2516_v11 = vpop.f32.mrf.mxu3  ;;  %v6094_v33 = vld [vmem:[#allocation106_spill] sm:$0xff] }
 0x4fd   :  { %v2179_v16 = vadd.f32 %v5414_v29, %v2178_v43 }
 0x501   :  { %v2662_v50 = vpop.f32.mrf.mxu0 }
 0x502   :  { %v2663_v46 = vadd.f32 %v2662_v50, %v2494_v4  ;;  %v2347_v59 = vpop.f32.mrf.mxu2  ;;  %v2509_v4 = vadd.f32 %v2508_v47, %v2340_v48 }
 0x504   :  { %2788 = vst [vmem:[%s5761_s5 + $0xb8] sm:$0xff] %v2663_v46  ;;  %v2180_v39 = vpop.f32.mrf.mxu1  ;;  %2237 = vmatmul.bf16.gmra.mxu1 %v6093_v38  ;;  %v2518_v62 = vpop.f32.mrf.mxu3  ;;  %v2343_v46 = vadd.f32 %v2342_v0, %v2174_v57 }
 0x506   :  { %v2512_v6 = vadd.f32 %v2511_v44, %v2343_v46  ;;  %v2348_v44 = vadd.f32 %v2347_v59, %v2179_v16 }
 0x509   :  { %v2665_v25 = vpop.f32.mrf.mxu0 }
 0x50a   :  { %v2666_v35 = vadd.f32 %v2665_v25, %v2497_v31  ;;  %v2349_v21 = vpop.f32.mrf.mxu2  ;;  %2406 = vmatmul.bf16.gmra.mxu2 %v5152_v45  ;;  %v2176_v31 = vadd.f32 %v5414_v29, %v2175_v7  ;;  %v6096_v25 = vld [vmem:[#allocation108_spill] sm:$0xff]  ;;  %v2181_v7 = vadd.f32 %v5414_v29, %v2180_v39 }
 0x50c   :  { %2789 = vst [vmem:[%s5761_s5 + $0xc0] sm:$0xff] %v2666_v35  ;;  %2704 = vmatmul.bf16.gmra.mxu0 %v6090_v12  ;;  %2575 = vmatmul.bf16.gmra.mxu3 %v5154_v41  ;;  %v2183_v60 = vpop.f32.mrf.mxu1  ;;  %v2521_v45 = vpop.f32.mrf.mxu3  ;;  %v2345_v35 = vadd.f32 %v2344_v3, %v2176_v31 }
 0x50e   :  { %v2514_v18 = vadd.f32 %v2513_v19, %v2345_v35  ;;  %v2350_v19 = vadd.f32 %v2349_v21, %v2181_v7 }
 0x510   :  { %v2519_v23 = vadd.f32 %v2518_v62, %v2350_v19 }
 0x511   :  { %v2667_v1 = vpop.f32.mrf.mxu0 }
 0x512   :  { %v2668_v53 = vadd.f32 %v2667_v1, %v2499_v36  ;;  %v2352_v30 = vpop.f32.mrf.mxu2  ;;  %v6097_v1 = vld [vmem:[#allocation22_spill] sm:$0xff] }
 0x514   :  { %2790 = vst [vmem:[%s5761_s5 + $0xc8] sm:$0xff] %v2668_v53  ;;  %v2185_v41 = vpop.f32.mrf.mxu1  ;;  %2242 = vmatmul.bf16.gmra.mxu1 %v6095_v40  ;;  %v2523_v17 = vpop.f32.mrf.mxu3  ;;  %v2517_v53 = vadd.f32 %v2516_v11, %v2348_v44 }
 0x519   :  { %v2670_v37 = vpop.f32.mrf.mxu0 }
 0x51a   :  { %v2671_v5 = vadd.f32 %v2670_v37, %v2502_v13  ;;  %v2354_v9 = vpop.f32.mrf.mxu2  ;;  %2411 = vmatmul.bf16.gmra.mxu2 %v5189_v58 }
 0x51c   :  { %2791 = vst [vmem:[%s5761_s5 + $0xd0] sm:$0xff] %v2671_v5  ;;  %2709 = vmatmul.bf16.gmra.mxu0 %v6092_v14  ;;  %2580 = vmatmul.bf16.gmra.mxu3 %v5191_v20  ;;  %v2188_v12 = vpop.f32.mrf.mxu1  ;;  %v2526_v58 = vpop.f32.mrf.mxu3  ;;  %v2184_v5 = vadd.f32 %v5414_v29, %v2183_v60 }
 0x51d   :  { %v2189_v27 = vadd.f32 %v5414_v29, %v2188_v12 }
 0x51e   :  { %v2353_v59 = vadd.f32 %v2352_v30, %v2184_v5 }
 0x520   :  { %v2522_v11 = vadd.f32 %v2521_v45, %v2353_v59 }
 0x521   :  { %v2672_v24 = vpop.f32.mrf.mxu0 }
 0x522   :  { %v2673_v56 = vadd.f32 %v2672_v24, %v2504_v49  ;;  %v2357_v54 = vpop.f32.mrf.mxu2  ;;  %v6099_v49 = vld [vmem:[#allocation25_spill] sm:$0xff] }
 0x523   :  { %v2358_v48 = vadd.f32 %v2357_v54, %v2189_v27 }
 0x524   :  { %2792 = vst [vmem:[%s5761_s5 + $0xd8] sm:$0xff] %v2673_v56  ;;  %v2190_v20 = vpop.f32.mrf.mxu1  ;;  %2247 = vmatmul.bf16.gmra.mxu1 %v6097_v1  ;;  %v2528_v34 = vpop.f32.mrf.mxu3  ;;  %v2186_v56 = vadd.f32 %v5414_v29, %v2185_v41 }
 0x525   :  { %v2527_v60 = vadd.f32 %v2526_v58, %v2358_v48  ;;  %v2191_v30 = vadd.f32 %v5414_v29, %v2190_v20  ;;  %v6101_v58 = vld [vmem:[#allocation113_spill] sm:$0xff] }
 0x529   :  { %v2675_v8 = vpop.f32.mrf.mxu0 }
 0x52a   :  { %v2676_v26 = vadd.f32 %v2675_v8, %v2507_v28  ;;  %v2359_v22 = vpop.f32.mrf.mxu2  ;;  %2416 = vmatmul.bf16.gmra.mxu2 %v5224_v52  ;;  %v2355_v28 = vadd.f32 %v2354_v9, %v2186_v56 }
 0x52c   :  { %2793 = vst [vmem:[%s5761_s5 + $0xe0] sm:$0xff] %v2676_v26  ;;  %2714 = vmatmul.bf16.gmra.mxu0 %v6094_v33  ;;  %2585 = vmatmul.bf16.gmra.mxu3 %v5226_v32  ;;  %v2193_v37 = vpop.f32.mrf.mxu1  ;;  %v2531_v52 = vpop.f32.mrf.mxu3  ;;  %v2524_v8 = vadd.f32 %v2523_v17, %v2355_v28 }
 0x52d   :  { %v2194_v41 = vadd.f32 %v5414_v29, %v2193_v37 }
 0x531   :  { %v2677_v15 = vpop.f32.mrf.mxu0 }
 0x532   :  { %v2678_v50 = vadd.f32 %v2677_v15, %v2509_v4  ;;  %v2362_v14 = vpop.f32.mrf.mxu2  ;;  %v6100_v15 = vld [vmem:[#allocation112_spill] sm:$0xff] }
 0x534   :  { %2794 = vst [vmem:[%s5761_s5 + $0xe8] sm:$0xff] %v2678_v50  ;;  %v2195_v32 = vpop.f32.mrf.mxu1  ;;  %2252 = vmatmul.bf16.gmra.mxu1 %v6099_v49  ;;  %v2533_v61 = vpop.f32.mrf.mxu3  ;;  %v2360_v50 = vadd.f32 %v2359_v22, %v2191_v30 }
 0x535   :  { %v2196_v12 = vadd.f32 %v5414_v29, %v2195_v32 }
 0x539   :  { %v2680_v2 = vpop.f32.mrf.mxu0 }
 0x53a   :  { %v2681_v47 = vadd.f32 %v2680_v2, %v2512_v6  ;;  %v2364_v24 = vpop.f32.mrf.mxu2  ;;  %2421 = vmatmul.bf16.gmra.mxu2 %v5259_v10  ;;  %v2529_v6 = vadd.f32 %v2528_v34, %v2360_v50  ;;  %v2363_v2 = vadd.f32 %v2362_v14, %v2194_v41  ;;  %v6104_v41 = vld [vmem:[#allocation116_spill] sm:$0xff] }
 0x53c   :  { %2795 = vst [vmem:[%s5761_s5 + $0xf0] sm:$0xff] %v2681_v47  ;;  %2719 = vmatmul.bf16.gmra.mxu0 %v6096_v25  ;;  %2590 = vmatmul.bf16.gmra.mxu3 %v5261_v42  ;;  %v2198_v21 = vpop.f32.mrf.mxu1  ;;  %v2536_v10 = vpop.f32.mrf.mxu3  ;;  %v2532_v25 = vadd.f32 %v2531_v52, %v2363_v2 }
 0x53d   :  { %v2199_v44 = vadd.f32 %v5414_v29, %v2198_v21 }
 0x541   :  { %v2682_v0 = vpop.f32.mrf.mxu0 }
 0x542   :  { %v2683_v36 = vadd.f32 %v2682_v0, %v2514_v18  ;;  %v2367_v62 = vpop.f32.mrf.mxu2  ;;  %v2365_v0 = vadd.f32 %v2364_v24, %v2196_v12 }
 0x543   :  { %v2368_v34 = vadd.f32 %v2367_v62, %v2199_v44  ;;  %v6103_v62 = vld [vmem:[#allocation115_spill] sm:$0xff] }
 0x544   :  { %2796 = vst [vmem:[%s5761_s5 + $0xf8] sm:$0xff] %v2683_v36  ;;  %v2200_v42 = vpop.f32.mrf.mxu1  ;;  %v2534_v1 = vadd.f32 %v2533_v61, %v2365_v0 }
 0x545   :  { %v2201_v19 = vadd.f32 %v5414_v29, %v2200_v42 }
 0x549   :  { %v2685_v13 = vpop.f32.mrf.mxu0 }
 0x54a   :  { %v2686_v3 = vadd.f32 %v2685_v13, %v2517_v53  ;;  %v2369_v57 = vpop.f32.mrf.mxu2 }
 0x54b   :  { %v2370_v52 = vadd.f32 %v2369_v57, %v2201_v19 }
 0x54c   :  { %2797 = vst [vmem:[%s5761_s5 + $0x100] sm:$0xff] %v2686_v3  ;;  %2724 = vmatmul.bf16.gmra.mxu0 %v6098_v55  ;;  %v2203_v46 = vpop.f32.mrf.mxu1  ;;  %v2537_v3 = vadd.f32 %v2536_v10, %v2368_v34 }
 0x551   :  { %v2687_v43 = vpop.f32.mrf.mxu0 }
 0x552   :  { %v2688_v63 = vadd.f32 %v2687_v43, %v2519_v23  ;;  %v2372_v40 = vpop.f32.mrf.mxu2  ;;  %v6102_v23 = vld [vmem:[#allocation114_spill] sm:$0xff] }
 0x554   :  { %2798 = vst [vmem:[%s5761_s5 + $0x108] sm:$0xff] %v2688_v63  ;;  %v2205_v47 = vpop.f32.mrf.mxu1  ;;  %v2204_v63 = vadd.f32 %v5414_v29, %v2203_v46 }
 0x556   :  { %v2373_v24 = vadd.f32 %v2372_v40, %v2204_v63 }
 0x559   :  { %v2690_v39 = vpop.f32.mrf.mxu0 }
 0x55a   :  { %v2691_v38 = vadd.f32 %v2690_v39, %v2522_v11  ;;  %v2374_v35 = vpop.f32.mrf.mxu2 }
 0x55c   :  { %2799 = vst [vmem:[%s5761_s5 + $0x110] sm:$0xff] %v2691_v38  ;;  %2729 = vmatmul.bf16.gmra.mxu0 %v5028_v51  ;;  %v2538_v51 = vpop.f32.mrf.mxu3  ;;  %v2208_v36 = vpop.f32.mrf.mxu1  ;;  %v2206_v38 = vadd.f32 %v5414_v29, %v2205_v47 }
 0x55d   :  { %v2539_v32 = vadd.f32 %v2538_v51, %v2370_v52 }
 0x561   :  { %v2692_v26 = vpop.f32.mrf.mxu0 }
 0x562   :  { %v2693_v33 = vadd.f32 %v2692_v26, %v2524_v8  ;;  %v2377_v20 = vpop.f32.mrf.mxu2  ;;  %v2375_v8 = vadd.f32 %v2374_v35, %v2206_v38  ;;  %v2209_v26 = vadd.f32 %v5414_v29, %v2208_v36  ;;  %v6105_v36 = vld [vmem:[#allocation117_spill] sm:$0xff] }
 0x564   :  { %2800 = vst [vmem:[%s5761_s5 + $0x118] sm:$0xff] %v2693_v33  ;;  %v2541_v9 = vpop.f32.mrf.mxu3  ;;  %v2210_v13 = vpop.f32.mrf.mxu1  ;;  %v2378_v57 = vadd.f32 %v2377_v20, %v2209_v26 }
 0x565   :  { %v2542_v39 = vadd.f32 %v2541_v9, %v2373_v24 }
 0x569   :  { %v2695_v4 = vpop.f32.mrf.mxu0 }
 0x56a   :  { %v2696_v45 = vadd.f32 %v2695_v4, %v2527_v60  ;;  %v2379_v55 = vpop.f32.mrf.mxu2 }
 0x56c   :  { %2801 = vst [vmem:[%s5761_s5 + $0x120] sm:$0xff] %v2696_v45  ;;  %2734 = vmatmul.bf16.gmra.mxu0 %v6100_v15  ;;  %v2543_v16 = vpop.f32.mrf.mxu3  ;;  %v2213_v43 = vpop.f32.mrf.mxu1  ;;  %v2211_v45 = vadd.f32 %v5414_v29, %v2210_v13 }
 0x56d   :  { %v2544_v48 = vadd.f32 %v2543_v16, %v2375_v8  ;;  %v2214_v9 = vadd.f32 %v5414_v29, %v2213_v43 }
 0x56e   :  { %v2380_v40 = vadd.f32 %v2379_v55, %v2211_v45 }
 0x571   :  { %v2697_v31 = vpop.f32.mrf.mxu0 }
 0x572   :  { %v2698_v17 = vadd.f32 %v2697_v31, %v2529_v6  ;;  %v2382_v59 = vpop.f32.mrf.mxu2 }
 0x574   :  { %2802 = vst [vmem:[%s5761_s5 + $0x128] sm:$0xff] %v2698_v17  ;;  %v2546_v53 = vpop.f32.mrf.mxu3  ;;  %v2215_v61 = vpop.f32.mrf.mxu1 }
 0x575   :  { %v2547_v51 = vadd.f32 %v2546_v53, %v2378_v57 }
 0x579   :  { %v2700_v54 = vpop.f32.mrf.mxu0 }
 0x57a   :  { %v2701_v18 = vadd.f32 %v2700_v54, %v2532_v25  ;;  %v2384_v21 = vpop.f32.mrf.mxu2  ;;  %v2383_v25 = vadd.f32 %v2382_v59, %v2214_v9  ;;  %v2216_v54 = vadd.f32 %v5414_v29, %v2215_v61 }
 0x57c   :  { %2803 = vst [vmem:[%s5761_s5 + $0x130] sm:$0xff] %v2701_v18  ;;  %2739 = vmatmul.bf16.gmra.mxu0 %v6101_v58  ;;  %v2548_v5 = vpop.f32.mrf.mxu3  ;;  %v2218_v33 = vpop.f32.mrf.mxu1  ;;  %v2385_v44 = vadd.f32 %v2384_v21, %v2216_v54 }
 0x57d   :  { %v2549_v31 = vadd.f32 %v2548_v5, %v2380_v40 }
 0x581   :  { %v2702_v22 = vpop.f32.mrf.mxu0 }
 0x582   :  { %v2703_v7 = vadd.f32 %v2702_v22, %v2534_v1  ;;  %v2387_v30 = vpop.f32.mrf.mxu2  ;;  %v2219_v1 = vadd.f32 %v5414_v29, %v2218_v33 }
 0x584   :  { %2804 = vst [vmem:[%s5761_s5 + $0x138] sm:$0xff] %v2703_v7  ;;  %v2551_v56 = vpop.f32.mrf.mxu3  ;;  %v2220_v50 = vpop.f32.mrf.mxu1  ;;  %v2388_v13 = vadd.f32 %v2387_v30, %v2219_v1 }
 0x585   :  { %v2552_v12 = vadd.f32 %v2551_v56, %v2383_v25 }
 0x589   :  { %v2705_v37 = vpop.f32.mrf.mxu0 }
 0x58a   :  { %v2706_v14 = vadd.f32 %v2705_v37, %v2537_v3  ;;  %v2389_v6 = vpop.f32.mrf.mxu2  ;;  %v5691_v37 = vld [vmem:[%s5760_s4] ss:$0 sm:$0xff] }
 0x58b   :  { %v2221_v5 = vadd.f32 %v5691_v37, %v2220_v50 }
 0x58c   :  { %2805 = vst [vmem:[%s5761_s5 + $0x140] sm:$0xff] %v2706_v14  ;;  %2744 = vmatmul.bf16.gmra.mxu0 %v6102_v23  ;;  %v2553_v10 = vpop.f32.mrf.mxu3  ;;  %v2223_v35 = vpop.f32.mrf.mxu1 }
 0x58d   :  { %v2554_v53 = vadd.f32 %v2553_v10, %v2385_v44  ;;  %v2390_v52 = vadd.f32 %v2389_v6, %v2221_v5  ;;  %v2224_v43 = vadd.f32 %v5691_v37, %v2223_v35 }
 0x591   :  { %v2707_v49 = vpop.f32.mrf.mxu0 }
 0x592   :  { %v2708_v11 = vadd.f32 %v2707_v49, %v2539_v32  ;;  %v2392_v16 = vpop.f32.mrf.mxu2 }
 0x593   :  { %v2393_v24 = vadd.f32 %v2392_v16, %v2224_v43 }
 0x594   :  { %2806 = vst [vmem:[%s5761_s5 + $0x148] sm:$0xff] %v2708_v11  ;;  %v2556_v4 = vpop.f32.mrf.mxu3  ;;  %v2225_v20 = vpop.f32.mrf.mxu1 }
 0x595   :  { %v2557_v55 = vadd.f32 %v2556_v4, %v2388_v13 }
 0x599   :  { %v2710_v28 = vpop.f32.mrf.mxu0 }
 0x59a   :  { %v2711_v27 = vadd.f32 %v2710_v28, %v2542_v39  ;;  %v2394_v7 = vpop.f32.mrf.mxu2  ;;  %v2226_v39 = vadd.f32 %v5691_v37, %v2225_v20 }
 0x59c   :  { %2807 = vst [vmem:[%s5761_s5 + $0x150] sm:$0xff] %v2711_v27  ;;  %2749 = vmatmul.bf16.gmra.mxu0 %v6103_v62  ;;  %v2558_v2 = vpop.f32.mrf.mxu3  ;;  %v2228_v19 = vpop.f32.mrf.mxu1  ;;  %v2395_v62 = vadd.f32 %v2394_v7, %v2226_v39 }
 0x59d   :  { %v2559_v59 = vadd.f32 %v2558_v2, %v2390_v52  ;;  %v2229_v8 = vadd.f32 %v5691_v37, %v2228_v19 }
 0x5a1   :  { %v2712_v42 = vpop.f32.mrf.mxu0 }
 0x5a2   :  { %v2713_v60 = vadd.f32 %v2712_v42, %v2544_v48  ;;  %v2397_v23 = vpop.f32.mrf.mxu2 }
 0x5a3   :  { %v2398_v42 = vadd.f32 %v2397_v23, %v2229_v8 }
 0x5a4   :  { %2808 = vst [vmem:[%s5761_s5 + $0x158] sm:$0xff] %v2713_v60  ;;  %v2561_v0 = vpop.f32.mrf.mxu3  ;;  %v2230_v49 = vpop.f32.mrf.mxu1 }
 0x5a5   :  { %v2562_v61 = vadd.f32 %v2561_v0, %v2393_v24 }
 0x5a9   :  { %v2715_v15 = vpop.f32.mrf.mxu0 }
 0x5aa   :  { %v2716_v46 = vadd.f32 %v2715_v15, %v2547_v51  ;;  %v2399_v56 = vpop.f32.mrf.mxu2  ;;  %v2231_v51 = vadd.f32 %v5691_v37, %v2230_v49 }
 0x5ac   :  { %2809 = vst [vmem:[%s5761_s5 + $0x160] sm:$0xff] %v2716_v46  ;;  %2754 = vmatmul.bf16.gmra.mxu0 %v6104_v41  ;;  %v2563_v3 = vpop.f32.mrf.mxu3  ;;  %v2233_v27 = vpop.f32.mrf.mxu1  ;;  %v2400_v50 = vadd.f32 %v2399_v56, %v2231_v51 }
 0x5ad   :  { %v2564_v26 = vadd.f32 %v2563_v3, %v2395_v62  ;;  %v2234_v41 = vadd.f32 %v5691_v37, %v2233_v27 }
 0x5b1   :  { %v2717_v17 = vpop.f32.mrf.mxu0 }
 0x5b2   :  { %v2718_v47 = vadd.f32 %v2717_v17, %v2549_v31  ;;  %v2402_v10 = vpop.f32.mrf.mxu2 }
 0x5b3   :  { %v2403_v17 = vadd.f32 %v2402_v10, %v2234_v41 }
 0x5b4   :  { %2810 = vst [vmem:[%s5761_s5 + $0x168] sm:$0xff] %v2718_v47  ;;  %v2566_v63 = vpop.f32.mrf.mxu3  ;;  %v2235_v57 = vpop.f32.mrf.mxu1 }
 0x5b5   :  { %v2567_v30 = vadd.f32 %v2566_v63, %v2398_v42  ;;  %v2236_v35 = vadd.f32 %v5691_v37, %v2235_v57 }
 0x5b9   :  { %v2720_v18 = vpop.f32.mrf.mxu0 }
 0x5ba   :  { %v2721_v58 = vadd.f32 %v2720_v18, %v2552_v12  ;;  %v2404_v45 = vpop.f32.mrf.mxu2 }
 0x5bb   :  { %v2405_v18 = vadd.f32 %v2404_v45, %v2236_v35 }
 0x5bc   :  { %2811 = vst [vmem:[%s5761_s5 + $0x170] sm:$0xff] %v2721_v58  ;;  %2759 = vmatmul.bf16.gmra.mxu0 %v6105_v36  ;;  %v2568_v28 = vpop.f32.mrf.mxu3  ;;  %v2238_v40 = vpop.f32.mrf.mxu1 }
 0x5bd   :  { %v2569_v6 = vadd.f32 %v2568_v28, %v2400_v50  ;;  %v2239_v0 = vadd.f32 %v5691_v37, %v2238_v40 }
 0x5c1   :  { %v2722_v22 = vpop.f32.mrf.mxu0 }
 0x5c2   :  { %v2723_v34 = vadd.f32 %v2722_v22, %v2554_v53  ;;  %v2407_v2 = vpop.f32.mrf.mxu2 }
 0x5c3   :  { %v2408_v53 = vadd.f32 %v2407_v2, %v2239_v0 }
 0x5c4   :  { %2812 = vst [vmem:[%s5761_s5 + $0x178] sm:$0xff] %v2723_v34  ;;  %v2571_v60 = vpop.f32.mrf.mxu3  ;;  %v2240_v16 = vpop.f32.mrf.mxu1 }
 0x5c5   :  { %v2572_v47 = vadd.f32 %v2571_v60, %v2403_v17  ;;  %v2241_v13 = vadd.f32 %v5691_v37, %v2240_v16 }
 0x5c9   :  { %v2725_v29 = vpop.f32.mrf.mxu0 }
 0x5ca   :  { %v2726_v14 = vadd.f32 %v2725_v29, %v2557_v55  ;;  %v2409_v58 = vpop.f32.mrf.mxu2 }
 0x5cb   :  { %v2410_v5 = vadd.f32 %v2409_v58, %v2241_v13 }
 0x5cc   :  { %2813 = vst [vmem:[%s5761_s5 + $0x180] sm:$0xff] %v2726_v14  ;;  %v2573_v46 = vpop.f32.mrf.mxu3  ;;  %v2243_v22 = vpop.f32.mrf.mxu1 }
 0x5cd   :  { %v2574_v36 = vadd.f32 %v2573_v46, %v2405_v18  ;;  %v2244_v14 = vadd.f32 %v5691_v37, %v2243_v22 }
 0x5d1   :  { %v2727_v32 = vpop.f32.mrf.mxu0 }
 0x5d2   :  { %v2728_v11 = vadd.f32 %v2727_v32, %v2559_v59  ;;  %v2412_v34 = vpop.f32.mrf.mxu2 }
 0x5d3   :  { %v2413_v59 = vadd.f32 %v2412_v34, %v2244_v14 }
 0x5d4   :  { %2814 = vst [vmem:[%s5761_s5 + $0x188] sm:$0xff] %v2728_v11  ;;  %v2576_v25 = vpop.f32.mrf.mxu3  ;;  %v2245_v29 = vpop.f32.mrf.mxu1 }
 0x5d5   :  { %v2577_v7 = vadd.f32 %v2576_v25, %v2408_v53  ;;  %v2246_v24 = vadd.f32 %v5691_v37, %v2245_v29 }
 0x5d9   :  { %v2730_v38 = vpop.f32.mrf.mxu0 }
 0x5da   :  { %v2731_v21 = vadd.f32 %v2730_v38, %v2562_v61  ;;  %v2414_v43 = vpop.f32.mrf.mxu2 }
 0x5db   :  { %v2415_v38 = vadd.f32 %v2414_v43, %v2246_v24 }
 0x5dc   :  { %2815 = vst [vmem:[%s5761_s5 + $0x190] sm:$0xff] %v2731_v21  ;;  %v2578_v20 = vpop.f32.mrf.mxu3  ;;  %v2248_v11 = vpop.f32.mrf.mxu1 }
 0x5dd   :  { %v2579_v23 = vadd.f32 %v2578_v20, %v2410_v5  ;;  %v2249_v28 = vadd.f32 %v5691_v37, %v2248_v11 }
 0x5e1   :  { %v2732_v33 = vpop.f32.mrf.mxu0 }
 0x5e2   :  { %v2733_v48 = vadd.f32 %v2732_v33, %v2564_v26  ;;  %v2417_v39 = vpop.f32.mrf.mxu2 }
 0x5e3   :  { %v2418_v26 = vadd.f32 %v2417_v39, %v2249_v28 }
 0x5e4   :  { %2816 = vst [vmem:[%s5761_s5 + $0x198] sm:$0xff] %v2733_v48  ;;  %v2581_v19 = vpop.f32.mrf.mxu3  ;;  %v2250_v8 = vpop.f32.mrf.mxu1 }
 0x5e5   :  { %v2582_v49 = vadd.f32 %v2581_v19, %v2413_v59  ;;  %v2251_v42 = vadd.f32 %v5691_v37, %v2250_v8 }
 0x5e9   :  { %v2735_v4 = vpop.f32.mrf.mxu0 }
 0x5ea   :  { %v2736_v15 = vadd.f32 %v2735_v4, %v2567_v30  ;;  %v2419_v33 = vpop.f32.mrf.mxu2 }
 0x5eb   :  { %v2420_v4 = vadd.f32 %v2419_v33, %v2251_v42 }
 0x5ec   :  { %2817 = vst [vmem:[%s5761_s5 + $0x1a0] sm:$0xff] %v2736_v15  ;;  %v2583_v32 = vpop.f32.mrf.mxu3  ;;  %v2253_v51 = vpop.f32.mrf.mxu1 }
 0x5ed   :  { %v2584_v27 = vadd.f32 %v2583_v32, %v2415_v38  ;;  %v2254_v45 = vadd.f32 %v5691_v37, %v2253_v51 }
 0x5f1   :  { %v2737_v9 = vpop.f32.mrf.mxu0 }
 0x5f2   :  { %v2738_v31 = vadd.f32 %v2737_v9, %v2569_v6  ;;  %v2422_v15 = vpop.f32.mrf.mxu2 }
 0x5f3   :  { %v2423_v40 = vadd.f32 %v2422_v15, %v2254_v45 }
 0x5f4   :  { %2818 = vst [vmem:[%s5761_s5 + $0x1a8] sm:$0xff] %v2738_v31  ;;  %v2586_v21 = vpop.f32.mrf.mxu3  ;;  %v2255_v9 = vpop.f32.mrf.mxu1 }
 0x5f5   :  { %v2587_v48 = vadd.f32 %v2586_v21, %v2418_v26  ;;  %v2256_v17 = vadd.f32 %v5691_v37, %v2255_v9 }
 0x5f9   :  { %v2740_v12 = vpop.f32.mrf.mxu0 }
 0x5fa   :  { %v2741_v54 = vadd.f32 %v2740_v12, %v2572_v47  ;;  %v2424_v47 = vpop.f32.mrf.mxu2 }
 0x5fb   :  { %v2425_v35 = vadd.f32 %v2424_v47, %v2256_v17 }
 0x5fc   :  { %2819 = vst [vmem:[%s5761_s5 + $0x1b0] sm:$0xff] %v2741_v54  ;;  %v2588_v57 = vpop.f32.mrf.mxu3 }
 0x5fd   :  { %v2589_v50 = vadd.f32 %v2588_v57, %v2420_v4 }
 0x601   :  { %v2742_v44 = vpop.f32.mrf.mxu0 }
 0x602   :  { %v2743_v1 = vadd.f32 %v2742_v44, %v2574_v36 }
 0x604   :  { %2820 = vst [vmem:[%s5761_s5 + $0x1b8] sm:$0xff] %v2743_v1  ;;  %v2591_v6 = vpop.f32.mrf.mxu3 }
 0x605   :  { %v2592_v31 = vadd.f32 %v2591_v6, %v2423_v40 }
 0x609   :  { %v2745_v3 = vpop.f32.mrf.mxu0 }
 0x60a   :  { %v2746_v55 = vadd.f32 %v2745_v3, %v2577_v7 }
 0x60c   :  { %2821 = vst [vmem:[%s5761_s5 + $0x1c0] sm:$0xff] %v2746_v55  ;;  %v2593_v12 = vpop.f32.mrf.mxu3 }
 0x60d   :  { %v2594_v16 = vadd.f32 %v2593_v12, %v2425_v35 }
 0x611   :  { %v2747_v52 = vpop.f32.mrf.mxu0 }
 0x612   :  { %v2748_v63 = vadd.f32 %v2747_v52, %v2579_v23 }
 0x614   :  { %2822 = vst [vmem:[%s5761_s5 + $0x1c8] sm:$0xff] %v2748_v63 }
 0x619   :  { %v2750_v56 = vpop.f32.mrf.mxu0 }
 0x61a   :  { %v2751_v61 = vadd.f32 %v2750_v56, %v2582_v49 }
 0x61c   :  { %2823 = vst [vmem:[%s5761_s5 + $0x1d0] sm:$0xff] %v2751_v61 }
 0x621   :  { %v2752_v62 = vpop.f32.mrf.mxu0 }
 0x622   :  { %v2753_v10 = vadd.f32 %v2752_v62, %v2584_v27 }
 0x624   :  { %2824 = vst [vmem:[%s5761_s5 + $0x1d8] sm:$0xff] %v2753_v10 }
 0x629   :  { %v2755_v60 = vpop.f32.mrf.mxu0 }
 0x62a   :  { %v2756_v30 = vadd.f32 %v2755_v60, %v2587_v48 }
 0x62c   :  { %2825 = vst [vmem:[%s5761_s5 + $0x1e0] sm:$0xff] %v2756_v30 }
 0x631   :  { %v2757_v46 = vpop.f32.mrf.mxu0 }
 0x632   :  { %v2758_v41 = vadd.f32 %v2757_v46, %v2589_v50 }
 0x634   :  { %2826 = vst [vmem:[%s5761_s5 + $0x1e8] sm:$0xff] %v2758_v41 }
 0x639   :  { %v2760_v2 = vpop.f32.mrf.mxu0 }
 0x63a   :  { %v2761_v25 = vadd.f32 %v2760_v2, %v2592_v31 }
 0x63c   :  { %2827 = vst [vmem:[%s5761_s5 + $0x1f0] sm:$0xff] %v2761_v25 }
 0x641   :  { %v2762_v54 = vpop.f32.mrf.mxu0 }
 0x642   :  { %v2763_v18 = vadd.f32 %v2762_v54, %v2594_v16 }
 0x644   :  { %2828 = vst [vmem:[%s5761_s5 + $0x1f8] sm:$0xff] %v2763_v18 }

</bundles_post_ra>
